<compile_context>
chip_gen: v7x
topology: tpu7x:2x2x1
jax: 0.10.0
libtpu: 0.0.40
codegen_flags: <defaults>
</compile_context>

<pallas_src>
import functools
import math

import jax
import jax.numpy as jnp
from jax import lax
from jax.experimental import pallas as pl
from jax.experimental.pallas import tpu as pltpu

NEG_INF = -1e30
_EPS = 1e-5


def _rup(n, m=128):
    return ((n + m - 1) // m) * m


# ----------------------------- in-kernel helpers -----------------------------

def _softmax_last(s):
    """Softmax over last dim; EUP approx reciprocal for the denominator."""
    m = jnp.max(s, axis=-1, keepdims=True)
    e = jnp.exp(s - m)
    return e * pl.reciprocal(jnp.sum(e, axis=-1, keepdims=True), approx=True)


def _layernorm_padded(h, gamma, beta, real_width):
    """LayerNorm over a 128-padded last dim whose padded lanes are exactly 0.

    Uses E[x^2] - mu^2 so no lane mask is needed; gamma/beta are 0 in the
    padded lanes, so the padded output lanes stay exactly 0.
    """
    inv = 1.0 / float(real_width)
    mu = jnp.sum(h, axis=-1, keepdims=True) * inv
    m2 = jnp.sum(h * h, axis=-1, keepdims=True) * inv
    var = jnp.maximum(m2 - mu * mu, 0.0)
    return gamma * (h - mu) * lax.rsqrt(var + _EPS) + beta


# --------------------------------- the kernel --------------------------------

def head_attention_kernel(
    x_ref,        # (G*N, F)                     f32
    wqkv1_ref,    # (F, 3*H*DP)                  bf16  [Q_h0|Q_h1|K_h0|K_h1|V_h0|V_h1], 128-padded segments
    wl_ref,       # (H*DP, DP)                   bf16
    wpack_ref,    # (max(DP,D2P,SDP), 3*D2P+SDP+OP) bf16  [att2 QKV | ffw1 | ffw2]
    bias_ref,     # (1, 3*H*DP + 3*DP + 3*D2P + 2*D2P... ) f32 packed biases / LN params
    out_ref,      # (G, OP)                      f32
    *, heads, d_model, n_nodes, dp, d2p, sdp, op,
):
    gn, _ = x_ref.shape
    n = n_nodes
    g = gn // n
    hdp = heads * dp

    # static offsets inside the packed bias vector (all multiples of 128)
    o_bqkv1 = 0
    o_bl = o_bqkv1 + 3 * hdp
    o_g1 = o_bl + dp
    o_be1 = o_g1 + dp
    o_bqkv2 = o_be1 + dp
    o_g2 = o_bqkv2 + 3 * d2p
    o_be2 = o_g2 + d2p
    o_b1 = o_be2 + d2p
    o_b2 = o_b1 + sdp

    x = x_ref[...].astype(jnp.bfloat16)                               # (G*N, F)

    # ---- fused, lane-aligned QKV projection for both heads (one matmul) ----
    # (1/sqrt(d_model) is folded into the Q columns/bias host-side.)
    qkv1 = (jnp.dot(x, wqkv1_ref[...], preferred_element_type=jnp.float32)
            + bias_ref[:, o_bqkv1:o_bqkv1 + 3 * hdp])                 # (G*N, 3*H*DP)
    qkv1 = qkv1.reshape(g, n, 3 * hdp)

    # ---- per-head attention, batched over the G graphs of this grid step ----
    outs = []
    for h in range(heads):                                            # static unroll (H=2)
        q = qkv1[:, :, h * dp:(h + 1) * dp].astype(jnp.bfloat16)
        k = qkv1[:, :, (heads + h) * dp:(heads + h + 1) * dp].astype(jnp.bfloat16)
        v = qkv1[:, :, (2 * heads + h) * dp:(2 * heads + h + 1) * dp].astype(jnp.bfloat16)
        s = jnp.einsum('gnd,gmd->gnm', q, k,
                       preferred_element_type=jnp.float32)            # (G, N, N)
        p = _softmax_last(s).astype(jnp.bfloat16)
        outs.append(jnp.einsum('gnm,gmd->gnd', p, v,
                               preferred_element_type=jnp.float32))   # (G, N, DP)

    # ---- lin(): one matmul on the lane-concatenated (128-aligned) head outs ----
    o_cat = jnp.concatenate(outs, axis=-1).reshape(gn, hdp).astype(jnp.bfloat16)
    hlin = (jnp.dot(o_cat, wl_ref[...], preferred_element_type=jnp.float32)
            + bias_ref[:, o_bl:o_bl + dp])                            # (G*N, DP)

    # ---- LayerNorm(d_model) -> ReLU (dropout = identity) ----
    h1 = jnp.maximum(
        _layernorm_padded(hlin, bias_ref[:, o_g1:o_g1 + dp],
                          bias_ref[:, o_be1:o_be1 + dp], d_model), 0.0)

    # ---- second attention block (d_model -> 2*d_model), fused + padded ----
    qkv2 = (jnp.dot(h1.astype(jnp.bfloat16), wpack_ref[0:dp, 0:3 * d2p],
                    preferred_element_type=jnp.float32)
            + bias_ref[:, o_bqkv2:o_bqkv2 + 3 * d2p])                 # (G*N, 3*D2P)
    qkv2 = qkv2.reshape(g, n, 3 * d2p)
    q2 = qkv2[:, :, 0:d2p].astype(jnp.bfloat16)
    k2 = qkv2[:, :, d2p:2 * d2p].astype(jnp.bfloat16)
    v2 = qkv2[:, :, 2 * d2p:3 * d2p].astype(jnp.bfloat16)
    s2 = jnp.einsum('gnd,gmd->gnm', q2, k2, preferred_element_type=jnp.float32)
    p2 = _softmax_last(s2).astype(jnp.bfloat16)
    h_att2 = jnp.einsum('gnm,gmd->gnd', p2, v2,
                        preferred_element_type=jnp.float32).reshape(gn, d2p)

    h2 = _layernorm_padded(h_att2, bias_ref[:, o_g2:o_g2 + d2p],
                           bias_ref[:, o_be2:o_be2 + d2p], 2 * d_model)

    # ---- global max pool over nodes (per graph) + flatten ----
    pooled = jnp.max(h2.reshape(g, n, d2p), axis=1)                   # (G, D2P)

    # ---- ffw1: Linear + ReLU ----
    f1 = jnp.maximum(
        jnp.dot(pooled.astype(jnp.bfloat16),
                wpack_ref[0:d2p, 3 * d2p:3 * d2p + sdp],
                preferred_element_type=jnp.float32)
        + bias_ref[:, o_b1:o_b1 + sdp], 0.0)                          # (G, SDP)

    # ---- ffw2: Linear + EXACT softmax over the (lane-padded) output vector ----
    logits = (jnp.dot(f1.astype(jnp.bfloat16),
                      wpack_ref[0:sdp, 3 * d2p + sdp:3 * d2p + sdp + op],
                      preferred_element_type=jnp.float32)
              + bias_ref[:, o_b2:o_b2 + op])                          # (G, OP)
    m = jnp.max(logits, axis=-1, keepdims=True)
    e = jnp.exp(logits - m)                      # padded lanes (bias=-1e30) -> 0
    out_ref[...] = e / jnp.sum(e, axis=-1, keepdims=True)


# -------------------------- host-side parameter prep --------------------------

def prepare_kernel_params(p, *, d_model, heads):
    """Fuse / 128-lane-pad / pack the PyTorch-style parameters for the kernel."""
    D, H = d_model, heads
    F = p["wq"].shape[1]
    SD = p["w1"].shape[1]          # scale * d_model
    O = p["w2"].shape[1]
    DP, D2P, SDP, OP = _rup(D), _rup(2 * D), _rup(SD), _rup(O)
    inv1 = 1.0 / math.sqrt(D)
    inv2 = 1.0 / math.sqrt(2 * D)

    wqkv1 = jnp.zeros((F, 3 * H * DP), jnp.float32)
    bqkv1 = jnp.zeros((1, 3 * H * DP), jnp.float32)
    for h in range(H):
        wqkv1 = wqkv1.at[:, h * DP:h * DP + D].set(p["wq"][h] * inv1)
        wqkv1 = wqkv1.at[:, (H + h) * DP:(H + h) * DP + D].set(p["wk"][h])
        wqkv1 = wqkv1.at[:, (2 * H + h) * DP:(2 * H + h) * DP + D].set(p["wv"][h])
        bqkv1 = bqkv1.at[:, h * DP:h * DP + D].set(p["bq"][h] * inv1)
        bqkv1 = bqkv1.at[:, (H + h) * DP:(H + h) * DP + D].set(p["bk"][h])
        bqkv1 = bqkv1.at[:, (2 * H + h) * DP:(2 * H + h) * DP + D].set(p["bv"][h])

    wl = jnp.zeros((H * DP, DP), jnp.float32)
    for h in range(H):
        wl = wl.at[h * DP:h * DP + D, :D].set(p["wl"][h * D:(h + 1) * D, :])
    bl = jnp.zeros((1, DP), jnp.float32).at[:, :D].set(p["bl"])
    g1 = jnp.zeros((1, DP), jnp.float32).at[:, :D].set(p["g1"])
    be1 = jnp.zeros((1, DP), jnp.float32).at[:, :D].set(p["be1"])

    wqkv2 = jnp.zeros((DP, 3 * D2P), jnp.float32)
    wqkv2 = wqkv2.at[:D, 0:2 * D].set(p["wq2"] * inv2)
    wqkv2 = wqkv2.at[:D, D2P:D2P + 2 * D].set(p["wk2"])
    wqkv2 = wqkv2.at[:D, 2 * D2P:2 * D2P + 2 * D].set(p["wv2"])
    bqkv2 = jnp.zeros((1, 3 * D2P), jnp.float32)
    bqkv2 = bqkv2.at[:, 0:2 * D].set(p["bq2"] * inv2)
    bqkv2 = bqkv2.at[:, D2P:D2P + 2 * D].set(p["bk2"])
    bqkv2 = bqkv2.at[:, 2 * D2P:2 * D2P + 2 * D].set(p["bv2"])
    g2 = jnp.zeros((1, D2P), jnp.float32).at[:, :2 * D].set(p["g2"])
    be2 = jnp.zeros((1, D2P), jnp.float32).at[:, :2 * D].set(p["be2"])

    w1 = jnp.zeros((D2P, SDP), jnp.float32).at[:2 * D, :SD].set(p["w1"])
    b1 = jnp.zeros((1, SDP), jnp.float32).at[:, :SD].set(p["b1"])
    w2 = jnp.zeros((SDP, OP), jnp.float32).at[:SD, :O].set(p["w2"])
    b2 = jnp.full((1, OP), NEG_INF, jnp.float32).at[:, :O].set(p["b2"])

    # pack the second-stage weights into one resident block
    rmax = max(DP, D2P, SDP)
    wpack = jnp.zeros((rmax, 3 * D2P + SDP + OP), jnp.float32)
    wpack = wpack.at[:DP, 0:3 * D2P].set(wqkv2)
    wpack = wpack.at[:D2P, 3 * D2P:3 * D2P + SDP].set(w1)
    wpack = wpack.at[:SDP, 3 * D2P + SDP:].set(w2)

    # pack all small f32 vectors into one lane-aligned resident array
    bias = jnp.concatenate([bqkv1, bl, g1, be1, bqkv2, g2, be2, b1, b2], axis=1)

    bf = lambda a: a.astype(jnp.bfloat16)
    return {
        "wqkv1": bf(wqkv1), "wl": bf(wl), "wpack": bf(wpack), "bias": bias,
        "dims": dict(heads=H, d_model=D, dp=DP, d2p=D2P, sdp=SDP, op=OP,
                     output_size=int(O)),
    }


# -------------------------------- host wrapper --------------------------------

def _resident_spec(arr):
    zeros = (0,) * arr.ndim
    return pl.BlockSpec(arr.shape, lambda b, _z=zeros: _z)


def _pick_graphs_per_step(batch, gmax):
    """Graphs per grid step: keep BlockSpec dims multiples of 8 (or == full dim)
    and, when batch > gmax, keep the grid length > 1 so the ("parallel",) axis
    can shard across v7x's two TensorCores."""
    if batch <= gmax:
        return batch
    for g in range(min(gmax, batch), 0, -1):
        if batch % g == 0 and g % 8 == 0:
            return g
    return batch  # fallback: single grid step (block == full array)


def head_attention_forward_batched(xb, kparams, graphs_per_step=8):
    """xb: (B, N, F) f32 node features for B graphs -> (B, output_size) probs."""
    B, N, F = xb.shape
    dims = kparams["dims"]
    op = dims["op"]
    G = _pick_graphs_per_step(B, graphs_per_step)

    kern = functools.partial(
        head_attention_kernel,
        heads=dims["heads"], d_model=dims["d_model"], n_nodes=N,
        dp=dims["dp"], d2p=dims["d2p"], sdp=dims["sdp"], op=op)

    out = pl.pallas_call(
        kern,
        out_shape=jax.ShapeDtypeStruct((B, op), jnp.float32),
        grid=(B // G,),
        in_specs=[pl.BlockSpec((G * N, F), lambda b: (b, 0)),
                  _resident_spec(kparams["wqkv1"]),
                  _resident_spec(kparams["wl"]),
                  _resident_spec(kparams["wpack"]),
                  _resident_spec(kparams["bias"])],
        out_specs=pl.BlockSpec((G, op), lambda b: (b, 0)),
        compiler_params=pltpu.CompilerParams(
            dimension_semantics=("parallel",)),
    )(xb.reshape(B * N, F), kparams["wqkv1"], kparams["wl"],
      kparams["wpack"], kparams["bias"])
    return out[:, :dims["output_size"]]


def head_attention_forward(x, kparams):
    """Single graph (N, F) -> (output_size,)."""
    return head_attention_forward_batched(x[None], kparams)[0]


# ----------------------------- pure-JAX reference -----------------------------

def _softmax_ref(s):
    m = jnp.max(s, axis=-1, keepdims=True)
    e = jnp.exp(s - m)
    return e / jnp.sum(e, axis=-1, keepdims=True)


def _layernorm_ref(h, gamma, beta, eps=_EPS):
    mu = jnp.mean(h, axis=-1, keepdims=True)
    var = jnp.mean((h - mu) ** 2, axis=-1, keepdims=True)
    return gamma * (h - mu) * lax.rsqrt(var + eps) + beta


def _attention_ref(xin, wq, bq, wk, bk, wv, bv, d_model):
    q = xin @ wq + bq
    k = xin @ wk + bk
    v = xin @ wv + bv
    p = _softmax_ref((q @ k.T) / math.sqrt(d_model))
    return p @ v, p


def head_attention_reference(x, params):
    heads = params["wq"].shape[0]
    d_model = params["wq"].shape[2]
    outs = [
        _attention_ref(x, params["wq"][h], params["bq"][h],
                       params["wk"][h], params["bk"][h],
                       params["wv"][h], params["bv"][h], d_model)[0]
        for h in range(heads)
    ]
    multi = jnp.concatenate(outs, axis=-1)
    hlin = multi @ params["wl"] + params["bl"]
    h1 = jnp.maximum(_layernorm_ref(hlin, params["g1"], params["be1"]), 0.0)
    h_att2, _ = _attention_ref(h1, params["wq2"], params["bq2"],
                               params["wk2"], params["bk2"],
                               params["wv2"], params["bv2"], 2 * d_model)
    h2 = _layernorm_ref(h_att2, params["g2"], params["be2"])
    pooled = jnp.max(h2, axis=0, keepdims=True)
    f1 = jnp.maximum(pooled @ params["w1"] + params["b1"], 0.0)
    logits = f1 @ params["w2"] + params["b2"]
    return _softmax_ref(logits)[0]


# ----------------------------------- main -------------------------------------

if __name__ == "__main__":
    B = 16           # graphs; G=8 per grid step -> grid=(2,), even (v7x: both TCs)
    N = 8            # nodes / sequence positions
    F = 4            # input_size
    D = 32           # d_model
    H = 2            # heads
    SCALE = 3        # scale
    O = 3            # output_size

    key = jax.random.PRNGKey(0)
    ks = jax.random.split(key, 24)

    def w(k, shape, s=0.1):
        return jax.random.normal(k, shape, dtype=jnp.float32) * s

    params = {
        # per-head attention (stacked along head axis)
        "wq": w(ks[0], (H, F, D)), "bq": w(ks[1], (H, 1, D)),
        "wk": w(ks[2], (H, F, D)), "bk": w(ks[3], (H, 1, D)),
        "wv": w(ks[4], (H, F, D)), "bv": w(ks[5], (H, 1, D)),
        # lin: heads*d_model -> d_model
        "wl": w(ks[6], (H * D, D)), "bl": w(ks[7], (1, D)),
        # LayerNorm(d_model)
        "g1": jnp.ones((1, D), jnp.float32), "be1": jnp.zeros((1, D), jnp.float32),
        # att2: d_model -> 2*d_model
        "wq2": w(ks[8], (D, 2 * D)), "bq2": w(ks[9], (1, 2 * D)),
        "wk2": w(ks[10], (D, 2 * D)), "bk2": w(ks[11], (1, 2 * D)),
        "wv2": w(ks[12], (D, 2 * D)), "bv2": w(ks[13], (1, 2 * D)),
        # LayerNorm(2*d_model)
        "g2": jnp.ones((1, 2 * D), jnp.float32), "be2": jnp.zeros((1, 2 * D), jnp.float32),
        # ffw1: 2*d_model -> scale*d_model
        "w1": w(ks[14], (2 * D, SCALE * D)), "b1": w(ks[15], (1, SCALE * D)),
        # ffw2: scale*d_model -> output_size
        "w2": w(ks[16], (SCALE * D, O)), "b2": w(ks[17], (1, O)),
    }

    kparams = prepare_kernel_params(params, d_model=D, heads=H)

    xb = jax.random.normal(ks[18], (B, N, F), dtype=jnp.float32)
    adj = jnp.ones((N, N), jnp.float32)  # unused by the reference forward

    out = head_attention_forward_batched(xb, kparams, graphs_per_step=8)  # (B, O)
    out = jax.block_until_ready(out)

    ref = jnp.stack([head_attention_reference(xb[b], params) for b in range(B)])

    assert out.shape == (B, O)
    # bf16 matmuls + approx attention reciprocal vs f32 reference -> loose tol
    assert jnp.allclose(out, ref, atol=2e-2, rtol=2e-2), (out, ref)
    # final softmax is an exact divide now
    assert jnp.allclose(jnp.sum(out, axis=-1), 1.0, atol=1e-4)

    print("KERNEL_OK")
</pallas_src>

<mosaic_0001>
module attributes {stable_mosaic.version = 11 : i64} {
  func.func @head_attention_kernel(%arg0: i32, %arg1: memref<64x4xf32, #tpu.memory_space<vmem>>, %arg2: memref<4x768xbf16, #tpu.memory_space<vmem>>, %arg3: memref<256x128xbf16, #tpu.memory_space<vmem>>, %arg4: memref<128x640xbf16, #tpu.memory_space<vmem>>, %arg5: memref<1x2048xf32, #tpu.memory_space<vmem>>, %arg6: memref<8x128xf32, #tpu.memory_space<vmem>>) attributes {dimension_semantics = [#tpu.dimension_semantics<parallel>], iteration_bounds = array<i64: 2>, scalar_prefetch = 0 : i64, scratch_operands = 0 : i64, tpu.core_type = #tpu.core_type<tc>, window_params = [{transform_indices = @transform_0, window_bounds = array<i64: 64, 4>}, {pipeline_mode = #tpu.pipeline_mode<synchronous>, transform_indices = @transform_1, window_bounds = array<i64: 4, 768>}, {pipeline_mode = #tpu.pipeline_mode<synchronous>, transform_indices = @transform_2, window_bounds = array<i64: 256, 128>}, {pipeline_mode = #tpu.pipeline_mode<synchronous>, transform_indices = @transform_3, window_bounds = array<i64: 128, 640>}, {pipeline_mode = #tpu.pipeline_mode<synchronous>, transform_indices = @transform_4, window_bounds = array<i64: 1, 2048>}, {transform_indices = @transform_5, window_bounds = array<i64: 8, 128>}]} {
    %c0 = arith.constant 0 : index
    %c0_0 = arith.constant 0 : index
    %0 = vector.load %arg1[%c0, %c0_0] : memref<64x4xf32, #tpu.memory_space<vmem>>, vector<64x4xf32>
    %1 = arith.truncf %0 : vector<64x4xf32> to vector<64x4xbf16>
    %c0_1 = arith.constant 0 : index
    %c0_2 = arith.constant 0 : index
    %2 = vector.load %arg2[%c0_1, %c0_2] : memref<4x768xbf16, #tpu.memory_space<vmem>>, vector<4x768xbf16>
    %cst = arith.constant dense<0.000000e+00> : vector<64x768xf32>
    %3 = tpu.matmul %1, %2, %cst {dimension_numbers = #tpu.dot_dimension_numbers<[1], [0], [0], [1], [0, 0, 1, 1], [], []>} : vector<64x4xbf16>, vector<4x768xbf16>, vector<64x768xf32> -> vector<64x768xf32>
    %c0_3 = arith.constant 0 : index
    %c0_4 = arith.constant 0 : index
    %4 = vector.load %arg5[%c0_3, %c0_4] : memref<1x2048xf32, #tpu.memory_space<vmem>>, vector<1x768xf32>
    %5 = vector.broadcast %4 : vector<1x768xf32> to vector<64x768xf32>
    %6 = arith.addf %3, %5 : vector<64x768xf32>
    %7 = vector.shape_cast %6 : vector<64x768xf32> to vector<8x8x768xf32>
    %8 = vector.extract_strided_slice %7 {offsets = [0, 0, 0], sizes = [8, 8, 128], strides = [1, 1, 1]} : vector<8x8x768xf32> to vector<8x8x128xf32>
    %9 = arith.truncf %8 : vector<8x8x128xf32> to vector<8x8x128xbf16>
    %10 = vector.extract_strided_slice %7 {offsets = [0, 0, 256], sizes = [8, 8, 128], strides = [1, 1, 1]} : vector<8x8x768xf32> to vector<8x8x128xf32>
    %11 = arith.truncf %10 : vector<8x8x128xf32> to vector<8x8x128xbf16>
    %12 = vector.extract_strided_slice %7 {offsets = [0, 0, 512], sizes = [8, 8, 128], strides = [1, 1, 1]} : vector<8x8x768xf32> to vector<8x8x128xf32>
    %13 = arith.truncf %12 : vector<8x8x128xf32> to vector<8x8x128xbf16>
    "tpu.trace_start"() <{level = 10 : i32, message = "gnd,gmd->gnm"}> : () -> ()
    %cst_5 = arith.constant dense<0.000000e+00> : vector<8x8x8xf32>
    %14 = tpu.matmul %9, %11, %cst_5 {dimension_numbers = #tpu.dot_dimension_numbers<[2], [2], [1], [1], [0, 0, 0, 1, 1, 1], [0], [0]>} : vector<8x8x128xbf16>, vector<8x8x128xbf16>, vector<8x8x8xf32> -> vector<8x8x8xf32>
    "tpu.trace_stop"() : () -> ()
    %cst_6 = arith.constant dense<0xFF800000> : vector<8x8xf32>
    %15 = vector.multi_reduction <maximumf>, %14, %cst_6 [2] : vector<8x8x8xf32> to vector<8x8xf32>
    %16 = vector.shape_cast %15 : vector<8x8xf32> to vector<8x8x1xf32>
    %17 = vector.broadcast %16 : vector<8x8x1xf32> to vector<8x8x8xf32>
    %18 = arith.subf %14, %17 : vector<8x8x8xf32>
    %19 = math.exp %18 : vector<8x8x8xf32>
    %cst_7 = arith.constant dense<0.000000e+00> : vector<8x8xf32>
    %20 = vector.multi_reduction <add>, %19, %cst_7 [2] : vector<8x8x8xf32> to vector<8x8xf32>
    %21 = vector.shape_cast %20 : vector<8x8xf32> to vector<8x8x1xf32>
    %22 = tpu.reciprocal %21 {approx = true} : vector<8x8x1xf32> -> vector<8x8x1xf32>
    %23 = vector.broadcast %22 : vector<8x8x1xf32> to vector<8x8x8xf32>
    %24 = arith.mulf %19, %23 : vector<8x8x8xf32>
    %25 = arith.truncf %24 : vector<8x8x8xf32> to vector<8x8x8xbf16>
    "tpu.trace_start"() <{level = 10 : i32, message = "gnm,gmd->gnd"}> : () -> ()
    %cst_8 = arith.constant dense<0.000000e+00> : vector<8x8x128xf32>
    %26 = tpu.matmul %25, %13, %cst_8 {dimension_numbers = #tpu.dot_dimension_numbers<[2], [1], [1], [2], [0, 0, 0, 1, 1, 2], [0], [0]>} : vector<8x8x8xbf16>, vector<8x8x128xbf16>, vector<8x8x128xf32> -> vector<8x8x128xf32>
    "tpu.trace_stop"() : () -> ()
    %27 = vector.extract_strided_slice %7 {offsets = [0, 0, 128], sizes = [8, 8, 128], strides = [1, 1, 1]} : vector<8x8x768xf32> to vector<8x8x128xf32>
    %28 = arith.truncf %27 : vector<8x8x128xf32> to vector<8x8x128xbf16>
    %29 = vector.extract_strided_slice %7 {offsets = [0, 0, 384], sizes = [8, 8, 128], strides = [1, 1, 1]} : vector<8x8x768xf32> to vector<8x8x128xf32>
    %30 = arith.truncf %29 : vector<8x8x128xf32> to vector<8x8x128xbf16>
    %31 = vector.extract_strided_slice %7 {offsets = [0, 0, 640], sizes = [8, 8, 128], strides = [1, 1, 1]} : vector<8x8x768xf32> to vector<8x8x128xf32>
    %32 = arith.truncf %31 : vector<8x8x128xf32> to vector<8x8x128xbf16>
    "tpu.trace_start"() <{level = 10 : i32, message = "gnd,gmd->gnm"}> : () -> ()
    %cst_9 = arith.constant dense<0.000000e+00> : vector<8x8x8xf32>
    %33 = tpu.matmul %28, %30, %cst_9 {dimension_numbers = #tpu.dot_dimension_numbers<[2], [2], [1], [1], [0, 0, 0, 1, 1, 1], [0], [0]>} : vector<8x8x128xbf16>, vector<8x8x128xbf16>, vector<8x8x8xf32> -> vector<8x8x8xf32>
    "tpu.trace_stop"() : () -> ()
    %cst_10 = arith.constant dense<0xFF800000> : vector<8x8xf32>
    %34 = vector.multi_reduction <maximumf>, %33, %cst_10 [2] : vector<8x8x8xf32> to vector<8x8xf32>
    %35 = vector.shape_cast %34 : vector<8x8xf32> to vector<8x8x1xf32>
    %36 = vector.broadcast %35 : vector<8x8x1xf32> to vector<8x8x8xf32>
    %37 = arith.subf %33, %36 : vector<8x8x8xf32>
    %38 = math.exp %37 : vector<8x8x8xf32>
    %cst_11 = arith.constant dense<0.000000e+00> : vector<8x8xf32>
    %39 = vector.multi_reduction <add>, %38, %cst_11 [2] : vector<8x8x8xf32> to vector<8x8xf32>
    %40 = vector.shape_cast %39 : vector<8x8xf32> to vector<8x8x1xf32>
    %41 = tpu.reciprocal %40 {approx = true} : vector<8x8x1xf32> -> vector<8x8x1xf32>
    %42 = vector.broadcast %41 : vector<8x8x1xf32> to vector<8x8x8xf32>
    %43 = arith.mulf %38, %42 : vector<8x8x8xf32>
    %44 = arith.truncf %43 : vector<8x8x8xf32> to vector<8x8x8xbf16>
    "tpu.trace_start"() <{level = 10 : i32, message = "gnm,gmd->gnd"}> : () -> ()
    %cst_12 = arith.constant dense<0.000000e+00> : vector<8x8x128xf32>
    %45 = tpu.matmul %44, %32, %cst_12 {dimension_numbers = #tpu.dot_dimension_numbers<[2], [1], [1], [2], [0, 0, 0, 1, 1, 2], [0], [0]>} : vector<8x8x8xbf16>, vector<8x8x128xbf16>, vector<8x8x128xf32> -> vector<8x8x128xf32>
    "tpu.trace_stop"() : () -> ()
    %46 = tpu.concatenate %26, %45 in 2 : vector<8x8x128xf32>, vector<8x8x128xf32> -> vector<8x8x256xf32>
    %47 = vector.shape_cast %46 : vector<8x8x256xf32> to vector<64x256xf32>
    %48 = arith.truncf %47 : vector<64x256xf32> to vector<64x256xbf16>
    %c0_13 = arith.constant 0 : index
    %c0_14 = arith.constant 0 : index
    %49 = vector.load %arg3[%c0_13, %c0_14] : memref<256x128xbf16, #tpu.memory_space<vmem>>, vector<256x128xbf16>
    %cst_15 = arith.constant dense<0.000000e+00> : vector<64x128xf32>
    %50 = tpu.matmul %48, %49, %cst_15 {dimension_numbers = #tpu.dot_dimension_numbers<[1], [0], [0], [1], [0, 0, 1, 1], [], []>} : vector<64x256xbf16>, vector<256x128xbf16>, vector<64x128xf32> -> vector<64x128xf32>
    %c0_16 = arith.constant 0 : index
    %c768 = arith.constant 768 : index
    %51 = vector.load %arg5[%c0_16, %c768] : memref<1x2048xf32, #tpu.memory_space<vmem>>, vector<1x128xf32>
    %52 = vector.broadcast %51 : vector<1x128xf32> to vector<64x128xf32>
    %53 = arith.addf %50, %52 : vector<64x128xf32>
    %c0_17 = arith.constant 0 : index
    %c896 = arith.constant 896 : index
    %54 = vector.load %arg5[%c0_17, %c896] : memref<1x2048xf32, #tpu.memory_space<vmem>>, vector<1x128xf32>
    %c0_18 = arith.constant 0 : index
    %c1024 = arith.constant 1024 : index
    %55 = vector.load %arg5[%c0_18, %c1024] : memref<1x2048xf32, #tpu.memory_space<vmem>>, vector<1x128xf32>
    %cst_19 = arith.constant dense<0.000000e+00> : vector<64xf32>
    %56 = vector.multi_reduction <add>, %53, %cst_19 [1] : vector<64x128xf32> to vector<64xf32>
    %57 = vector.shape_cast %56 : vector<64xf32> to vector<64x1xf32>
    %cst_20 = arith.constant 3.125000e-02 : f32
    %58 = vector.broadcast %cst_20 : f32 to vector<64x1xf32>
    %59 = arith.mulf %57, %58 : vector<64x1xf32>
    %60 = arith.mulf %53, %53 : vector<64x128xf32>
    %cst_21 = arith.constant dense<0.000000e+00> : vector<64xf32>
    %61 = vector.multi_reduction <add>, %60, %cst_21 [1] : vector<64x128xf32> to vector<64xf32>
    %62 = vector.shape_cast %61 : vector<64xf32> to vector<64x1xf32>
    %cst_22 = arith.constant 3.125000e-02 : f32
    %63 = vector.broadcast %cst_22 : f32 to vector<64x1xf32>
    %64 = arith.mulf %62, %63 : vector<64x1xf32>
    %65 = arith.mulf %59, %59 : vector<64x1xf32>
    %66 = arith.subf %64, %65 : vector<64x1xf32>
    %cst_23 = arith.constant 0.000000e+00 : f32
    %67 = vector.broadcast %cst_23 : f32 to vector<64x1xf32>
    %68 = arith.maximumf %66, %67 : vector<64x1xf32>
    %69 = vector.broadcast %59 : vector<64x1xf32> to vector<64x128xf32>
    %70 = arith.subf %53, %69 : vector<64x128xf32>
    %71 = vector.broadcast %54 : vector<1x128xf32> to vector<64x128xf32>
    %72 = arith.mulf %71, %70 : vector<64x128xf32>
    %cst_24 = arith.constant 9.99999974E-6 : f32
    %73 = vector.broadcast %cst_24 : f32 to vector<64x1xf32>
    %74 = arith.addf %68, %73 : vector<64x1xf32>
    %75 = math.rsqrt %74 : vector<64x1xf32>
    %76 = vector.broadcast %75 : vector<64x1xf32> to vector<64x128xf32>
    %77 = arith.mulf %72, %76 : vector<64x128xf32>
    %78 = vector.broadcast %55 : vector<1x128xf32> to vector<64x128xf32>
    %79 = arith.addf %77, %78 : vector<64x128xf32>
    %cst_25 = arith.constant 0.000000e+00 : f32
    %80 = vector.broadcast %cst_25 : f32 to vector<64x128xf32>
    %81 = arith.maximumf %79, %80 : vector<64x128xf32>
    %82 = arith.truncf %81 : vector<64x128xf32> to vector<64x128xbf16>
    %c0_26 = arith.constant 0 : index
    %c0_27 = arith.constant 0 : index
    %83 = vector.load %arg4[%c0_26, %c0_27] : memref<128x640xbf16, #tpu.memory_space<vmem>>, vector<128x384xbf16>
    %cst_28 = arith.constant dense<0.000000e+00> : vector<64x384xf32>
    %84 = tpu.matmul %82, %83, %cst_28 {dimension_numbers = #tpu.dot_dimension_numbers<[1], [0], [0], [1], [0, 0, 1, 1], [], []>} : vector<64x128xbf16>, vector<128x384xbf16>, vector<64x384xf32> -> vector<64x384xf32>
    %c0_29 = arith.constant 0 : index
    %c1152 = arith.constant 1152 : index
    %85 = vector.load %arg5[%c0_29, %c1152] : memref<1x2048xf32, #tpu.memory_space<vmem>>, vector<1x384xf32>
    %86 = vector.broadcast %85 : vector<1x384xf32> to vector<64x384xf32>
    %87 = arith.addf %84, %86 : vector<64x384xf32>
    %88 = vector.shape_cast %87 : vector<64x384xf32> to vector<8x8x384xf32>
    %89 = vector.extract_strided_slice %88 {offsets = [0, 0, 0], sizes = [8, 8, 128], strides = [1, 1, 1]} : vector<8x8x384xf32> to vector<8x8x128xf32>
    %90 = arith.truncf %89 : vector<8x8x128xf32> to vector<8x8x128xbf16>
    %91 = vector.extract_strided_slice %88 {offsets = [0, 0, 128], sizes = [8, 8, 128], strides = [1, 1, 1]} : vector<8x8x384xf32> to vector<8x8x128xf32>
    %92 = arith.truncf %91 : vector<8x8x128xf32> to vector<8x8x128xbf16>
    %93 = vector.extract_strided_slice %88 {offsets = [0, 0, 256], sizes = [8, 8, 128], strides = [1, 1, 1]} : vector<8x8x384xf32> to vector<8x8x128xf32>
    %94 = arith.truncf %93 : vector<8x8x128xf32> to vector<8x8x128xbf16>
    "tpu.trace_start"() <{level = 10 : i32, message = "gnd,gmd->gnm"}> : () -> ()
    %cst_30 = arith.constant dense<0.000000e+00> : vector<8x8x8xf32>
    %95 = tpu.matmul %90, %92, %cst_30 {dimension_numbers = #tpu.dot_dimension_numbers<[2], [2], [1], [1], [0, 0, 0, 1, 1, 1], [0], [0]>} : vector<8x8x128xbf16>, vector<8x8x128xbf16>, vector<8x8x8xf32> -> vector<8x8x8xf32>
    "tpu.trace_stop"() : () -> ()
    %cst_31 = arith.constant dense<0xFF800000> : vector<8x8xf32>
    %96 = vector.multi_reduction <maximumf>, %95, %cst_31 [2] : vector<8x8x8xf32> to vector<8x8xf32>
    %97 = vector.shape_cast %96 : vector<8x8xf32> to vector<8x8x1xf32>
    %98 = vector.broadcast %97 : vector<8x8x1xf32> to vector<8x8x8xf32>
    %99 = arith.subf %95, %98 : vector<8x8x8xf32>
    %100 = math.exp %99 : vector<8x8x8xf32>
    %cst_32 = arith.constant dense<0.000000e+00> : vector<8x8xf32>
    %101 = vector.multi_reduction <add>, %100, %cst_32 [2] : vector<8x8x8xf32> to vector<8x8xf32>
    %102 = vector.shape_cast %101 : vector<8x8xf32> to vector<8x8x1xf32>
    %103 = tpu.reciprocal %102 {approx = true} : vector<8x8x1xf32> -> vector<8x8x1xf32>
    %104 = vector.broadcast %103 : vector<8x8x1xf32> to vector<8x8x8xf32>
    %105 = arith.mulf %100, %104 : vector<8x8x8xf32>
    %106 = arith.truncf %105 : vector<8x8x8xf32> to vector<8x8x8xbf16>
    "tpu.trace_start"() <{level = 10 : i32, message = "gnm,gmd->gnd"}> : () -> ()
    %cst_33 = arith.constant dense<0.000000e+00> : vector<8x8x128xf32>
    %107 = tpu.matmul %106, %94, %cst_33 {dimension_numbers = #tpu.dot_dimension_numbers<[2], [1], [1], [2], [0, 0, 0, 1, 1, 2], [0], [0]>} : vector<8x8x8xbf16>, vector<8x8x128xbf16>, vector<8x8x128xf32> -> vector<8x8x128xf32>
    "tpu.trace_stop"() : () -> ()
    %108 = vector.shape_cast %107 : vector<8x8x128xf32> to vector<64x128xf32>
    %c0_34 = arith.constant 0 : index
    %c1536 = arith.constant 1536 : index
    %109 = vector.load %arg5[%c0_34, %c1536] : memref<1x2048xf32, #tpu.memory_space<vmem>>, vector<1x128xf32>
    %c0_35 = arith.constant 0 : index
    %c1664 = arith.constant 1664 : index
    %110 = vector.load %arg5[%c0_35, %c1664] : memref<1x2048xf32, #tpu.memory_space<vmem>>, vector<1x128xf32>
    %cst_36 = arith.constant dense<0.000000e+00> : vector<64xf32>
    %111 = vector.multi_reduction <add>, %108, %cst_36 [1] : vector<64x128xf32> to vector<64xf32>
    %112 = vector.shape_cast %111 : vector<64xf32> to vector<64x1xf32>
    %cst_37 = arith.constant 1.562500e-02 : f32
    %113 = vector.broadcast %cst_37 : f32 to vector<64x1xf32>
    %114 = arith.mulf %112, %113 : vector<64x1xf32>
    %115 = arith.mulf %108, %108 : vector<64x128xf32>
    %cst_38 = arith.constant dense<0.000000e+00> : vector<64xf32>
    %116 = vector.multi_reduction <add>, %115, %cst_38 [1] : vector<64x128xf32> to vector<64xf32>
    %117 = vector.shape_cast %116 : vector<64xf32> to vector<64x1xf32>
    %cst_39 = arith.constant 1.562500e-02 : f32
    %118 = vector.broadcast %cst_39 : f32 to vector<64x1xf32>
    %119 = arith.mulf %117, %118 : vector<64x1xf32>
    %120 = arith.mulf %114, %114 : vector<64x1xf32>
    %121 = arith.subf %119, %120 : vector<64x1xf32>
    %cst_40 = arith.constant 0.000000e+00 : f32
    %122 = vector.broadcast %cst_40 : f32 to vector<64x1xf32>
    %123 = arith.maximumf %121, %122 : vector<64x1xf32>
    %124 = vector.broadcast %114 : vector<64x1xf32> to vector<64x128xf32>
    %125 = arith.subf %108, %124 : vector<64x128xf32>
    %126 = vector.broadcast %109 : vector<1x128xf32> to vector<64x128xf32>
    %127 = arith.mulf %126, %125 : vector<64x128xf32>
    %cst_41 = arith.constant 9.99999974E-6 : f32
    %128 = vector.broadcast %cst_41 : f32 to vector<64x1xf32>
    %129 = arith.addf %123, %128 : vector<64x1xf32>
    %130 = math.rsqrt %129 : vector<64x1xf32>
    %131 = vector.broadcast %130 : vector<64x1xf32> to vector<64x128xf32>
    %132 = arith.mulf %127, %131 : vector<64x128xf32>
    %133 = vector.broadcast %110 : vector<1x128xf32> to vector<64x128xf32>
    %134 = arith.addf %132, %133 : vector<64x128xf32>
    %135 = vector.shape_cast %134 : vector<64x128xf32> to vector<8x8x128xf32>
    %cst_42 = arith.constant dense<0xFF800000> : vector<8x128xf32>
    %136 = vector.multi_reduction <maximumf>, %135, %cst_42 [1] : vector<8x8x128xf32> to vector<8x128xf32>
    %137 = arith.truncf %136 : vector<8x128xf32> to vector<8x128xbf16>
    %c0_43 = arith.constant 0 : index
    %c384 = arith.constant 384 : index
    %138 = vector.load %arg4[%c0_43, %c384] : memref<128x640xbf16, #tpu.memory_space<vmem>>, vector<128x128xbf16>
    %cst_44 = arith.constant dense<0.000000e+00> : vector<8x128xf32>
    %139 = tpu.matmul %137, %138, %cst_44 {dimension_numbers = #tpu.dot_dimension_numbers<[1], [0], [0], [1], [0, 0, 1, 1], [], []>} : vector<8x128xbf16>, vector<128x128xbf16>, vector<8x128xf32> -> vector<8x128xf32>
    %c0_45 = arith.constant 0 : index
    %c1792 = arith.constant 1792 : index
    %140 = vector.load %arg5[%c0_45, %c1792] : memref<1x2048xf32, #tpu.memory_space<vmem>>, vector<1x128xf32>
    %141 = vector.broadcast %140 : vector<1x128xf32> to vector<8x128xf32>
    %142 = arith.addf %139, %141 : vector<8x128xf32>
    %cst_46 = arith.constant 0.000000e+00 : f32
    %143 = vector.broadcast %cst_46 : f32 to vector<8x128xf32>
    %144 = arith.maximumf %142, %143 : vector<8x128xf32>
    %145 = arith.truncf %144 : vector<8x128xf32> to vector<8x128xbf16>
    %c0_47 = arith.constant 0 : index
    %c512 = arith.constant 512 : index
    %146 = vector.load %arg4[%c0_47, %c512] : memref<128x640xbf16, #tpu.memory_space<vmem>>, vector<128x128xbf16>
    %cst_48 = arith.constant dense<0.000000e+00> : vector<8x128xf32>
    %147 = tpu.matmul %145, %146, %cst_48 {dimension_numbers = #tpu.dot_dimension_numbers<[1], [0], [0], [1], [0, 0, 1, 1], [], []>} : vector<8x128xbf16>, vector<128x128xbf16>, vector<8x128xf32> -> vector<8x128xf32>
    %c0_49 = arith.constant 0 : index
    %c1920 = arith.constant 1920 : index
    %148 = vector.load %arg5[%c0_49, %c1920] : memref<1x2048xf32, #tpu.memory_space<vmem>>, vector<1x128xf32>
    %149 = vector.broadcast %148 : vector<1x128xf32> to vector<8x128xf32>
    %150 = arith.addf %147, %149 : vector<8x128xf32>
    %cst_50 = arith.constant dense<0xFF800000> : vector<8xf32>
    %151 = vector.multi_reduction <maximumf>, %150, %cst_50 [1] : vector<8x128xf32> to vector<8xf32>
    %152 = vector.shape_cast %151 : vector<8xf32> to vector<8x1xf32>
    %153 = vector.broadcast %152 : vector<8x1xf32> to vector<8x128xf32>
    %154 = arith.subf %150, %153 : vector<8x128xf32>
    %155 = math.exp %154 : vector<8x128xf32>
    %cst_51 = arith.constant dense<0.000000e+00> : vector<8xf32>
    %156 = vector.multi_reduction <add>, %155, %cst_51 [1] : vector<8x128xf32> to vector<8xf32>
    %157 = vector.shape_cast %156 : vector<8xf32> to vector<8x1xf32>
    %158 = vector.broadcast %157 : vector<8x1xf32> to vector<8x128xf32>
    %159 = arith.divf %155, %158 : vector<8x128xf32>
    %c0_52 = arith.constant 0 : index
    %c0_53 = arith.constant 0 : index
    %160 = vector.load %arg6[%c0_52, %c0_53] : memref<8x128xf32, #tpu.memory_space<vmem>>, vector<8x128xf32>
    tpu.vector_store %arg6[%c0_52, %c0_53], %159 {strides = array<i32>} : memref<8x128xf32, #tpu.memory_space<vmem>>, vector<8x128xf32>,
    return
  }
  func.func @transform_0(%arg0: i32) -> (i32, i32) {
    %c0_i32 = arith.constant 0 : i32
    %c0_i32_0 = arith.constant 0 : i32
    return %arg0, %c0_i32 : i32, i32
  }
  func.func @transform_1(%arg0: i32) -> (i32, i32) {
    %c0_i32 = arith.constant 0 : i32
    %c0_i32_0 = arith.constant 0 : i32
    %c0_i32_1 = arith.constant 0 : i32
    return %c0_i32, %c0_i32_0 : i32, i32
  }
  func.func @transform_2(%arg0: i32) -> (i32, i32) {
    %c0_i32 = arith.constant 0 : i32
    %c0_i32_0 = arith.constant 0 : i32
    %c0_i32_1 = arith.constant 0 : i32
    return %c0_i32, %c0_i32_0 : i32, i32
  }
  func.func @transform_3(%arg0: i32) -> (i32, i32) {
    %c0_i32 = arith.constant 0 : i32
    %c0_i32_0 = arith.constant 0 : i32
    %c0_i32_1 = arith.constant 0 : i32
    return %c0_i32, %c0_i32_0 : i32, i32
  }
  func.func @transform_4(%arg0: i32) -> (i32, i32) {
    %c0_i32 = arith.constant 0 : i32
    %c0_i32_0 = arith.constant 0 : i32
    %c0_i32_1 = arith.constant 0 : i32
    return %c0_i32, %c0_i32_0 : i32, i32
  }
  func.func @transform_5(%arg0: i32) -> (i32, i32) {
    %c0_i32 = arith.constant 0 : i32
    %c0_i32_0 = arith.constant 0 : i32
    return %arg0, %c0_i32 : i32, i32
  }
}

</mosaic_0001>

<bundles_post_ra>
// kernel: tpu_custom_call.1
= control target key start
LH: loop header
LB: loop body
LE: loop exit
PB: predicated region body
PF: predicated region fallthrough
CT: control target
= control target key end

     0   :  { %10 = vsyncpa [#allocation3], 0  ;;  %s6354_s0 = inlined_call_operand.vmem [shape: f32[128,4], index: 0, kind: input, shape index: {}]   ;;  %s6355_s1 = inlined_call_operand.hbm [shape: bf16[4,768], index: 1, kind: input, shape index: {}]   ;;  %s6356_s2 = inlined_call_operand.vmem [shape: bf16[256,128], index: 2, kind: input, shape index: {}]   ;;  %s6357_s3 = inlined_call_operand.hbm [shape: bf16[128,640], index: 3, kind: input, shape index: {}]   ;;  %s6358_s4 = inlined_call_operand.vmem [shape: f32[1,2048], index: 4, kind: input, shape index: {}]   ;;  %s6359_s5 = inlined_call_operand.hbm [shape: f32[16,128], index: 5, kind: output, shape index: {}]  }
   0x1   :  { %11 = vsyncpa [#allocation6], 0 }
   0x2   :  { %12 = vsyncpa [#allocation4], 0 }
   0x3   :  { %14 = vsyncpa [#allocation4 + $0x1], 0  ;;  %s5306_s18 = smov 0   ;;  %s5308_s19 = smov 0  }
   0x4   :  { %s5310_s20 = smov 0   ;;  %s5312_s21 = smov 0  }
   0x5 LB: > { %s5327_s22 = sadd.s32 4294967295, %s5265_s21   ;;  %s4240_s23 = sadd.s32 4294967294, %s5265_s21   ;;  %s5265_s21 = sphi %s5312_s21, %s6377_s21   ;;  %s5261_s20 = sphi %s5310_s20, %s6376_s20   ;;  %s5257_s19 = sphi %s5308_s19, %s6375_s19   ;;  %s5253_s18 = sphi %s5306_s18, %s6374_s18  }
   0x6   : > { %s5331_s24 = sadd.s32 1, %s5265_s21   ;;  %s137_s25 = sadd.s32 1, %s5261_s20 }
   0x7   : > { %s134_s26 = ssub.s32 %s5265_s21, %s5331_s24  ;;  %p147_p0 = scmp.ne.s32.totalorder %s5261_s20, %s5257_s19 }
   0x8   : > { %p135_p1 = scmp.eq.s32.totalorder %s134_s26, 0  ;;  %p148_p2 = scmp.eq.s32.totalorder %s5327_s22, 1 }
   0x9   : > { %p153_p3 = scmp.ne.s32.totalorder %s5257_s19, %s5253_s18  ;;  %p154_p4 = scmp.eq.s32.totalorder %s4240_s23, 1 }
   0xa   : > { %s5342_s27 = scalar_select %p135_p1, %s5261_s20, %s137_s25  }
   0xb   : > { %p5344_p5 = por %p148_p2, %p147_p0  ;;  %p5348_p6 = por %p154_p4, %p153_p3 }
   0xc   : > { %p4241_p7 = scmp.ge.s32.totalorder %s5265_s21, 1  ;;  %p161_p8 = scmp.lt.s32.totalorder %s5265_s21, 3 }
   0xd   : > { %s6363_s28 = scalar_select %p5344_p5, 1, 0 }
   0xe   : > { %s6364_s29 = scalar_select %p5348_p6, 1, 0 }
   0xf   : > { %p6360_p9 = scmp.eq.s32.totalorder %s5327_s22, 0  ;;  %p5355_p10 = pnand %p4241_p7, %p161_p8 }
  0x10   : > { %s5267_s6 = smov [#allocation2]   ;;  %s5268_s8 = smov [#allocation5]  }
  0x11   : > { %s6365_s30 = scalar_select %p5355_p10, 1, 0 }
  0x12   : > { %s174_s7 = sshll.u32 %s5267_s6, 4  ;;  %p4886_p11 = pneg %p5355_p10  ;;  %s175_s7 = int_to_ptr.vmem [resolvable:$true] %s174_s7 }
  0x13   : > { %s187_s9 = sshll.u32 %s5268_s8, 4  ;;  %s5139_s13 = scalar_lea.hbm %s6355_s1, 192  ;;  %s5367_s9 = int_to_ptr.vmem [resolvable:$true] %s187_s9 }
  0x14   : > { %p5363_p12 = pnand %p6360_p9, %p4886_p11  ;;  %p5140_p13 = scmp.ne.s32.totalorder %s6355_s1, %s5139_s13 }
  0x15   : > { %p5146_p3 = scmp.lt.u32.totalorder %s5139_s13, %s6355_s1 }
  0x16   : > { %p5141_p0 = pneg %p5363_p12 }
  0x18   : > { %p5142_p1 = pnand %p5141_p0, %p5140_p13 }
  0x1a   : > { %p5143_p2 = pneg %p5142_p1 }
  0x1c   : > { %p5148_p4 = pnand %p5146_p3, %p5143_p2 }
  0x1e   : > { %5151 = shalt.err (!%p5148_p4)
}
  0x1f   : > { %s5152_s23 = scalar_lea.vmem %s175_s7, 192  ;;  %p5160_p9 = scmp.lt.s32.totalorder %s175_s7, %s175_s7 }
  0x20   : > { %p5153_p7 = scmp.ne.s32.totalorder %s175_s7, %s5152_s23  ;;  %p5161_p6 = scmp.lt.s32.totalorder %s5152_s23, %s5152_s23 }
  0x22   : > { %p5155_p8 = pnand %p5153_p7, %p5141_p0  ;;  %p5162_p5 = por %p5161_p6, %p5160_p9 }
  0x24   : > { %p5156_p11 = pneg %p5155_p8 }
  0x26   : > { %p5163_p10 = pnand %p5162_p5, %p5156_p11 }
  0x28   : > { %5166 = shalt.err (!%p5163_p10)
}
  0x29   : > { %4889 = dma.hbm_to_vmem [thread:$0]  (!%p5363_p12), %s6355_s1, 192, %s175_s7, [#allocation3]  }
  0x2a   : > { %s5167_s11 = scalar_lea.hbm %s6357_s3, 5120 }
  0x2b   : > { %p5168_p13 = scmp.ne.s32.totalorder %s6357_s3, %s5167_s11  ;;  %p5174_p9 = scmp.lt.u32.totalorder %s5167_s11, %s6357_s3 }
  0x2d   : > { %p5170_p6 = pnand %p5168_p13, %p5141_p0 }
  0x2f   : > { %p5171_p5 = pneg %p5170_p6 }
  0x31   : > { %p5176_p10 = pnand %p5174_p9, %p5171_p5 }
  0x33   : > { %5179 = shalt.err (!%p5176_p10)
}
  0x34   : > { %s5180_s7 = scalar_lea.vmem %s5367_s9, 5120  ;;  %p5188_p4 = scmp.lt.s32.totalorder %s5367_s9, %s5367_s9 }
  0x35   : > { %p5181_p1 = scmp.ne.s32.totalorder %s5367_s9, %s5180_s7  ;;  %p5189_p7 = scmp.lt.s32.totalorder %s5180_s7, %s5180_s7 }
  0x37   : > { %p5183_p2 = pnand %p5181_p1, %p5141_p0  ;;  %p5190_p8 = por %p5189_p7, %p5188_p4 }
  0x39   : > { %p5184_p3 = pneg %p5183_p2 }
  0x3b   : > { %p5191_p11 = pnand %p5190_p8, %p5184_p3 }
  0x3d   : > { %5194 = shalt.err (!%p5191_p11)
}
  0x3e   : > { %s5269_s16 = smov 320   ;;  %s5270_s17 = smov 20  }
  0x3f   : > { %4892 = dma.hbm_to_vmem [thread:$0]  (!%p5363_p12), %s6357_s3, 5120, %s5367_s9, [#allocation6], %s5269_s16, %s5269_s16, %s5270_s17  }
  0x40   : > { %p6367_p13 = scmp.ne.s32.totalorder %s6365_s30, 0 }
  0x41   : > { %p6368_p0 = scmp.eq.s32.totalorder (!%p6367_p13), %s5327_s22, 0 }
  0x42   : > { %215 = sbr.rel (%p6367_p13) target bundleno = 3972 (0xf84), region = 40 }
  0x49   : > { %5240 = dma.done.wait (%p6368_p0), [#allocation3], 192   ;;  %p6369_p6 = pmov %p6368_p0 }
  0x4a   : > { %p6370_p5 = pmov %p6368_p0 }
  0x4b   : > { %5242 = vsyncadd (%p6369_p6), [#allocation3], 4294967104 }
  0x4c   : > { %5244 = dma.done.wait (%p6370_p5), [#allocation6], 5120   ;;  %p6371_p9 = pmov %p6368_p0 }
  0x4d   : > { %v270_v0 = vlaneseq  ;;  %v5271_v1 = vmov 1983009808   ;;  %v5272_v3 = vmov 0   ;;  %s4249_s30 = sshll.u32 %s5327_s22, 3  ;;  %v266_v7 = vld [vmem:[#allocation2] sm:$0xff]  ;;  %vm340_vm0 = vcmask 1041408  }
  0x4e   : > { %5246 = vsyncadd (%p6371_p9), [#allocation6], 4294962176  ;;  %v304_v2 = vunpack.c.l.s4 %v5271_v1  ;;  %464 = vmatprep.mubr.bf16.mxu1 %v5272_v3  ;;  %391 = vmatprep.mubr.bf16.mxu0 %v5272_v3  ;;  %p248_p12 = scmp.lt.s32.totalorder %s4249_s30, 15  ;;  %v302_v9 = vcombine.high %v266_v7, %v266_v7  ;;  %vm327_vm1 = vcmask 31744   ;;  %v5273_v30 = vmov 0.0   ;;  %s244_s12 = sand.u32 1, %s5257_s19  }
  0x4f   : > { %v5429_v4 = vshrl.u32 %v270_v0, 7  ;;  %v4251_v8 = vld.sshfl [vmem:[#allocation2 + $0x8] sm:$0x33 pattern:$0x76325410]  ;;  %vm5274_vm2 = vmmov 0  }
  0x50   : > { %v305_v5 = vunpack.c.0.s8 %v304_v2  ;;  %s6379_s30 = smov (!%p248_p12, %s4249_s30), 15  ;;  %v326_v11 = vcombine.high %v4251_v8, %v4251_v8  ;;  %v354_v17 = vsel %vm340_vm0, %v4251_v8, 0  ;;  %v5477_v32 = vld [vmem:[%s6358_s4] sm:$0x3f]  ;;  %vm1022_vm3 = vcmask 1043456   ;;  %s4248_s13 = sshll.u32 %s244_s12, 3 }
  0x51   : > { %s4250_s9 = sshll.u32 %s6379_s30, 3  ;;  %v280_v31 = vsub.s32 2, %v5429_v4  ;;  %v272_v33 = vsub.s32 0, %v5429_v4  ;;  %vm922_vm4 = vcmask 64512   ;;  %vm3918_vm5 = vcmask 1041409   ;;  %s4355_s14 = sshll.u32 %s5327_s22, 7 }
  0x52   : > { %v308_v6 = vsub.s32 %v305_v5, %v5429_v4  ;;  %s5435_s6 = scalar_lea.vmem %s6354_s0, %s4250_s9  ;;  %vm3920_vm6 = vcmask 1042434   ;;  %vm3922_vm7 = vcmask 1043459   ;;  %vm3924_vm8 = vcmask 1044484   ;;  %s246_s15 = scalar_lea.vmem [#allocation7], %s4248_s13 }
  0x53   : > { %v254_v14 = vld [vmem:[%s5435_s6] sm:$0xff]  ;;  %v255_v15 = vld [vmem:[%s5435_s6 + $0x8] sm:$0xff]  ;;  %v256_v21 = vld [vmem:[%s5435_s6 + $0x10] sm:$0xff]  ;;  %v5483_v34 = vrot.slane %v5477_v32, %v280_v31  ;;  %v5490_v38 = vrot.slane %v5477_v32, %v272_v33  ;;  %vm3926_vm9 = vcmask 1045509   ;;  %vm3928_vm10 = vcmask 1046534   ;;  %s4159_s7 = sshll.u32 %s246_s15, 4  ;;  %s6312_s23 = scalar_lea.hbm %s6359_s5, %s4355_s14  ;;  %s6314_s7 = int_to_ptr.vmem [resolvable:$true] %s4159_s7 }
  0x54   : > { %v309_v10 = vrot.slane %v266_v7, %v308_v6  ;;  %v316_v12 = vrot.slane %v302_v9, %v308_v6  ;;  %v262_v20 = vpack.c.bf16 %v255_v15, %v254_v14  ;;  %v257_v22 = vld [vmem:[%s5435_s6 + $0x18] sm:$0xff]  ;;  %v258_v24 = vld [vmem:[%s5435_s6 + $0x20] sm:$0xff]  ;;  %v259_v25 = vld [vmem:[%s5435_s6 + $0x28] sm:$0xff]  ;;  %v288_v15 = vsub.s32 4, %v5429_v4  ;;  %s4146_s25 = scalar_lea.sflag [#allocation4], %s244_s12  ;;  %s5195_s30 = scalar_lea.vmem %s6314_s7, 128 }
  0x55   : > { %v263_v23 = vpack.c.bf16 %v257_v22, %v256_v21  ;;  %v264_v26 = vpack.c.bf16 %v259_v25, %v258_v24  ;;  %v260_v27 = vld [vmem:[%s5435_s6 + $0x30] sm:$0xff]  ;;  %v261_v28 = vld [vmem:[%s5435_s6 + $0x38] sm:$0xff]  ;;  %vm3930_vm11 = vcmask 1047559   ;;  %p5196_p10 = scmp.ne.s32.totalorder %s6314_s7, %s5195_s30  ;;  %p6372_p1 = scmp.ne.s32.totalorder %s6363_s28, 0 }
  0x56   : > { %v317_v13 = vcombine.high %v309_v10, %v309_v10  ;;  %v342_v16 = vsel %vm340_vm0, %v309_v10, 0  ;;  %v318_v18 = vcombine.high %v316_v12, %v316_v12  ;;  %v348_v19 = vsel %vm340_vm0, %v316_v12, 0  ;;  %s5275_s22 = smov [#allocation7]  }
  0x57   : > { %v265_v29 = vpack.c.bf16 %v261_v28, %v260_v27  ;;  %v5542_v27 = vrot.slane %v5477_v32, %v288_v15  ;;  %p5197_p2 = pnand %p5196_p10, %p6372_p1  ;;  %s5199_s9 = sshll.u32 %s5275_s22, 4  ;;  %s5200_s9 = int_to_ptr.vmem [resolvable:$false] %s5199_s9 }
  0x58   : > { %4252 = vmatprep.subr.msk.bf16.mxu0 %vm340_vm0, %v317_v13  ;;  %4257 = vmatprep.subr.msk.bf16.mxu1 %vm340_vm0, %v318_v18  ;;  %s5201_s10 = scalar_lea.vmem %s5200_s9, 256  ;;  %p5202_p4 = scmp.lt.s32.totalorder %s6314_s7, %s5200_s9 }
  0x59   : > { %360 = vmatpush1.bf16.msra.mxu0 %v342_v16  ;;  %433 = vmatpush1.bf16.msra.mxu1 %v348_v19  ;;  %p5198_p3 = pneg %p5197_p2  ;;  %p5203_p7 = scmp.lt.s32.totalorder %s5201_s10, %s5195_s30 }
  0x5a   : > { %4262 = vmatprep.subr.msk.bf16.mxu0 %vm340_vm0, %v326_v11  ;;  %4524 = vmatprep.subr.bf16.mxu1 %v5273_v30 }
  0x5b   : > { %p5204_p8 = por %p5203_p7, %p5202_p4 }
  0x5c   : > { %4253 = vmatmul.mubr.msk.bf16.vlgmr.msra.gmra.mrb[0].mxu0 %vm327_vm1, %v262_v20  ;;  %4258 = vmatmul.mubr.msk.bf16.vlgmr.msra.gmra.mrb[0].mxu1 %vm327_vm1, %v262_v20 }
  0x5d   : > { %401 = vmatprep.mubr.bf16.mxu0 %v5272_v3  ;;  %506 = vmatpush1.bf16.msra.mxu0 %v354_v17  ;;  %p5205_p11 = pnand %p5204_p8, %p5198_p3 }
  0x5e   : > { %474 = vmatprep.mubr.bf16.mxu1 %v5272_v3  ;;  %4548 = vmatprep.subr.bf16.mxu0 %v5273_v30 }
  0x64   : > { %4254 = vmatmul.mubr.msk.bf16.gmra.mrb[4].mxu0 %vm327_vm1, %v263_v23  ;;  %4259 = vmatmul.mubr.msk.bf16.gmra.mrb[4].mxu1 %vm327_vm1, %v263_v23 }
  0x65   : > { %411 = vmatprep.mubr.bf16.mxu0 %v5272_v3  ;;  %484 = vmatprep.mubr.bf16.mxu1 %v5272_v3 }
  0x6c   : > { %4255 = vmatmul.mubr.msk.bf16.gmra.mrb[8].mxu0 %vm327_vm1, %v264_v26  ;;  %4260 = vmatmul.mubr.msk.bf16.gmra.mrb[8].mxu1 %vm327_vm1, %v264_v26 }
  0x6d   : > { %421 = vmatprep.mubr.bf16.mxu0 %v5272_v3  ;;  %494 = vmatprep.mubr.bf16.mxu1 %v5272_v3 }
  0x74   : > { %4256 = vmatmul.mubr.msk.bf16.gmra.mrb[12].mxu0 %vm327_vm1, %v265_v29  ;;  %4261 = vmatmul.mubr.msk.bf16.gmra.mrb[12].mxu1 %vm327_vm1, %v265_v29 }
  0x75   : > { %537 = vmatprep.mubr.bf16.mxu0 %v5272_v3  ;;  %4526 = vmatprep.mubr.msk.bf16.mxu1 %vm5274_vm2, %v5273_v30 }
  0x7c   : > { %4263 = vmatmul.mubr.msk.bf16.vlgmr.msra.gmra.mrb[16].mxu0 %vm327_vm1, %v262_v20 }
  0x7d   : > { %547 = vmatprep.mubr.bf16.mxu0 %v5272_v3 }
  0x84   : > { %4264 = vmatmul.mubr.msk.bf16.gmra.mrb[20].mxu0 %vm327_vm1, %v263_v23 }
  0x85   : > { %557 = vmatprep.mubr.bf16.mxu0 %v5272_v3 }
  0x8c   : > { %4265 = vmatmul.mubr.msk.bf16.gmra.mrb[24].mxu0 %vm327_vm1, %v264_v26 }
  0x8d   : > { %567 = vmatprep.mubr.bf16.mxu0 %v5272_v3 }
  0x94   : > { %4266 = vmatmul.mubr.msk.bf16.gmra.mrb[28].mxu0 %vm327_vm1, %v265_v29 }
  0x95   : > { %4550 = vmatprep.mubr.msk.bf16.mxu0 %vm5274_vm2, %v5273_v30 }
 0x12f   : > { %v393_v35 = vpop.f32.mrb[0].mxu0  ;;  %v466_v37 = vpop.f32.mrb[0].mxu1 }
 0x130   : > { %v5485_v36 = vpop.f32.mrb[1].mxu0  ;;  %v467_v40 = vadd.f32 %v466_v37, %v5483_v34  ;;  %v5493_v41 = vpop.f32.mrb[1].mxu1  ;;  %v394_v46 = vadd.f32 %v393_v35, %v5490_v38 }
 0x131   : > { %v397_v39 = vpop.f32.mrb[2].mxu0  ;;  %v470_v43 = vpop.f32.mrb[2].mxu1 }
 0x132   : > { %v5495_v42 = vpop.f32.mrb[3].mxu0  ;;  %v586_v44 = vpack.c.bf16 %v467_v40, %v467_v40  ;;  %v5497_v45 = vpop.f32.mrb[3].mxu1  ;;  %v471_v48 = vadd.f32 %v470_v43, %v5483_v34  ;;  %v578_v50 = vpack.c.bf16 %v394_v46, %v394_v46  ;;  %v398_v59 = vadd.f32 %v397_v39, %v5490_v38 }
 0x134   : > { %4525 = vmatpush3.bf16.xpose.msra.mxu1 %v586_v44  ;;  %v587_v56 = vpack.c.bf16 %v471_v48, %v471_v48  ;;  %v579_v6 = vpack.c.bf16 %v398_v59, %v398_v59 }
 0x135   : > { %4530 = vmatprep.subr.bf16.mxu1 %v5273_v30 }
 0x137   : > { %v403_v47 = vpop.f32.mrb[4].mxu0  ;;  %v476_v51 = vpop.f32.mrb[4].mxu1 }
 0x138   : > { %v5502_v49 = vpop.f32.mrb[5].mxu0  ;;  %v5504_v53 = vpop.f32.mrb[5].mxu1  ;;  %v477_v58 = vadd.f32 %v476_v51, %v5483_v34  ;;  %v404_v10 = vadd.f32 %v403_v47, %v5490_v38 }
 0x139   : > { %v407_v52 = vpop.f32.mrb[6].mxu0  ;;  %v480_v55 = vpop.f32.mrb[6].mxu1 }
 0x13a   : > { %v5506_v54 = vpop.f32.mrb[7].mxu0  ;;  %v5508_v57 = vpop.f32.mrb[7].mxu1  ;;  %v588_v0 = vpack.c.bf16 %v477_v58, %v477_v58  ;;  %v481_v13 = vadd.f32 %v480_v55, %v5483_v34  ;;  %v580_v16 = vpack.c.bf16 %v404_v10, %v404_v10  ;;  %v408_v29 = vadd.f32 %v407_v52, %v5490_v38 }
 0x13b   : > { %4527 = vmatmul.mubr.bf16.vlgmr.msra.gmra.mrb[16].mxu1 %v578_v50 }
 0x13c   : > { %4531 = vmatpush3.bf16.xpose.msra.mxu1 %v587_v56  ;;  %4532 = vmatprep.mubr.msk.bf16.mxu1 %vm5274_vm2, %v5273_v30  ;;  %v589_v24 = vpack.c.bf16 %v481_v13, %v481_v13  ;;  %v581_v48 = vpack.c.bf16 %v408_v29, %v408_v29 }
 0x13d   : > { %4536 = vmatprep.subr.bf16.mxu1 %v5273_v30 }
 0x13f   : > { %v413_v60 = vpop.f32.mrb[8].mxu0  ;;  %v486_v62 = vpop.f32.mrb[8].mxu1 }
 0x140   : > { %v5515_v61 = vpop.f32.mrb[9].mxu0  ;;  %v487_v1 = vadd.f32 %v486_v62, %v5483_v34  ;;  %v5518_v2 = vpop.f32.mrb[9].mxu1  ;;  %v414_v11 = vadd.f32 %v413_v60, %v5490_v38 }
 0x141   : > { %v417_v63 = vpop.f32.mrb[10].mxu0  ;;  %v490_v7 = vpop.f32.mrb[10].mxu1 }
 0x142   : > { %v5520_v5 = vpop.f32.mrb[11].mxu0  ;;  %v590_v8 = vpack.c.bf16 %v487_v1, %v487_v1  ;;  %v5522_v9 = vpop.f32.mrb[11].mxu1  ;;  %v582_v17 = vpack.c.bf16 %v414_v11, %v414_v11  ;;  %v491_v37 = vadd.f32 %v490_v7, %v5483_v34  ;;  %v418_v52 = vadd.f32 %v417_v63, %v5490_v38 }
 0x143   : > { %4533 = vmatmul.mubr.bf16.vlgmr.msra.gmra.mrb[20].mxu1 %v579_v6 }
 0x144   : > { %4537 = vmatpush3.bf16.xpose.msra.mxu1 %v588_v0  ;;  %4549 = vmatpush3.bf16.xpose.msra.mxu0 %v590_v8  ;;  %v591_v50 = vpack.c.bf16 %v491_v37, %v491_v37  ;;  %v583_v56 = vpack.c.bf16 %v418_v52, %v418_v52 }
 0x145   : > { %4538 = vmatprep.mubr.msk.bf16.mxu1 %vm5274_vm2, %v5273_v30  ;;  %4542 = vmatprep.subr.bf16.mxu1 %v5273_v30 }
 0x146   : > { %4560 = vmatprep.subr.bf16.mxu0 %v5273_v30 }
 0x147   : > { %v423_v12 = vpop.f32.mrb[12].mxu0  ;;  %v496_v18 = vpop.f32.mrb[12].mxu1 }
 0x148   : > { %v5531_v14 = vpop.f32.mrb[13].mxu0  ;;  %v497_v20 = vadd.f32 %v496_v18, %v5483_v34  ;;  %v5535_v21 = vpop.f32.mrb[13].mxu1  ;;  %v424_v28 = vadd.f32 %v423_v12, %v5490_v38 }
 0x149   : > { %v427_v19 = vpop.f32.mrb[14].mxu0  ;;  %v500_v23 = vpop.f32.mrb[14].mxu1 }
 0x14a   : > { %v5537_v22 = vpop.f32.mrb[15].mxu0  ;;  %v592_v25 = vpack.c.bf16 %v497_v20, %v497_v20  ;;  %v5539_v26 = vpop.f32.mrb[15].mxu1  ;;  %v584_v43 = vpack.c.bf16 %v424_v28, %v424_v28  ;;  %v501_v55 = vadd.f32 %v500_v23, %v5483_v34  ;;  %v428_v60 = vadd.f32 %v427_v19, %v5490_v38 }
 0x14b   : > { %4539 = vmatmul.mubr.bf16.vlgmr.msra.gmra.mrb[24].mxu1 %v580_v16  ;;  %4551 = vmatmul.mubr.bf16.vlgmr.msra.gmra.mrb[32].mxu0 %v582_v17 }
 0x14c   : > { %4543 = vmatpush3.bf16.xpose.msra.mxu1 %v589_v24  ;;  %4561 = vmatpush3.bf16.xpose.msra.mxu0 %v592_v25  ;;  %v593_v59 = vpack.c.bf16 %v501_v55, %v501_v55  ;;  %v585_v34 = vpack.c.bf16 %v428_v60, %v428_v60 }
 0x14d   : > { %4544 = vmatprep.mubr.msk.bf16.mxu1 %vm5274_vm2, %v5273_v30  ;;  %4562 = vmatprep.mubr.msk.bf16.mxu0 %vm5274_vm2, %v5273_v30 }
 0x14e   : > { %4554 = vmatprep.subr.bf16.mxu1 %v5273_v30  ;;  %4572 = vmatprep.subr.bf16.mxu0 %v5273_v30 }
 0x14f   : > { %v539_v35 = vpop.f32.mrb[16].mxu0 }
 0x150   : > { %v540_v39 = vadd.f32 %v539_v35, %v5542_v27  ;;  %v5553_v40 = vpop.f32.mrb[17].mxu0 }
 0x151   : > { %v543_v44 = vpop.f32.mrb[18].mxu0 }
 0x152   : > { %v594_v46 = vpack.c.bf16 %v540_v39, %v540_v39  ;;  %v5556_v47 = vpop.f32.mrb[19].mxu0  ;;  %v544_v58 = vadd.f32 %v543_v44, %v5542_v27 }
 0x153   : > { %4545 = vmatmul.mubr.bf16.vlgmr.msra.gmra.mrb[28].mxu1 %v581_v48  ;;  %4563 = vmatmul.mubr.bf16.vlgmr.msra.gmra.mrb[36].mxu0 %v584_v43 }
 0x154   : > { %v1024_v51 = vsel %vm1022_vm3, %v594_v46, 0  ;;  %4555 = vmatpush3.bf16.xpose.msra.mxu1 %v591_v50  ;;  %4556 = vmatprep.mubr.msk.bf16.mxu1 %vm5274_vm2, %v5273_v30  ;;  %v595_v62 = vpack.c.bf16 %v544_v58, %v544_v58 }
 0x155   : > { %4566 = vmatprep.subr.bf16.mxu1 %v5273_v30  ;;  %4573 = vmatpush3.bf16.msra.mxu0 %v1024_v51 }
 0x156   : > { %4574 = vmatprep.mubr.msk.bf16.mxu0 %vm5274_vm2, %v5273_v30  ;;  %4584 = vmatprep.subr.bf16.mxu0 %v5273_v30  ;;  %v1070_v63 = vsel %vm1022_vm3, %v595_v62, 0 }
 0x157   : > { %v5576_v0 = vpop.f32.mrb[20].mxu0 }
 0x158   : > { %v5578_v1 = vpop.f32.mrb[21].mxu0 }
 0x159   : > { %v5580_v6 = vpop.f32.mrb[22].mxu0 }
 0x15a   : > { %v5582_v38 = vpop.f32.mrb[23].mxu0 }
 0x15b   : > { %4557 = vmatmul.mubr.bf16.vlgmr.msra.gmra.mrb[32].mxu1 %v583_v56 }
 0x15c   : > { %4567 = vmatpush3.bf16.xpose.msra.mxu1 %v593_v59  ;;  %4568 = vmatprep.mubr.msk.bf16.mxu1 %vm5274_vm2, %v5273_v30 }
 0x15d   : > { %4578 = vmatprep.subr.bf16.mxu1 %v5273_v30 }
 0x15f   : > { %v5584_v7 = vpop.f32.mrb[24].mxu0 }
 0x160   : > { %v5586_v8 = vpop.f32.mrb[25].mxu0 }
 0x161   : > { %v5588_v10 = vpop.f32.mrb[26].mxu0 }
 0x162   : > { %v5590_v11 = vpop.f32.mrb[27].mxu0 }
 0x163   : > { %4569 = vmatmul.mubr.bf16.vlgmr.msra.gmra.mrb[36].mxu1 %v585_v34 }
 0x164   : > { %4579 = vmatpush3.bf16.msra.mxu1 %v1070_v63  ;;  %4580 = vmatprep.mubr.msk.bf16.mxu1 %vm5274_vm2, %v5273_v30 }
 0x165   : > { %4590 = vmatprep.subr.bf16.mxu1 %v5273_v30 }
 0x167   : > { %v5592_v12 = vpop.f32.mrb[28].mxu0 }
 0x168   : > { %v5594_v13 = vpop.f32.mrb[29].mxu0 }
 0x169   : > { %v5596_v15 = vpop.f32.mrb[30].mxu0 }
 0x16a   : > { %v5598_v16 = vpop.f32.mrb[31].mxu0 }
 0x20e   : > { %v636_v17 = vpop.f32.mrb[16].mxu1 }
 0x20f   : > { %v4528_v18 = vpop.f32.mrb[17].mxu1  ;;  %v923_v19 = vsel %vm922_vm4, %v636_v17, -inf }
 0x210   : > { %924 = vmax.xlane.f32.xlu0 %v923_v19  ;;  %v639_v20 = vpop.f32.mrb[18].mxu1 }
 0x211   : > { %v4529_v23 = vpop.f32.mrb[19].mxu1 }
 0x216   : > { %v676_v24 = vpop.f32.mrb[20].mxu1 }
 0x217   : > { %v4534_v25 = vpop.f32.mrb[21].mxu1  ;;  %v926_v28 = vsel %vm922_vm4, %v676_v24, -inf }
 0x218   : > { %927 = vmax.xlane.f32.xlu0 %v926_v28  ;;  %v679_v29 = vpop.f32.mrb[22].mxu1 }
 0x219   : > { %v4535_v35 = vpop.f32.mrb[23].mxu1 }
 0x21e   : > { %v716_v37 = vpop.f32.mrb[24].mxu1  ;;  %v796_v39 = vpop.f32.mrb[32].mxu0 }
 0x21f   : > { %v4540_v43 = vpop.f32.mrb[25].mxu1  ;;  %v935_v44 = vsel %vm922_vm4, %v796_v39, -inf  ;;  %v929_v46 = vsel %vm922_vm4, %v716_v37, -inf  ;;  %v4552_v48 = vpop.f32.mrb[33].mxu0 }
 0x220   : > { %936 = vmax.xlane.f32.xlu0 %v935_v44  ;;  %930 = vmax.xlane.f32.xlu1 %v929_v46  ;;  %v719_v50 = vpop.f32.mrb[26].mxu1  ;;  %v799_v51 = vpop.f32.mrb[34].mxu0 }
 0x221   : > { %v4541_v52 = vpop.f32.mrb[27].mxu1  ;;  %v4553_v55 = vpop.f32.mrb[35].mxu0 }
 0x226   : > { %v756_v56 = vpop.f32.mrb[28].mxu1  ;;  %v876_v58 = vpop.f32.mrb[36].mxu0 }
 0x227   : > { %v4546_v59 = vpop.f32.mrb[29].mxu1  ;;  %v941_v60 = vsel %vm922_vm4, %v876_v58, -inf  ;;  %v932_v62 = vsel %vm922_vm4, %v756_v56, -inf  ;;  %v4564_v34 = vpop.f32.mrb[37].mxu0 }
 0x228   : > { %942 = vmax.xlane.f32.xlu0 %v941_v60  ;;  %933 = vmax.xlane.f32.xlu1 %v932_v62  ;;  %v759_v63 = vpop.f32.mrb[30].mxu1  ;;  %v879_v18 = vpop.f32.mrb[38].mxu0 }
 0x229   : > { %v4547_v19 = vpop.f32.mrb[31].mxu1  ;;  %v4565_v20 = vpop.f32.mrb[39].mxu0 }
 0x22e   : > { %v836_v23 = vpop.f32.mrb[32].mxu1 }
 0x22f   : > { %v4558_v25 = vpop.f32.mrb[33].mxu1  ;;  %v938_v28 = vsel %vm922_vm4, %v836_v23, -inf }
 0x230   : > { %939 = vmax.xlane.f32.xlu1 %v938_v28  ;;  %v839_v29 = vpop.f32.mrb[34].mxu1 }
 0x231   : > { %v4559_v35 = vpop.f32.mrb[35].mxu1 }
 0x236   : > { %v916_v43 = vpop.f32.mrb[36].mxu1 }
 0x237   : > { %v4570_v44 = vpop.f32.mrb[37].mxu1  ;;  %v944_v46 = vsel %vm922_vm4, %v916_v43, -inf }
 0x238   : > { %945 = vmax.xlane.f32.xlu1 %v944_v46  ;;  %v919_v48 = vpop.f32.mrb[38].mxu1 }
 0x239   : > { %v4571_v50 = vpop.f32.mrb[39].mxu1 }
 0x29d   : > { %v925_v51 = vpop.xlane.xlu0 %924 }
 0x29e   : > { %v947_v52 = vsub.f32 %v636_v17, %v925_v51 }
 0x2a0   : > { %v955_v55 = vmul.f32 1.442695, %v947_v52 }
 0x2a2   : > { %5007 = vpow2.f32 %v955_v55 }
 0x2a5   : > { %v928_v59 = vpop.xlane.xlu0 %927 }
 0x2a6   : > { %v948_v60 = vsub.f32 %v676_v24, %v928_v59 }
 0x2a8   : > { %v957_v62 = vmul.f32 1.442695, %v948_v60 }
 0x2aa   : > { %5009 = vpow2.f32 %v957_v62 }
 0x2ac   : > { %v5008_v34 = vpop.eup %5007 }
 0x2ad   : > { %v937_v63 = vpop.xlane.xlu0 %936  ;;  %v931_v18 = vpop.xlane.xlu1 %930  ;;  %v971_v19 = vsel %vm922_vm4, %v5008_v34, 0.0 }
 0x2ae   : > { %v951_v20 = vsub.f32 %v796_v39, %v937_v63  ;;  %v949_v25 = vsub.f32 %v716_v37, %v931_v18  ;;  %972 = vadd.xlane.f32.xlu0 %v971_v19 }
 0x2b0   : > { %v959_v28 = vmul.f32 1.442695, %v949_v25  ;;  %v963_v29 = vmul.f32 1.442695, %v951_v20 }
 0x2b2   : > { %5011 = vpow2.f32 %v959_v28 }
 0x2b3   : > { %5013 = vpow2.f32 %v963_v29 }
 0x2b4   : > { %v5010_v35 = vpop.eup %5009 }
 0x2b5   : > { %v943_v17 = vpop.xlane.xlu0 %942  ;;  %v934_v44 = vpop.xlane.xlu1 %933  ;;  %v974_v46 = vsel %vm922_vm4, %v5010_v35, 0.0 }
 0x2b6   : > { %v953_v24 = vsub.f32 %v876_v58, %v943_v17  ;;  %v950_v48 = vsub.f32 %v756_v56, %v934_v44  ;;  %975 = vadd.xlane.f32.xlu1 %v974_v46  ;;  %v550_v44 = vadd.f32 %v5576_v0, %v5542_v27 }
 0x2b8   : > { %v967_v50 = vmul.f32 1.442695, %v953_v24  ;;  %v961_v51 = vmul.f32 1.442695, %v950_v48  ;;  %v596_v48 = vpack.c.bf16 %v550_v44, %v550_v44 }
 0x2ba   : > { %5015 = vpow2.f32 %v967_v50 }
 0x2bb   : > { %5017 = vpow2.f32 %v961_v51 }
 0x2bc   : > { %v5012_v52 = vpop.eup %5011 }
 0x2bd   : > { %v940_v39 = vpop.xlane.xlu1 %939  ;;  %v977_v55 = vsel %vm922_vm4, %v5012_v52, 0.0  ;;  %v5611_v59 = vpop.eup %5013 }
 0x2be   : > { %v952_v37 = vsub.f32 %v836_v23, %v940_v39  ;;  %978 = vadd.xlane.f32.xlu0 %v977_v55  ;;  %v983_v62 = vsel %vm922_vm4, %v5611_v59, 0.0  ;;  %v1116_v39 = vsel %vm1022_vm3, %v596_v48, 0 }
 0x2c0   : > { %v965_v60 = vmul.f32 1.442695, %v952_v37  ;;  %v554_v37 = vadd.f32 %v5580_v6, %v5542_v27  ;;  %v560_v6 = vadd.f32 %v5584_v7, %v5542_v27  ;;  %v570_v7 = vadd.f32 %v5592_v12, %v5542_v27 }
 0x2c2   : > { %5019 = vpow2.f32 %v965_v60  ;;  %984 = vadd.xlane.f32.xlu0 %v983_v62  ;;  %v597_v60 = vpack.c.bf16 %v554_v37, %v554_v37 }
 0x2c4   : > { %v5615_v56 = vpop.eup %5015 }
 0x2c5   : > { %v5617_v58 = vpop.eup %5017  ;;  %v946_v63 = vpop.xlane.xlu1 %945  ;;  %v989_v18 = vsel %vm922_vm4, %v5615_v56, 0.0 }
 0x2c6   : > { %v954_v23 = vsub.f32 %v916_v43, %v946_v63  ;;  %v980_v19 = vsel %vm922_vm4, %v5617_v58, 0.0  ;;  %990 = vadd.xlane.f32.xlu0 %v989_v18  ;;  %v1162_v18 = vsel %vm1022_vm3, %v597_v60, 0 }
 0x2c7   : > { %981 = vadd.xlane.f32.xlu1 %v980_v19 }
 0x2c8   : > { %v969_v20 = vmul.f32 1.442695, %v954_v23 }
 0x2ca   : > { %5021 = vpow2.f32 %v969_v20  ;;  %v598_v20 = vpack.c.bf16 %v560_v6, %v560_v6 }
 0x2cc   : > { %v5623_v25 = vpop.eup %5019 }
 0x2cd   : > { %v986_v28 = vsel %vm922_vm4, %v5623_v25, 0.0 }
 0x2ce   : > { %987 = vadd.xlane.f32.xlu1 %v986_v28 }
 0x2d4   : > { %v5627_v29 = vpop.eup %5021 }
 0x2d5   : > { %v992_v17 = vsel %vm922_vm4, %v5627_v29, 0.0 }
 0x2d6   : > { %993 = vadd.xlane.f32.xlu1 %v992_v17 }
 0x33b   : > { %v973_v43 = vpop.xlane.xlu0 %972 }
 0x33c   : > { %5023 = vrcp.f32 %v973_v43 }
 0x343   : > { %v976_v46 = vpop.xlane.xlu1 %975 }
 0x344   : > { %5025 = vrcp.f32 %v976_v46  ;;  %v1208_v46 = vsel %vm1022_vm3, %v598_v20, 0 }
 0x346   : > { %v5024_v24 = vpop.eup %5023 }
 0x347   : > { %v1003_v50 = vmul.f32 %v5024_v24, %v5008_v34  ;;  %v564_v24 = vadd.f32 %v5588_v10, %v5542_v27 }
 0x349   : > { %v1011_v51 = vpack.c.bf16 %v1003_v50, %v1003_v50  ;;  %v284_v50 = vsub.s32 3, %v5429_v4 }
 0x34b   : > { %4575 = vmatmul.mubr.msk.bf16.vlgmr.msra.gmra.mrb[40].mxu0 %vm922_vm4, %v1011_v51  ;;  %v979_v55 = vpop.xlane.xlu0 %978  ;;  %v600_v51 = vpack.c.bf16 %v570_v7, %v570_v7  ;;  %v5660_v10 = vrot.slane %v5477_v32, %v284_v50 }
 0x34c   : > { %4585 = vmatpush3.bf16.msra.mxu0 %v1116_v39  ;;  %4586 = vmatprep.mubr.msk.bf16.mxu0 %vm5274_vm2, %v5273_v30  ;;  %5027 = vrcp.f32 %v979_v55  ;;  %v599_v39 = vpack.c.bf16 %v564_v24, %v564_v24 }
 0x34d   : > { %4596 = vmatprep.subr.bf16.mxu0 %v5273_v30 }
 0x34e   : > { %v5026_v0 = vpop.eup %5025 }
 0x34f   : > { %v1004_v62 = vmul.f32 %v5026_v0, %v5010_v35  ;;  %v985_v34 = vpop.xlane.xlu0 %984 }
 0x350   : > { %5029 = vrcp.f32 %v985_v34  ;;  %v574_v34 = vadd.f32 %v5596_v15, %v5542_v27  ;;  %v469_v27 = vadd.f32 %v5493_v41, %v5660_v10 }
 0x351   : > { %v1012_v63 = vpack.c.bf16 %v1004_v62, %v1004_v62  ;;  %v1300_v62 = vsel %vm1022_vm3, %v600_v51, 0  ;;  %v292_v51 = vsub.s32 5, %v5429_v4 }
 0x352   : > { %v601_v15 = vpack.c.bf16 %v574_v34, %v574_v34 }
 0x353   : > { %4581 = vmatmul.mubr.msk.bf16.vlgmr.msra.gmra.mrb[40].mxu1 %vm922_vm4, %v1012_v63  ;;  %v991_v19 = vpop.xlane.xlu0 %990 }
 0x354   : > { %4591 = vmatpush3.bf16.msra.mxu1 %v1162_v18  ;;  %v982_v23 = vpop.xlane.xlu1 %981  ;;  %4592 = vmatprep.mubr.msk.bf16.mxu1 %vm5274_vm2, %v5273_v30  ;;  %v276_v18 = vsub.s32 1, %v5429_v4 }
 0x355   : > { %4602 = vmatprep.subr.bf16.mxu1 %v5273_v30  ;;  %5031 = vrcp.f32 %v982_v23 }
 0x356   : > { %v5028_v35 = vpop.eup %5027  ;;  %5033 = vrcp.f32 %v991_v19  ;;  %v5682_v19 = vrot.slane %v5477_v32, %v276_v18 }
 0x357   : > { %v1005_v28 = vmul.f32 %v5028_v35, %v5012_v52  ;;  %v1396_v35 = vpack.c.bf16 %v469_v27, %v469_v27 }
 0x358   : > { %v396_v20 = vadd.f32 %v5485_v36, %v5682_v19  ;;  %v406_v36 = vadd.f32 %v5502_v49, %v5682_v19 }
 0x359   : > { %v1013_v17 = vpack.c.bf16 %v1005_v28, %v1005_v28 }
 0x35a   : > { %v5030_v43 = vpop.eup %5029 }
 0x35b   : > { %v988_v44 = vpop.xlane.xlu1 %987  ;;  %4587 = vmatmul.mubr.msk.bf16.vlgmr.msra.gmra.mrb[44].mxu0 %vm922_vm4, %v1013_v17  ;;  %v1007_v52 = vmul.f32 %v5030_v43, %v5611_v59  ;;  %v1254_v59 = vsel %vm1022_vm3, %v599_v39, 0  ;;  %v479_v17 = vadd.f32 %v5504_v53, %v5660_v10  ;;  %v473_v43 = vadd.f32 %v5497_v45, %v5660_v10 }
 0x35c   : > { %5035 = vrcp.f32 %v988_v44  ;;  %4597 = vmatpush3.bf16.msra.mxu0 %v1208_v46  ;;  %4598 = vmatprep.mubr.msk.bf16.mxu0 %vm5274_vm2, %v5273_v30  ;;  %v1388_v46 = vpack.c.bf16 %v396_v20, %v396_v20  ;;  %v400_v45 = vadd.f32 %v5495_v42, %v5682_v19  ;;  %v489_v53 = vadd.f32 %v5518_v2, %v5660_v10 }
 0x35d   : > { %4608 = vmatprep.subr.bf16.mxu0 %v5273_v30  ;;  %v1015_v37 = vpack.c.bf16 %v1007_v52, %v1007_v52  ;;  %v1398_v7 = vpack.c.bf16 %v479_v17, %v479_v17  ;;  %v1397_v24 = vpack.c.bf16 %v473_v43, %v473_v43  ;;  %v1390_v52 = vpack.c.bf16 %v406_v36, %v406_v36 }
 0x35e   : > { %v1400_v49 = vpack.c.bf16 %v489_v53, %v489_v53  ;;  %v416_v42 = vadd.f32 %v5515_v61, %v5682_v19  ;;  %v410_v2 = vadd.f32 %v5506_v54, %v5682_v19  ;;  %v493_v39 = vadd.f32 %v5522_v9, %v5660_v10 }
 0x35f   : > { %v5032_v48 = vpop.eup %5031  ;;  %v5730_v61 = vrot.slane %v5477_v32, %v292_v51  ;;  %v420_v32 = vadd.f32 %v5520_v5, %v5682_v19  ;;  %v503_v9 = vadd.f32 %v5539_v26, %v5660_v10  ;;  %v430_v26 = vadd.f32 %v5537_v22, %v5682_v19 }
 0x360   : > { %v1006_v12 = vmul.f32 %v5032_v48, %v5617_v58  ;;  %v5034_v55 = vpop.eup %5033  ;;  %v1389_v48 = vpack.c.bf16 %v400_v45, %v400_v45  ;;  %v1401_v54 = vpack.c.bf16 %v493_v39, %v493_v39 }
 0x361   : > { %v1009_v63 = vmul.f32 %v5034_v55, %v5615_v56  ;;  %v546_v5 = vadd.f32 %v5556_v47, %v5730_v61  ;;  %v1395_v34 = vpack.c.bf16 %v430_v26, %v430_v26 }
 0x362   : > { %v1014_v0 = vpack.c.bf16 %v1006_v12, %v1006_v12  ;;  %v1392_v12 = vpack.c.bf16 %v416_v42, %v416_v42 }
 0x363   : > { %v994_v60 = vpop.xlane.xlu1 %993  ;;  %4599 = vmatmul.mubr.msk.bf16.vlgmr.msra.gmra.mrb[48].mxu0 %vm922_vm4, %v1015_v37  ;;  %v1017_v23 = vpack.c.bf16 %v1009_v63, %v1009_v63  ;;  %v1391_v37 = vpack.c.bf16 %v410_v2, %v410_v2 }
 0x364   : > { %5037 = vrcp.f32 %v994_v60  ;;  %4593 = vmatmul.mubr.msk.bf16.vlgmr.msra.gmra.mrb[44].mxu1 %vm922_vm4, %v1014_v0  ;;  %4609 = vmatpush3.bf16.msra.mxu0 %v1300_v62  ;;  %v426_v0 = vadd.f32 %v5531_v14, %v5682_v19  ;;  %v1393_v14 = vpack.c.bf16 %v420_v32, %v420_v32  ;;  %v1403_v62 = vpack.c.bf16 %v503_v9, %v503_v9 }
 0x365   : > { %4603 = vmatpush3.bf16.msra.mxu1 %v1254_v59  ;;  %4604 = vmatprep.mubr.msk.bf16.mxu1 %vm5274_vm2, %v5273_v30 }
 0x366   : > { %v5036_v58 = vpop.eup %5035  ;;  %4610 = vmatprep.mubr.msk.bf16.mxu0 %vm5274_vm2, %v5273_v30  ;;  %4614 = vmatprep.subr.bf16.mxu1 %v5273_v30  ;;  %v1394_v60 = vpack.c.bf16 %v426_v0, %v426_v0 }
 0x367   : > { %v1008_v6 = vmul.f32 %v5036_v58, %v5623_v25  ;;  %4620 = vmatprep.subr.bf16.mxu0 %v5273_v30  ;;  %v1346_v25 = vsel %vm1022_vm3, %v601_v15, 0 }
 0x369   : > { %v1016_v56 = vpack.c.bf16 %v1008_v6, %v1008_v6 }
 0x36b   : > { %4611 = vmatmul.mubr.msk.bf16.vlgmr.msra.gmra.mrb[52].mxu0 %vm922_vm4, %v1017_v23 }
 0x36c   : > { %4605 = vmatmul.mubr.msk.bf16.vlgmr.msra.gmra.mrb[48].mxu1 %vm922_vm4, %v1016_v56  ;;  %4622 = vmatprep.mubr.msk.bf16.mxu0 %vm5274_vm2, %v5273_v30 }
 0x36d   : > { %4615 = vmatpush3.bf16.msra.mxu1 %v1346_v25  ;;  %4621 = vmatpush3.bf16.xpose.msra.mxu0 %v1396_v35 }
 0x36e   : > { %v5038_v41 = vpop.eup %5037  ;;  %4616 = vmatprep.mubr.msk.bf16.mxu1 %vm5274_vm2, %v5273_v30  ;;  %4626 = vmatprep.subr.bf16.mxu1 %v5273_v30 }
 0x36f   : > { %v1010_v28 = vmul.f32 %v5038_v41, %v5627_v29  ;;  %4632 = vmatprep.subr.bf16.mxu0 %v5273_v30  ;;  %v483_v29 = vadd.f32 %v5508_v57, %v5660_v10  ;;  %v499_v57 = vadd.f32 %v5535_v21, %v5660_v10  ;;  %v542_v21 = vadd.f32 %v5553_v40, %v5730_v61 }
 0x370   : > { %v1405_v10 = vpack.c.bf16 %v546_v5, %v546_v5 }
 0x371   : > { %v1018_v44 = vpack.c.bf16 %v1010_v28, %v1010_v28  ;;  %v1399_v50 = vpack.c.bf16 %v483_v29, %v483_v29  ;;  %v1402_v55 = vpack.c.bf16 %v499_v57, %v499_v57  ;;  %v1404_v40 = vpack.c.bf16 %v542_v21, %v542_v21 }
 0x372   : > { %v1878_v47 = vsel %vm1022_vm3, %v1405_v10, 0 }
 0x373   : > { %v1832_v59 = vsel %vm1022_vm3, %v1404_v40, 0 }
 0x374   : > { %4617 = vmatmul.mubr.msk.bf16.vlgmr.msra.gmra.mrb[52].mxu1 %vm922_vm4, %v1018_v44  ;;  %4623 = vmatmul.mubr.bf16.vlgmr.msra.gmra.mrb[56].mxu0 %v1388_v46 }
 0x375   : > { %4633 = vmatpush3.bf16.xpose.msra.mxu0 %v1398_v7  ;;  %4628 = vmatprep.mubr.msk.bf16.mxu1 %vm5274_vm2, %v5273_v30 }
 0x376   : > { %4627 = vmatpush3.bf16.xpose.msra.mxu1 %v1397_v24  ;;  %4634 = vmatprep.mubr.msk.bf16.mxu0 %vm5274_vm2, %v5273_v30 }
 0x377   : > { %4638 = vmatprep.subr.bf16.mxu1 %v5273_v30  ;;  %4644 = vmatprep.subr.bf16.mxu0 %v5273_v30 }
 0x37c   : > { %4635 = vmatmul.mubr.bf16.vlgmr.msra.gmra.mrb[60].mxu0 %v1390_v52 }
 0x37d   : > { %4629 = vmatmul.mubr.bf16.vlgmr.msra.gmra.mrb[56].mxu1 %v1389_v48  ;;  %4645 = vmatpush3.bf16.xpose.msra.mxu0 %v1400_v49 }
 0x37e   : > { %4639 = vmatpush3.bf16.xpose.msra.mxu1 %v1399_v50  ;;  %4640 = vmatprep.mubr.msk.bf16.mxu1 %vm5274_vm2, %v5273_v30 }
 0x37f   : > { %4646 = vmatprep.mubr.msk.bf16.mxu0 %vm5274_vm2, %v5273_v30  ;;  %4650 = vmatprep.subr.bf16.mxu1 %v5273_v30 }
 0x380   : > { %4656 = vmatprep.subr.bf16.mxu0 %v5273_v30 }
 0x384   : > { %4647 = vmatmul.mubr.bf16.vlgmr.msra.gmra.mrb[64].mxu0 %v1392_v12 }
 0x385   : > { %4641 = vmatmul.mubr.bf16.vlgmr.msra.gmra.mrb[60].mxu1 %v1391_v37  ;;  %4657 = vmatpush3.bf16.xpose.msra.mxu0 %v1402_v55 }
 0x386   : > { %4651 = vmatpush3.bf16.xpose.msra.mxu1 %v1401_v54  ;;  %4652 = vmatprep.mubr.msk.bf16.mxu1 %vm5274_vm2, %v5273_v30 }
 0x387   : > { %4658 = vmatprep.mubr.msk.bf16.mxu0 %vm5274_vm2, %v5273_v30  ;;  %4662 = vmatprep.subr.bf16.mxu1 %v5273_v30 }
 0x388   : > { %4668 = vmatprep.subr.bf16.mxu0 %v5273_v30 }
 0x38c   : > { %4659 = vmatmul.mubr.bf16.vlgmr.msra.gmra.mrb[68].mxu0 %v1394_v60 }
 0x38d   : > { %4653 = vmatmul.mubr.bf16.vlgmr.msra.gmra.mrb[64].mxu1 %v1393_v14  ;;  %4669 = vmatpush3.bf16.msra.mxu0 %v1832_v59 }
 0x38e   : > { %4663 = vmatpush3.bf16.xpose.msra.mxu1 %v1403_v62  ;;  %4664 = vmatprep.mubr.msk.bf16.mxu1 %vm5274_vm2, %v5273_v30 }
 0x38f   : > { %4674 = vmatprep.subr.bf16.mxu1 %v5273_v30  ;;  %4670 = vmatprep.mubr.msk.bf16.mxu0 %vm5274_vm2, %v5273_v30 }
 0x390   : > { %4680 = vmatprep.subr.bf16.mxu0 %v5273_v30 }
 0x395   : > { %4665 = vmatmul.mubr.bf16.vlgmr.msra.gmra.mrb[68].mxu1 %v1395_v34 }
 0x396   : > { %4675 = vmatpush3.bf16.msra.mxu1 %v1878_v47  ;;  %4676 = vmatprep.mubr.msk.bf16.mxu1 %vm5274_vm2, %v5273_v30 }
 0x397   : > { %4686 = vmatprep.subr.bf16.mxu1 %v5273_v30 }
 0x41e   : > { %v5762_v58 = vpop.f32.mrb[40].mxu0 }
 0x41f   : > { %v4576_v22 = vpop.f32.mrb[41].mxu0 }
 0x420   : > { %v1063_v63 = vpop.f32.mrb[42].mxu0 }
 0x421   : > { %v4577_v6 = vpop.f32.mrb[43].mxu0 }
 0x426   : > { %v5764_v27 = vpop.f32.mrb[40].mxu1 }
 0x427   : > { %v2196_v15 = vpack.c.bf16 %v5764_v27, %v5762_v58  ;;  %v4582_v56 = vpop.f32.mrb[41].mxu1 }
 0x428   : > { %v1109_v23 = vpop.f32.mrb[42].mxu1 }
 0x429   : > { %v4583_v19 = vpop.f32.mrb[43].mxu1 }
 0x42e   : > { %v5768_v35 = vpop.f32.mrb[44].mxu0 }
 0x42f   : > { %v4588_v25 = vpop.f32.mrb[45].mxu0 }
 0x430   : > { %v1155_v41 = vpop.f32.mrb[46].mxu0 }
 0x431   : > { %v4589_v20 = vpop.f32.mrb[47].mxu0 }
 0x436   : > { %v5770_v28 = vpop.f32.mrb[48].mxu0 }
 0x437   : > { %v5772_v17 = vpop.f32.mrb[44].mxu1  ;;  %v4600_v43 = vpop.f32.mrb[49].mxu0 }
 0x438   : > { %v2198_v44 = vpack.c.bf16 %v5772_v17, %v5768_v35  ;;  %v4594_v46 = vpop.f32.mrb[45].mxu1  ;;  %v1247_v7 = vpop.f32.mrb[50].mxu0 }
 0x439   : > { %v1201_v24 = vpop.f32.mrb[46].mxu1  ;;  %v4601_v36 = vpop.f32.mrb[51].mxu0 }
 0x43a   : > { %v4595_v45 = vpop.f32.mrb[47].mxu1 }
 0x43e   : > { %v5776_v53 = vpop.f32.mrb[52].mxu0 }
 0x43f   : > { %v5778_v29 = vpop.f32.mrb[48].mxu1  ;;  %v4612_v52 = vpop.f32.mrb[53].mxu0 }
 0x440   : > { %v2200_v48 = vpack.c.bf16 %v5778_v29, %v5770_v28  ;;  %v4606_v49 = vpop.f32.mrb[49].mxu1  ;;  %v1339_v50 = vpop.f32.mrb[54].mxu0 }
 0x441   : > { %v1293_v51 = vpop.f32.mrb[50].mxu1  ;;  %v4613_v42 = vpop.f32.mrb[55].mxu0 }
 0x442   : > { %v4607_v2 = vpop.f32.mrb[51].mxu1 }
 0x447   : > { %v5782_v57 = vpop.f32.mrb[52].mxu1  ;;  %v1446_v39 = vpop.f32.mrb[56].mxu0 }
 0x448   : > { %v2202_v12 = vpack.c.bf16 %v5782_v57, %v5776_v53  ;;  %v4618_v37 = vpop.f32.mrb[53].mxu1  ;;  %v4624_v55 = vpop.f32.mrb[57].mxu0  ;;  %v1732_v54 = vsel %vm922_vm4, %v1446_v39, -inf }
 0x449   : > { %1733 = vmax.xlane.f32.xlu0 %v1732_v54  ;;  %v1385_v21 = vpop.f32.mrb[54].mxu1  ;;  %v1449_v0 = vpop.f32.mrb[58].mxu0 }
 0x44a   : > { %v4619_v32 = vpop.f32.mrb[55].mxu1  ;;  %v4625_v9 = vpop.f32.mrb[59].mxu0 }
 0x44f   : > { %v1526_v40 = vpop.f32.mrb[60].mxu0 }
 0x450   : > { %v1486_v60 = vpop.f32.mrb[56].mxu1  ;;  %v4636_v14 = vpop.f32.mrb[61].mxu0  ;;  %v1738_v62 = vsel %vm922_vm4, %v1526_v40, -inf }
 0x451   : > { %v4630_v59 = vpop.f32.mrb[57].mxu1  ;;  %1739 = vmax.xlane.f32.xlu0 %v1738_v62  ;;  %v1529_v5 = vpop.f32.mrb[62].mxu0  ;;  %v1735_v26 = vsel %vm922_vm4, %v1486_v60, -inf }
 0x452   : > { %1736 = vmax.xlane.f32.xlu1 %v1735_v26  ;;  %v1489_v10 = vpop.f32.mrb[58].mxu1  ;;  %v4637_v34 = vpop.f32.mrb[63].mxu0 }
 0x453   : > { %v4631_v47 = vpop.f32.mrb[59].mxu1 }
 0x457   : > { %v1606_v22 = vpop.f32.mrb[64].mxu0 }
 0x458   : > { %v1566_v63 = vpop.f32.mrb[60].mxu1  ;;  %v4648_v6 = vpop.f32.mrb[65].mxu0  ;;  %v1744_v56 = vsel %vm922_vm4, %v1606_v22, -inf }
 0x459   : > { %v4642_v23 = vpop.f32.mrb[61].mxu1  ;;  %1745 = vmax.xlane.f32.xlu0 %v1744_v56  ;;  %v1609_v19 = vpop.f32.mrb[66].mxu0  ;;  %v1741_v25 = vsel %vm922_vm4, %v1566_v63, -inf }
 0x45a   : > { %1742 = vmax.xlane.f32.xlu1 %v1741_v25  ;;  %v1569_v41 = vpop.f32.mrb[62].mxu1  ;;  %v4649_v20 = vpop.f32.mrb[67].mxu0 }
 0x45b   : > { %v4643_v43 = vpop.f32.mrb[63].mxu1 }
 0x45f   : > { %v1686_v46 = vpop.f32.mrb[68].mxu0 }
 0x460   : > { %v1646_v7 = vpop.f32.mrb[64].mxu1  ;;  %v4660_v24 = vpop.f32.mrb[69].mxu0  ;;  %v1750_v36 = vsel %vm922_vm4, %v1686_v46, -inf }
 0x461   : > { %v4654_v45 = vpop.f32.mrb[65].mxu1  ;;  %1751 = vmax.xlane.f32.xlu0 %v1750_v36  ;;  %v1689_v52 = vpop.f32.mrb[70].mxu0  ;;  %v1747_v49 = vsel %vm922_vm4, %v1646_v7, -inf }
 0x462   : > { %1748 = vmax.xlane.f32.xlu1 %v1747_v49  ;;  %v1649_v50 = vpop.f32.mrb[66].mxu1  ;;  %v4661_v51 = vpop.f32.mrb[71].mxu0 }
 0x463   : > { %v4655_v42 = vpop.f32.mrb[67].mxu1 }
 0x468   : > { %v1726_v2 = vpop.f32.mrb[68].mxu1 }
 0x469   : > { %v4666_v37 = vpop.f32.mrb[69].mxu1  ;;  %v1753_v55 = vsel %vm922_vm4, %v1726_v2, -inf }
 0x46a   : > { %1754 = vmax.xlane.f32.xlu1 %v1753_v55  ;;  %v1729_v54 = vpop.f32.mrb[70].mxu1 }
 0x46b   : > { %v4667_v21 = vpop.f32.mrb[71].mxu1 }
 0x4d6   : > { %v1734_v0 = vpop.xlane.xlu0 %1733 }
 0x4d7   : > { %v1756_v32 = vsub.f32 %v1446_v39, %v1734_v0 }
 0x4d9   : > { %v1764_v9 = vmul.f32 1.442695, %v1756_v32 }
 0x4db   : > { %5039 = vpow2.f32 %v1764_v9  ;;  %v552_v9 = vadd.f32 %v5578_v1, %v5730_v61 }
 0x4de   : > { %v1740_v14 = vpop.xlane.xlu0 %1739 }
 0x4df   : > { %v1758_v62 = vsub.f32 %v1526_v40, %v1740_v14  ;;  %v1737_v59 = vpop.xlane.xlu1 %1736 }
 0x4e0   : > { %v1757_v5 = vsub.f32 %v1486_v60, %v1737_v59 }
 0x4e1   : > { %v1768_v26 = vmul.f32 1.442695, %v1758_v62 }
 0x4e2   : > { %v1766_v10 = vmul.f32 1.442695, %v1757_v5  ;;  %v1406_v5 = vpack.c.bf16 %v552_v9, %v552_v9 }
 0x4e3   : > { %5041 = vpow2.f32 %v1768_v26 }
 0x4e4   : > { %5043 = vpow2.f32 %v1766_v10 }
 0x4e5   : > { %v5040_v34 = vpop.eup %5039 }
 0x4e6   : > { %v1746_v47 = vpop.xlane.xlu0 %1745  ;;  %v1780_v6 = vsel %vm922_vm4, %v5040_v34, 0.0 }
 0x4e7   : > { %v1760_v56 = vsub.f32 %v1606_v22, %v1746_v47  ;;  %v1743_v23 = vpop.xlane.xlu1 %1742  ;;  %1781 = vadd.xlane.f32.xlu0 %v1780_v6  ;;  %v1924_v47 = vsel %vm1022_vm3, %v1406_v5, 0  ;;  %v562_v6 = vadd.f32 %v5586_v8, %v5730_v61  ;;  %v4945_v5 = vld [vmem:[%s6356_s2 + $0x48] sm:$0xff]  }
 0x4e8   : > { %v1759_v19 = vsub.f32 %v1566_v63, %v1743_v23  ;;  %v556_v23 = vadd.f32 %v5582_v38, %v5730_v61  ;;  %v572_v38 = vadd.f32 %v5594_v13, %v5730_v61 }
 0x4e9   : > { %v1772_v25 = vmul.f32 1.442695, %v1760_v56 }
 0x4ea   : > { %v1770_v39 = vmul.f32 1.442695, %v1759_v19  ;;  %v1407_v8 = vpack.c.bf16 %v556_v23, %v556_v23 }
 0x4eb   : > { %5045 = vpow2.f32 %v1772_v25  ;;  %v1408_v25 = vpack.c.bf16 %v562_v6, %v562_v6  ;;  %v4948_v6 = vld [vmem:[%s6356_s2 + $0x10] sm:$0xff]  }
 0x4ec   : > { %5047 = vpow2.f32 %v1770_v39 }
 0x4ed   : > { %v5042_v41 = vpop.eup %5041 }
 0x4ee   : > { %v5044_v40 = vpop.eup %5043  ;;  %v1752_v20 = vpop.xlane.xlu0 %1751  ;;  %v1786_v60 = vsel %vm922_vm4, %v5042_v41, 0.0 }
 0x4ef   : > { %v1762_v43 = vsub.f32 %v1686_v46, %v1752_v20  ;;  %v1749_v24 = vpop.xlane.xlu1 %1748  ;;  %1787 = vadd.xlane.f32.xlu0 %v1786_v60  ;;  %v1783_v36 = vsel %vm922_vm4, %v5044_v40, 0.0 }
 0x4f0   : > { %v1761_v45 = vsub.f32 %v1646_v7, %v1749_v24  ;;  %1784 = vadd.xlane.f32.xlu1 %v1783_v36  ;;  %v2016_v24 = vsel %vm1022_vm3, %v1408_v25, 0  ;;  %v4954_v25 = vld [vmem:[%s6356_s2 + $0x28] sm:$0xff]  }
 0x4f1   : > { %v1776_v22 = vmul.f32 1.442695, %v1762_v43 }
 0x4f2   : > { %v1774_v52 = vmul.f32 1.442695, %v1761_v45  ;;  %v1970_v45 = vsel %vm1022_vm3, %v1407_v8, 0  ;;  %v4956_v8 = vld [vmem:[%s6356_s2 + $0x30] sm:$0xff]  }
 0x4f3   : > { %5049 = vpow2.f32 %v1776_v22  ;;  %v566_v22 = vadd.f32 %v5590_v11, %v5730_v61 }
 0x4f4   : > { %5051 = vpow2.f32 %v1774_v52  ;;  %v1410_v52 = vpack.c.bf16 %v572_v38, %v572_v38 }
 0x4f5   : > { %v5797_v63 = vpop.eup %5045 }
 0x4f6   : > { %v5799_v49 = vpop.eup %5047  ;;  %v1792_v50 = vsel %vm922_vm4, %v5797_v63, 0.0 }
 0x4f7   : > { %v1755_v51 = vpop.xlane.xlu1 %1754  ;;  %1793 = vadd.xlane.f32.xlu0 %v1792_v50  ;;  %v1789_v46 = vsel %vm922_vm4, %v5799_v49, 0.0  ;;  %v1409_v50 = vpack.c.bf16 %v566_v22, %v566_v22 }
 0x4f8   : > { %v1763_v42 = vsub.f32 %v1726_v2, %v1755_v51  ;;  %1790 = vadd.xlane.f32.xlu1 %v1789_v46 }
 0x4fa   : > { %v1778_v7 = vmul.f32 1.442695, %v1763_v42 }
 0x4fc   : > { %5053 = vpow2.f32 %v1778_v7  ;;  %v2108_v7 = vsel %vm1022_vm3, %v1410_v52, 0 }
 0x4fd   : > { %v5805_v37 = vpop.eup %5049 }
 0x4fe   : > { %v5807_v55 = vpop.eup %5051  ;;  %v1798_v54 = vsel %vm922_vm4, %v5805_v37, 0.0 }
 0x4ff   : > { %1799 = vadd.xlane.f32.xlu0 %v1798_v54  ;;  %v1795_v21 = vsel %vm922_vm4, %v5807_v55, 0.0  ;;  %v4943_v54 = vld [vmem:[%s6356_s2 + $0x40] sm:$0xff]  }
 0x500   : > { %1796 = vadd.xlane.f32.xlu1 %v1795_v21  ;;  %v2062_v21 = vsel %vm1022_vm3, %v1409_v50, 0 }
 0x506   : > { %v5813_v0 = vpop.eup %5053 }
 0x507   : > { %v1801_v2 = vsel %vm922_vm4, %v5813_v0, 0.0 }
 0x508   : > { %1802 = vadd.xlane.f32.xlu1 %v1801_v2 }
 0x574   : > { %v1782_v32 = vpop.xlane.xlu0 %1781 }
 0x575   : > { %5055 = vrcp.f32 %v1782_v32 }
 0x57c   : > { %v1788_v14 = vpop.xlane.xlu0 %1787 }
 0x57d   : > { %5057 = vrcp.f32 %v1788_v14  ;;  %v1785_v62 = vpop.xlane.xlu1 %1784  ;;  %v4944_v14 = vld [vmem:[%s6356_s2] sm:$0xff]  }
 0x57e   : > { %5059 = vrcp.f32 %v1785_v62 }
 0x57f   : > { %v5056_v59 = vpop.eup %5055 }
 0x580   : > { %v1812_v26 = vmul.f32 %v5056_v59, %v5040_v34 }
 0x582   : > { %v1820_v10 = vpack.c.bf16 %v1812_v26, %v1812_v26 }
 0x584   : > { %4671 = vmatmul.mubr.msk.bf16.vlgmr.msra.gmra.mrb[72].mxu0 %vm922_vm4, %v1820_v10  ;;  %v1794_v56 = vpop.xlane.xlu0 %1793 }
 0x585   : > { %4681 = vmatpush3.bf16.msra.mxu0 %v1924_v47  ;;  %5061 = vrcp.f32 %v1794_v56  ;;  %v1791_v1 = vpop.xlane.xlu1 %1790  ;;  %4682 = vmatprep.mubr.msk.bf16.mxu0 %vm5274_vm2, %v5273_v30  ;;  %v4949_v56 = vld [vmem:[%s6356_s2 + $0x58] sm:$0xff]  }
 0x586   : > { %5063 = vrcp.f32 %v1791_v1  ;;  %4692 = vmatprep.subr.bf16.mxu0 %v5273_v30  ;;  %v4950_v1 = vld [vmem:[%s6356_s2 + $0x18] sm:$0xff]  }
 0x587   : > { %v5058_v34 = vpop.eup %5057 }
 0x588   : > { %v5060_v19 = vpop.eup %5059  ;;  %v1814_v39 = vmul.f32 %v5058_v34, %v5042_v41  ;;  %v4952_v34 = vld [vmem:[%s6356_s2 + $0x20] sm:$0xff]  }
 0x589   : > { %v1813_v20 = vmul.f32 %v5060_v19, %v5044_v40  ;;  %v4953_v19 = vld [vmem:[%s6356_s2 + $0x68] sm:$0xff]  }
 0x58a   : > { %v1822_v60 = vpack.c.bf16 %v1814_v39, %v1814_v39  ;;  %v4955_v39 = vld [vmem:[%s6356_s2 + $0x70] sm:$0xff]  }
 0x58b   : > { %v1821_v43 = vpack.c.bf16 %v1813_v20, %v1813_v20  ;;  %v4957_v20 = vld [vmem:[%s6356_s2 + $0x78] sm:$0xff]  }
 0x58c   : > { %4683 = vmatmul.mubr.msk.bf16.vlgmr.msra.gmra.mrb[76].mxu0 %vm922_vm4, %v1822_v60  ;;  %v1800_v36 = vpop.xlane.xlu0 %1799  ;;  %v4958_v60 = vld [vmem:[%s6356_s2 + $0x38] sm:$0xff]  }
 0x58d   : > { %4693 = vmatpush3.bf16.msra.mxu0 %v2016_v24  ;;  %5065 = vrcp.f32 %v1800_v36  ;;  %4677 = vmatmul.mubr.msk.bf16.vlgmr.msra.gmra.mrb[72].mxu1 %vm922_vm4, %v1821_v43  ;;  %v1797_v41 = vpop.xlane.xlu1 %1796 }
 0x58e   : > { %4687 = vmatpush3.bf16.msra.mxu1 %v1970_v45  ;;  %5067 = vrcp.f32 %v1797_v41  ;;  %4688 = vmatprep.mubr.msk.bf16.mxu1 %vm5274_vm2, %v5273_v30 }
 0x58f   : > { %v5062_v40 = vpop.eup %5061  ;;  %4694 = vmatprep.mubr.msk.bf16.mxu0 %vm5274_vm2, %v5273_v30  ;;  %4698 = vmatprep.subr.bf16.mxu1 %v5273_v30 }
 0x590   : > { %v5064_v13 = vpop.eup %5063  ;;  %v1816_v11 = vmul.f32 %v5062_v40, %v5797_v63  ;;  %4704 = vmatprep.subr.bf16.mxu0 %v5273_v30  ;;  %v576_v63 = vadd.f32 %v5598_v16, %v5730_v61 }
 0x591   : > { %v1815_v51 = vmul.f32 %v5064_v13, %v5799_v49 }
 0x592   : > { %v1824_v46 = vpack.c.bf16 %v1816_v11, %v1816_v11  ;;  %v1411_v16 = vpack.c.bf16 %v576_v63, %v576_v63 }
 0x593   : > { %v1823_v42 = vpack.c.bf16 %v1815_v51, %v1815_v51 }
 0x594   : > { %4695 = vmatmul.mubr.msk.bf16.vlgmr.msra.gmra.mrb[80].mxu0 %vm922_vm4, %v1824_v46  ;;  %v2154_v26 = vsel %vm1022_vm3, %v1411_v16, 0 }
 0x595   : > { %4689 = vmatmul.mubr.msk.bf16.vlgmr.msra.gmra.mrb[76].mxu1 %vm922_vm4, %v1823_v42  ;;  %4705 = vmatpush3.bf16.msra.mxu0 %v2108_v7  ;;  %v1803_v2 = vpop.xlane.xlu1 %1802 }
 0x596   : > { %4699 = vmatpush3.bf16.msra.mxu1 %v2062_v21  ;;  %5069 = vrcp.f32 %v1803_v2  ;;  %4700 = vmatprep.mubr.msk.bf16.mxu1 %vm5274_vm2, %v5273_v30 }
 0x597   : > { %v5066_v49 = vpop.eup %5065  ;;  %4706 = vmatprep.mubr.msk.bf16.mxu0 %vm5274_vm2, %v5273_v30  ;;  %4710 = vmatprep.subr.bf16.mxu1 %v5273_v30 }
 0x598   : > { %v5068_v32 = vpop.eup %5067  ;;  %v1818_v9 = vmul.f32 %v5066_v49, %v5805_v37  ;;  %4422 = vmatprep.subr.bf16.mxu0 %v4943_v54  ;;  %v4946_v37 = vld [vmem:[%s6356_s2 + $0x8] sm:$0xff]  }
 0x599   : > { %v1817_v61 = vmul.f32 %v5068_v32, %v5807_v55  ;;  %v4947_v55 = vld [vmem:[%s6356_s2 + $0x50] sm:$0xff]  }
 0x59a   : > { %v1826_v62 = vpack.c.bf16 %v1818_v9, %v1818_v9 }
 0x59b   : > { %v1825_v59 = vpack.c.bf16 %v1817_v61, %v1817_v61 }
 0x59c   : > { %4707 = vmatmul.mubr.msk.bf16.vlgmr.msra.gmra.mrb[84].mxu0 %vm922_vm4, %v1826_v62 }
 0x59d   : > { %4701 = vmatmul.mubr.msk.bf16.vlgmr.msra.gmra.mrb[80].mxu1 %vm922_vm4, %v1825_v59  ;;  %4423 = vmatpush3.bf16.msra.mxu0 %v4944_v14 }
 0x59e   : > { %4711 = vmatpush3.bf16.msra.mxu1 %v2154_v26  ;;  %4712 = vmatprep.mubr.msk.bf16.mxu1 %vm5274_vm2, %v5273_v30 }
 0x59f   : > { %4424 = vmatprep.subr.bf16.mxu0 %v4945_v5 }
 0x5a0   : > { %v5070_v10 = vpop.eup %5069 }
 0x5a1   : > { %v1819_v47 = vmul.f32 %v5070_v10, %v5813_v0  ;;  %4425 = vmatpush3.bf16.msra.mxu0 %v4946_v37  ;;  %v4951_v0 = vld [vmem:[%s6356_s2 + $0x60] sm:$0xff]  }
 0x5a2   : > { %4426 = vmatprep.subr.bf16.mxu0 %v4947_v55 }
 0x5a3   : > { %v1827_v23 = vpack.c.bf16 %v1819_v47, %v1819_v47 }
 0x5a5   : > { %4713 = vmatmul.mubr.msk.bf16.vlgmr.msra.gmra.mrb[84].mxu1 %vm922_vm4, %v1827_v23  ;;  %4427 = vmatpush3.bf16.msra.mxu0 %v4948_v6 }
 0x5a6   : > { %4428 = vmatprep.subr.bf16.mxu0 %v4949_v56  ;;  %2767 = vmatprep.mubr.bf16.mxu1 %v5272_v3 }
 0x5a9   : > { %4429 = vmatpush3.bf16.msra.mxu0 %v4950_v1 }
 0x5aa   : > { %4430 = vmatprep.subr.bf16.mxu0 %v4951_v0 }
 0x5ad   : > { %4431 = vmatpush3.bf16.msra.mxu0 %v4952_v34 }
 0x5ae   : > { %4432 = vmatprep.subr.bf16.mxu0 %v4953_v19 }
 0x5b1   : > { %4433 = vmatpush3.bf16.msra.mxu0 %v4954_v25 }
 0x5b2   : > { %4434 = vmatprep.subr.bf16.mxu0 %v4955_v39 }
 0x5b5   : > { %4435 = vmatpush3.bf16.msra.mxu0 %v4956_v8 }
 0x5b6   : > { %4436 = vmatprep.subr.bf16.mxu0 %v4957_v20 }
 0x5b9   : > { %4437 = vmatpush3.bf16.msra.mxu0 %v4958_v60 }
 0x657   : > { %v1868_v43 = vpop.f32.mrb[72].mxu0 }
 0x658   : > { %v4672_v24 = vpop.f32.mrb[73].mxu0 }
 0x659   : > { %v1871_v38 = vpop.f32.mrb[74].mxu0 }
 0x65a   : > { %v4673_v36 = vpop.f32.mrb[75].mxu0 }
 0x65f   : > { %v1960_v45 = vpop.f32.mrb[76].mxu0 }
 0x660   : > { %v1914_v22 = vpop.f32.mrb[72].mxu1  ;;  %v4684_v41 = vpop.f32.mrb[77].mxu0 }
 0x661   : > { %v2197_v40 = vpack.c.bf16 %v1914_v22, %v1868_v43  ;;  %v4678_v13 = vpop.f32.mrb[73].mxu1  ;;  %v1963_v52 = vpop.f32.mrb[78].mxu0  ;;  %v4961_v41 = vld [vmem:[#allocation5 + $0x4] ss:$20 sps:$4 sm:$0xff]  }
 0x662   : > { %v1917_v11 = vpop.f32.mrb[74].mxu1  ;;  %v4685_v50 = vpop.f32.mrb[79].mxu0  ;;  %2735 = vmatprep.subr.bf16.mxu1 %v4961_v41 }
 0x663   : > { %v4679_v51 = vpop.f32.mrb[75].mxu1  ;;  %2371 = vmatprep.mubr.bf16.mxu0 %v2197_v40  ;;  %v4959_v40 = vld [vmem:[#allocation5] ss:$20 sps:$4 sm:$0xff]  }
 0x664   : > { %2372 = vmatmul.mubr.bf16.vlgmr.msra.gmra.mrb[88].mxu0 %v2196_v15  ;;  %2736 = vmatpush1.bf16.msra.mxu1 %v4959_v40  ;;  %v4964_v50 = vld [vmem:[#allocation5 + $0x2c] ss:$20 sps:$4 sm:$0xff]  }
 0x665   : > { %2737 = vmatprep.subr.bf16.mxu1 %v4964_v50 }
 0x667   : > { %v2052_v46 = vpop.f32.mrb[80].mxu0 }
 0x668   : > { %v2006_v42 = vpop.f32.mrb[76].mxu1  ;;  %v4696_v7 = vpop.f32.mrb[81].mxu0 }
 0x669   : > { %v2199_v54 = vpack.c.bf16 %v2006_v42, %v1960_v45  ;;  %v4690_v21 = vpop.f32.mrb[77].mxu1  ;;  %v2055_v63 = vpop.f32.mrb[82].mxu0 }
 0x66a   : > { %v2009_v2 = vpop.f32.mrb[78].mxu1  ;;  %v4697_v49 = vpop.f32.mrb[83].mxu0 }
 0x66b   : > { %v4691_v32 = vpop.f32.mrb[79].mxu1  ;;  %2379 = vmatprep.mubr.bf16.mxu0 %v2199_v54  ;;  %v4967_v49 = vld [vmem:[#allocation5 + $0x54] ss:$20 sps:$4 sm:$0xff]  }
 0x66c   : > { %2380 = vmatmul.mubr.bf16.gmra.mrb[92].mxu0 %v2198_v44  ;;  %v4283_v44 = vld [vmem:[%s6358_s4 + $0x6] ss:$0 sm:$0xff] }
 0x66d   : > { %v4968_v32 = vld [vmem:[#allocation5 + $0x8] ss:$20 sps:$4 sm:$0xff]  }
 0x66e   : > { %4716 = vmatprep.subr.bf16.mxu0 %v4968_v32 }
 0x66f   : > { %v2144_v9 = vpop.f32.mrb[84].mxu0  ;;  %4717 = vmatpush3.bf16.msra.mxu0 %v4968_v32 }
 0x670   : > { %v2098_v16 = vpop.f32.mrb[80].mxu1  ;;  %v4708_v61 = vpop.f32.mrb[85].mxu0 }
 0x671   : > { %v2201_v14 = vpack.c.bf16 %v2098_v16, %v2052_v46  ;;  %v4702_v58 = vpop.f32.mrb[81].mxu1  ;;  %v2147_v27 = vpop.f32.mrb[86].mxu0  ;;  %v4962_v46 = vld [vmem:[#allocation5 + $0x28] ss:$20 sps:$4 sm:$0xff]  }
 0x672   : > { %v2101_v15 = vpop.f32.mrb[82].mxu1  ;;  %v4709_v62 = vpop.f32.mrb[87].mxu0  ;;  %2738 = vmatpush1.bf16.msra.mxu1 %v4962_v46  ;;  %v4972_v58 = vld [vmem:[#allocation5 + $0x30] ss:$20 sps:$4 sm:$0xff]   ;;  %v4969_v27 = vld [vmem:[#allocation5 + $0x78] ss:$20 sps:$4 sm:$0xff]  }
 0x673   : > { %v4703_v59 = vpop.f32.mrb[83].mxu1  ;;  %2387 = vmatprep.mubr.bf16.mxu0 %v2201_v14  ;;  %2739 = vmatprep.subr.bf16.mxu1 %v4967_v49  ;;  %v4971_v14 = vld [vmem:[#allocation5 + $0x7c] ss:$20 sps:$4 sm:$0xff]   ;;  %v4975_v62 = vld [vmem:[#allocation5 + $0xa4] ss:$20 sps:$4 sm:$0xff]  }
 0x674   : > { %2388 = vmatmul.mubr.bf16.gmra.mrb[96].mxu0 %v2200_v48  ;;  %4718 = vmatprep.subr.bf16.mxu0 %v4972_v58  ;;  %v4976_v59 = vld [vmem:[#allocation5 + $0x58] ss:$20 sps:$4 sm:$0xff]  }
 0x675   : > { %4719 = vmatpush3.bf16.msra.mxu0 %v4972_v58  ;;  %v5980_v58 = vld [vmem:[%s6358_s4 + $0x7] ss:$0 sm:$0xff] }
 0x676   : > { %4720 = vmatprep.subr.bf16.mxu0 %v4976_v59 }
 0x678   : > { %v2190_v5 = vpop.f32.mrb[84].mxu1 }
 0x679   : > { %v2203_v26 = vpack.c.bf16 %v2190_v5, %v2144_v9  ;;  %v4714_v37 = vpop.f32.mrb[85].mxu1  ;;  %v4965_v9 = vld [vmem:[#allocation5 + $0x50] ss:$20 sps:$4 sm:$0xff]   ;;  %v4973_v5 = vld [vmem:[#allocation5 + $0xa0] ss:$20 sps:$4 sm:$0xff]   ;;  %4721 = vmatpush3.bf16.msra.mxu0 %v4976_v59 }
 0x67a   : > { %v2193_v55 = vpop.f32.mrb[86].mxu1  ;;  %2740 = vmatpush1.bf16.msra.mxu1 %v4965_v9  ;;  %v4980_v37 = vld [vmem:[#allocation5 + $0x80] ss:$20 sps:$4 sm:$0xff]  }
 0x67b   : > { %v4715_v35 = vpop.f32.mrb[87].mxu1  ;;  %2395 = vmatprep.mubr.bf16.mxu0 %v2203_v26  ;;  %2741 = vmatprep.subr.bf16.mxu1 %v4971_v14  ;;  %v4979_v26 = vld [vmem:[#allocation5 + $0xcc] ss:$20 sps:$4 sm:$0xff]   ;;  %v4977_v55 = vld [vmem:[#allocation5 + $0xc8] ss:$20 sps:$4 sm:$0xff]  }
 0x67c   : > { %2396 = vmatmul.mubr.bf16.gmra.mrb[100].mxu0 %v2202_v12  ;;  %4722 = vmatprep.subr.bf16.mxu0 %v4980_v37  ;;  %v4983_v35 = vld [vmem:[#allocation5 + $0xf4] ss:$20 sps:$4 sm:$0xff]  }
 0x67d   : > { %4723 = vmatpush3.bf16.msra.mxu0 %v4980_v37 }
 0x67e   : > { %2742 = vmatpush1.bf16.msra.mxu1 %v4969_v27 }
 0x67f   : > { %2743 = vmatprep.subr.bf16.mxu1 %v4975_v62 }
 0x682   : > { %2744 = vmatpush1.bf16.msra.mxu1 %v4973_v5 }
 0x683   : > { %2745 = vmatprep.subr.bf16.mxu1 %v4979_v26 }
 0x686   : > { %2746 = vmatpush1.bf16.msra.mxu1 %v4977_v55 }
 0x687   : > { %2747 = vmatprep.subr.bf16.mxu1 %v4983_v35 }
 0x737   : > { %v4438_v17 = vpop.f32.mrb[88].mxu0 }
 0x738   : > { %v4439_v10 = vpop.f32.mrb[89].mxu0 }
 0x739   : > { %v4440_v47 = vadd.f32 %v4439_v10, %v4438_v17  ;;  %v4441_v6 = vpop.f32.mrb[90].mxu0  ;;  %v4984_v17 = vld [vmem:[#allocation5 + $0xa8] ss:$20 sps:$4 sm:$0xff]  }
 0x73a   : > { %v4442_v28 = vpop.f32.mrb[91].mxu0  ;;  %4724 = vmatprep.subr.bf16.mxu0 %v4984_v17  ;;  %v4987_v10 = vld [vmem:[#allocation5 + $0x11c] ss:$20 sps:$4 sm:$0xff]  }
 0x73b   : > { %v5928_v29 = vadd.f32 %v4440_v47, %v4283_v44  ;;  %v4443_v48 = vadd.f32 %v4442_v28, %v4441_v6  ;;  %4725 = vmatpush3.bf16.msra.mxu0 %v4984_v17  ;;  %v4988_v47 = vld [vmem:[#allocation5 + $0xd0] ss:$20 sps:$4 sm:$0xff]   ;;  %v4985_v6 = vld [vmem:[#allocation5 + $0x118] ss:$20 sps:$4 sm:$0xff]  }
 0x73c   : > { %4726 = vmatprep.subr.bf16.mxu0 %v4988_v47  ;;  %v4989_v28 = vld [vmem:[#allocation5 + $0xf8] ss:$20 sps:$4 sm:$0xff]  }
 0x73d   : > { %v5930_v56 = vadd.f32 %v4443_v48, %v4283_v44  ;;  %2406 = vadd.xlane.f32.xlu0 %v5928_v29  ;;  %v2430_v57 = vmul.f32 %v5928_v29, %v5928_v29  ;;  %v4990_v48 = vld [vmem:[#allocation5 + $0x120] ss:$20 sps:$4 sm:$0xff]  }
 0x73f   : > { %2408 = vadd.xlane.f32.xlu1 %v5930_v56  ;;  %v4444_v53 = vpop.f32.mrb[92].mxu0  ;;  %v2431_v0 = vmul.f32 %v5930_v56, %v5930_v56  ;;  %4727 = vmatpush3.bf16.msra.mxu0 %v4988_v47 }
 0x740   : > { %v4445_v12 = vpop.f32.mrb[93].mxu0  ;;  %4728 = vmatprep.subr.bf16.mxu0 %v4989_v28 }
 0x741   : > { %v4446_v23 = vadd.f32 %v4445_v12, %v4444_v53  ;;  %2438 = vadd.xlane.f32.xlu0 %v2430_v57  ;;  %v4447_v1 = vpop.f32.mrb[94].mxu0 }
 0x742   : > { %v4448_v34 = vpop.f32.mrb[95].mxu0 }
 0x743   : > { %v5938_v19 = vadd.f32 %v4446_v23, %v4283_v44  ;;  %v4449_v25 = vadd.f32 %v4448_v34, %v4447_v1  ;;  %2440 = vadd.xlane.f32.xlu1 %v2431_v0  ;;  %4729 = vmatpush3.bf16.msra.mxu0 %v4989_v28 }
 0x744   : > { %4730 = vmatprep.subr.bf16.mxu0 %v4990_v48 }
 0x745   : > { %v5940_v39 = vadd.f32 %v4449_v25, %v4283_v44  ;;  %2410 = vadd.xlane.f32.xlu0 %v5938_v19  ;;  %v2432_v20 = vmul.f32 %v5938_v19, %v5938_v19 }
 0x747   : > { %2412 = vadd.xlane.f32.xlu1 %v5940_v39  ;;  %v4450_v8 = vpop.f32.mrb[96].mxu0  ;;  %v2433_v38 = vmul.f32 %v5940_v39, %v5940_v39  ;;  %4731 = vmatpush3.bf16.msra.mxu0 %v4990_v48 }
 0x748   : > { %v4451_v60 = vpop.f32.mrb[97].mxu0  ;;  %4752 = vmatprep.subr.bf16.mxu0 %v5273_v30 }
 0x749   : > { %v4452_v43 = vadd.f32 %v4451_v60, %v4450_v8  ;;  %2442 = vadd.xlane.f32.xlu0 %v2432_v20  ;;  %v4453_v24 = vpop.f32.mrb[98].mxu0 }
 0x74a   : > { %v4454_v36 = vpop.f32.mrb[99].mxu0 }
 0x74b   : > { %v5948_v45 = vadd.f32 %v4452_v43, %v4283_v44  ;;  %v4455_v22 = vadd.f32 %v4454_v36, %v4453_v24  ;;  %2444 = vadd.xlane.f32.xlu1 %v2433_v38 }
 0x74d   : > { %v5950_v13 = vadd.f32 %v4455_v22, %v4283_v44  ;;  %2414 = vadd.xlane.f32.xlu0 %v5948_v45  ;;  %v2434_v11 = vmul.f32 %v5948_v45, %v5948_v45 }
 0x74f   : > { %2416 = vadd.xlane.f32.xlu1 %v5950_v13  ;;  %v4456_v52 = vpop.f32.mrb[100].mxu0  ;;  %v2435_v54 = vmul.f32 %v5950_v13, %v5950_v13 }
 0x750   : > { %v4457_v51 = vpop.f32.mrb[101].mxu0 }
 0x751   : > { %v4458_v42 = vadd.f32 %v4457_v51, %v4456_v52  ;;  %2446 = vadd.xlane.f32.xlu0 %v2434_v11  ;;  %v4459_v7 = vpop.f32.mrb[102].mxu0 }
 0x752   : > { %v4460_v21 = vpop.f32.mrb[103].mxu0 }
 0x753   : > { %v5958_v63 = vadd.f32 %v4458_v42, %v4283_v44  ;;  %v4461_v2 = vadd.f32 %v4460_v21, %v4459_v7  ;;  %2448 = vadd.xlane.f32.xlu1 %v2435_v54 }
 0x755   : > { %v5960_v16 = vadd.f32 %v4461_v2, %v4283_v44  ;;  %2418 = vadd.xlane.f32.xlu0 %v5958_v63  ;;  %v2436_v61 = vmul.f32 %v5958_v63, %v5958_v63  ;;  %v4981_v44 = vld [vmem:[#allocation5 + $0xf0] ss:$20 sps:$4 sm:$0xff]  }
 0x756   : > { %2748 = vmatpush1.bf16.msra.mxu1 %v4981_v44 }
 0x757   : > { %2420 = vadd.xlane.f32.xlu1 %v5960_v16  ;;  %v2437_v15 = vmul.f32 %v5960_v16, %v5960_v16  ;;  %2749 = vmatprep.subr.bf16.mxu1 %v4987_v10 }
 0x759   : > { %2450 = vadd.xlane.f32.xlu0 %v2436_v61 }
 0x75a   : > { %2750 = vmatpush1.bf16.msra.mxu1 %v4985_v6 }
 0x75b   : > { %2452 = vadd.xlane.f32.xlu1 %v2437_v15  ;;  %4740 = vmatprep.subr.bf16.mxu1 %v5273_v30 }
 0x7ca   : > { %v2407_v53 = vpop.xlane.xlu0 %2406 }
 0x7cb   : > { %v2422_v57 = vmul.f32 0.03125, %v2407_v53 }
 0x7cc   : > { %v2409_v12 = vpop.xlane.xlu1 %2408 }
 0x7cd   : > { %v2423_v23 = vmul.f32 0.03125, %v2409_v12  ;;  %v2462_v0 = vmul.f32 %v2422_v57, %v2422_v57  ;;  %v2486_v61 = vsub.f32 %v5928_v29, %v2422_v57 }
 0x7ce   : > { %v2439_v1 = vpop.xlane.xlu0 %2438 }
 0x7cf   : > { %v2454_v34 = vmul.f32 0.03125, %v2439_v1  ;;  %v2463_v8 = vmul.f32 %v2423_v23, %v2423_v23  ;;  %v2487_v62 = vsub.f32 %v5930_v56, %v2423_v23  ;;  %v2500_v29 = vmul.f32 %v5980_v58, %v2486_v61  ;;  %v5993_v56 = vld [vmem:[%s6358_s4 + $0x8] ss:$0 sm:$0xff] }
 0x7d0   : > { %v2441_v25 = vpop.xlane.xlu1 %2440 }
 0x7d1   : > { %v2470_v20 = vsub.f32 %v2454_v34, %v2462_v0  ;;  %v2455_v60 = vmul.f32 0.03125, %v2441_v25  ;;  %v2501_v6 = vmul.f32 %v5980_v58, %v2487_v62 }
 0x7d2   : > { %v2411_v43 = vpop.xlane.xlu0 %2410 }
 0x7d3   : > { %v2478_v24 = vmax.f32 %v2470_v20, 0.0  ;;  %v2471_v38 = vsub.f32 %v2455_v60, %v2463_v8  ;;  %v2424_v36 = vmul.f32 0.03125, %v2411_v43 }
 0x7d4   : > { %v2413_v22 = vpop.xlane.xlu1 %2412 }
 0x7d5   : > { %v2508_v41 = vadd.f32 1e-05, %v2478_v24  ;;  %v2479_v40 = vmax.f32 %v2471_v38, 0.0  ;;  %v5970_v52 = vmul.f32 0.03125, %v2413_v22  ;;  %v2464_v51 = vmul.f32 %v2424_v36, %v2424_v36 }
 0x7d6   : > { %v2443_v11 = vpop.xlane.xlu0 %2442  ;;  %v2488_v1 = vsub.f32 %v5938_v19, %v2424_v36 }
 0x7d7   : > { %5071 = vrsqrt.f32 %v2508_v41  ;;  %v2509_v50 = vadd.f32 1e-05, %v2479_v40  ;;  %v2456_v46 = vmul.f32 0.03125, %v2443_v11  ;;  %v2465_v7 = vmul.f32 %v5970_v52, %v5970_v52 }
 0x7d8   : > { %v2445_v42 = vpop.xlane.xlu1 %2444  ;;  %v2489_v60 = vsub.f32 %v5940_v39, %v5970_v52  ;;  %v2502_v11 = vmul.f32 %v5980_v58, %v2488_v1 }
 0x7d9   : > { %5073 = vrsqrt.f32 %v2509_v50  ;;  %v2472_v54 = vsub.f32 %v2456_v46, %v2464_v51  ;;  %v2457_v21 = vmul.f32 0.03125, %v2445_v42 }
 0x7da   : > { %v2415_v2 = vpop.xlane.xlu0 %2414  ;;  %v2503_v39 = vmul.f32 %v5980_v58, %v2489_v60 }
 0x7db   : > { %v2480_v49 = vmax.f32 %v2472_v54, 0.0  ;;  %v2473_v32 = vsub.f32 %v2457_v21, %v2465_v7  ;;  %v5974_v9 = vmul.f32 0.03125, %v2415_v2 }
 0x7dc   : > { %v2417_v14 = vpop.xlane.xlu1 %2416 }
 0x7dd   : > { %v2510_v27 = vadd.f32 1e-05, %v2480_v49  ;;  %v2481_v15 = vmax.f32 %v2473_v32, 0.0  ;;  %v5983_v59 = vmul.f32 0.03125, %v2417_v14  ;;  %v2466_v37 = vmul.f32 %v5974_v9, %v5974_v9 }
 0x7de   : > { %v2447_v5 = vpop.xlane.xlu0 %2446  ;;  %v2490_v32 = vsub.f32 %v5948_v45, %v5974_v9 }
 0x7df   : > { %5075 = vrsqrt.f32 %v2510_v27  ;;  %v2511_v26 = vadd.f32 1e-05, %v2481_v15  ;;  %v2458_v55 = vmul.f32 0.03125, %v2447_v5  ;;  %v2467_v44 = vmul.f32 %v5983_v59, %v5983_v59 }
 0x7e0   : > { %v2449_v35 = vpop.xlane.xlu1 %2448  ;;  %v2491_v62 = vsub.f32 %v5950_v13, %v5983_v59 }
 0x7e1   : > { %v5072_v17 = vpop.eup %5071  ;;  %5077 = vrsqrt.f32 %v2511_v26  ;;  %v2474_v10 = vsub.f32 %v2458_v55, %v2466_v37  ;;  %v2459_v47 = vmul.f32 0.03125, %v2449_v35  ;;  %v2504_v37 = vmul.f32 %v5980_v58, %v2490_v32 }
 0x7e2   : > { %v2419_v28 = vpop.xlane.xlu0 %2418  ;;  %v2524_v48 = vmul.f32 %v5072_v17, %v2500_v29  ;;  %v2505_v29 = vmul.f32 %v5980_v58, %v2491_v62 }
 0x7e3   : > { %v5074_v53 = vpop.eup %5073  ;;  %v2482_v57 = vmax.f32 %v2474_v10, 0.0  ;;  %v2475_v12 = vsub.f32 %v2459_v47, %v2467_v44  ;;  %v2428_v23 = vmul.f32 0.03125, %v2419_v28 }
 0x7e4   : > { %v2421_v0 = vpop.xlane.xlu1 %2420  ;;  %v2525_v34 = vmul.f32 %v5074_v53, %v2501_v6  ;;  %v2538_v25 = vadd.f32 %v5993_v56, %v2524_v48 }
 0x7e5   : > { %v2512_v8 = vadd.f32 1e-05, %v2482_v57  ;;  %v2483_v20 = vmax.f32 %v2475_v12, 0.0  ;;  %v2429_v43 = vmul.f32 0.03125, %v2421_v0  ;;  %v2468_v41 = vmul.f32 %v2428_v23, %v2428_v23 }
 0x7e6   : > { %v2451_v24 = vpop.xlane.xlu0 %2450  ;;  %v2539_v38 = vadd.f32 %v5993_v56, %v2525_v34  ;;  %v2546_v36 = vmax.f32 %v2538_v25, 0.0  ;;  %v2492_v10 = vsub.f32 %v5958_v63, %v2428_v23 }
 0x7e7   : > { %5079 = vrsqrt.f32 %v2512_v8  ;;  %v2513_v22 = vadd.f32 1e-05, %v2483_v20  ;;  %v2460_v40 = vmul.f32 0.03125, %v2451_v24  ;;  %v2469_v46 = vmul.f32 %v2429_v43, %v2429_v43 }
 0x7e8   : > { %v2453_v19 = vpop.xlane.xlu1 %2452  ;;  %v2547_v50 = vmax.f32 %v2539_v38, 0.0  ;;  %v2493_v47 = vsub.f32 %v5960_v16, %v2429_v43  ;;  %v2506_v28 = vmul.f32 %v5980_v58, %v2492_v10 }
 0x7e9   : > { %v5076_v51 = vpop.eup %5075  ;;  %5081 = vrsqrt.f32 %v2513_v22  ;;  %v2476_v42 = vsub.f32 %v2460_v40, %v2468_v41  ;;  %v2461_v7 = vmul.f32 0.03125, %v2453_v19 }
 0x7ea   : > { %v2554_v52 = vpack.c.bf16 %v2547_v50, %v2546_v36  ;;  %v2526_v54 = vmul.f32 %v5076_v51, %v2502_v11  ;;  %v2507_v12 = vmul.f32 %v5980_v58, %v2493_v47  ;;  %v2590_v58 = vld [vmem:[%s6358_s4 + $0x9] sm:$0x7] }
 0x7eb   : > { %v5078_v21 = vpop.eup %5077  ;;  %v2484_v2 = vmax.f32 %v2476_v42, 0.0  ;;  %v2477_v49 = vsub.f32 %v2461_v7, %v2469_v46  ;;  %v6036_v38 = vrot.slane %v2590_v58, %v272_v33  ;;  %v6040_v40 = vrot.slane %v2590_v58, %v280_v31 }
 0x7ec   : > { %2768 = vmatmul.mubr.bf16.vlgmr.msra.gmra.mrb[88].mxu1 %v2554_v52  ;;  %4732 = vmatprep.mubr.bf16.mxu0 %v2554_v52  ;;  %v2527_v61 = vmul.f32 %v5078_v21, %v2503_v39  ;;  %v2540_v14 = vadd.f32 %v5993_v56, %v2526_v54 }
 0x7ed   : > { %v2514_v27 = vadd.f32 1e-05, %v2484_v2  ;;  %v2485_v15 = vmax.f32 %v2477_v49, 0.0  ;;  %2777 = vmatprep.mubr.bf16.mxu1 %v5272_v3 }
 0x7ee   : > { %v2541_v5 = vadd.f32 %v5993_v56, %v2527_v61  ;;  %v2548_v55 = vmax.f32 %v2540_v14, 0.0 }
 0x7ef   : > { %5083 = vrsqrt.f32 %v2514_v27  ;;  %v2515_v26 = vadd.f32 1e-05, %v2485_v15 }
 0x7f0   : > { %v2549_v45 = vmax.f32 %v2541_v5, 0.0 }
 0x7f1   : > { %v5080_v9 = vpop.eup %5079  ;;  %5085 = vrsqrt.f32 %v2515_v26 }
 0x7f2   : > { %v2555_v35 = vpack.c.bf16 %v2549_v45, %v2548_v55  ;;  %v2528_v17 = vmul.f32 %v5080_v9, %v2504_v37 }
 0x7f3   : > { %v5082_v44 = vpop.eup %5081 }
 0x7f4   : > { %2778 = vmatmul.mubr.bf16.gmra.mrb[92].mxu1 %v2555_v35  ;;  %4733 = vmatmul.mubr.bf16.vlgmr.msra.gmra.mrb[104].mxu0 %v2555_v35  ;;  %v2529_v13 = vmul.f32 %v5082_v44, %v2505_v29  ;;  %v2542_v59 = vadd.f32 %v5993_v56, %v2528_v17 }
 0x7f5   : > { %2787 = vmatprep.mubr.bf16.mxu1 %v5272_v3 }
 0x7f6   : > { %v2543_v6 = vadd.f32 %v5993_v56, %v2529_v13  ;;  %v2550_v48 = vmax.f32 %v2542_v59, 0.0 }
 0x7f8   : > { %v2551_v53 = vmax.f32 %v2543_v6, 0.0 }
 0x7f9   : > { %v5084_v57 = vpop.eup %5083 }
 0x7fa   : > { %v2556_v1 = vpack.c.bf16 %v2551_v53, %v2550_v48  ;;  %v2530_v63 = vmul.f32 %v5084_v57, %v2506_v28 }
 0x7fb   : > { %v5086_v23 = vpop.eup %5085 }
 0x7fc   : > { %2788 = vmatmul.mubr.bf16.gmra.mrb[96].mxu1 %v2556_v1  ;;  %4736 = vmatprep.mubr.bf16.mxu0 %v2556_v1  ;;  %v2531_v0 = vmul.f32 %v5086_v23, %v2507_v12  ;;  %v2544_v34 = vadd.f32 %v5993_v56, %v2530_v63 }
 0x7fd   : > { %2797 = vmatprep.mubr.bf16.mxu1 %v5272_v3  ;;  %v6031_v3 = vrot.slane %v2590_v58, %v276_v18 }
 0x7fe   : > { %v2545_v16 = vadd.f32 %v5993_v56, %v2531_v0  ;;  %v2552_v25 = vmax.f32 %v2544_v34, 0.0 }
 0x800   : > { %v2553_v8 = vmax.f32 %v2545_v16, 0.0 }
 0x802   : > { %v2557_v20 = vpack.c.bf16 %v2553_v8, %v2552_v25 }
 0x804   : > { %2798 = vmatmul.mubr.bf16.gmra.mrb[100].mxu1 %v2557_v20  ;;  %4737 = vmatmul.mubr.bf16.gmra.mrb[108].mxu0 %v2557_v20 }
 0x805   : > { %4742 = vmatprep.mubr.msk.bf16.mxu1 %vm5274_vm2, %v5273_v30  ;;  %4754 = vmatprep.mubr.msk.bf16.mxu0 %vm5274_vm2, %v5273_v30 }
 0x8bf   : > { %v2769_v56 = vpop.f32.mrb[88].mxu1 }
 0x8c0   : > { %v2771_v60 = vpop.f32.mrb[89].mxu1  ;;  %v2770_v11 = vadd.f32 %v2769_v56, %v6036_v38 }
 0x8c1   : > { %v2772_v43 = vadd.f32 %v2771_v60, %v6031_v3  ;;  %v2773_v24 = vpop.f32.mrb[90].mxu1 }
 0x8c2   : > { %v2775_v22 = vpop.f32.mrb[91].mxu1  ;;  %v2873_v31 = vpack.c.bf16 %v2770_v11, %v2770_v11  ;;  %v2774_v2 = vadd.f32 %v2773_v24, %v6036_v38 }
 0x8c3   : > { %v2881_v41 = vpack.c.bf16 %v2772_v43, %v2772_v43  ;;  %v2776_v18 = vadd.f32 %v2775_v22, %v6031_v3 }
 0x8c4   : > { %v2874_v62 = vpack.c.bf16 %v2774_v2, %v2774_v2 }
 0x8c5   : > { %4741 = vmatpush3.bf16.xpose.msra.mxu1 %v2881_v41  ;;  %v2882_v54 = vpack.c.bf16 %v2776_v18, %v2776_v18 }
 0x8c6   : > { %4746 = vmatprep.subr.bf16.mxu1 %v5273_v30 }
 0x8c7   : > { %v2779_v19 = vpop.f32.mrb[92].mxu1  ;;  %v4734_v36 = vpop.f32.mrb[104].mxu0 }
 0x8c8   : > { %v6046_v50 = vadd.f32 %v4734_v36, %v6040_v40  ;;  %v2781_v33 = vpop.f32.mrb[93].mxu1  ;;  %v2842_v51 = vpop.f32.mrb[105].mxu0  ;;  %v2780_v49 = vadd.f32 %v2779_v19, %v6036_v38 }
 0x8c9   : > { %v2782_v46 = vadd.f32 %v2781_v33, %v6031_v3  ;;  %v2783_v42 = vpop.f32.mrb[94].mxu1  ;;  %v4735_v4 = vpop.f32.mrb[106].mxu0  ;;  %v2843_v34 = vadd.f32 %v2842_v51, %v6040_v40 }
 0x8ca   : > { %v6050_v7 = vadd.f32 %v4735_v4, %v6040_v40  ;;  %v2785_v39 = vpop.f32.mrb[95].mxu1  ;;  %v6052_v52 = vpop.f32.mrb[107].mxu0  ;;  %v2875_v5 = vpack.c.bf16 %v2780_v49, %v2780_v49  ;;  %v2784_v45 = vadd.f32 %v2783_v42, %v6036_v38 }
 0x8cb   : > { %v2883_v21 = vpack.c.bf16 %v2782_v46, %v2782_v46  ;;  %v2786_v32 = vadd.f32 %v2785_v39, %v6031_v3  ;;  %v2889_v20 = vpack.c.bf16 %v2843_v34, %v2843_v34  ;;  %v2846_v24 = vadd.f32 %v6052_v52, %v6040_v40 }
 0x8cc   : > { %4743 = vmatmul.mubr.bf16.vlgmr.msra.gmra.mrb[104].mxu1 %v2873_v31  ;;  %v2876_v48 = vpack.c.bf16 %v2784_v45, %v2784_v45 }
 0x8cd   : > { %4747 = vmatpush3.bf16.xpose.msra.mxu1 %v2882_v54  ;;  %4753 = vmatpush3.bf16.xpose.msra.mxu0 %v2883_v21  ;;  %v2884_v37 = vpack.c.bf16 %v2786_v32, %v2786_v32  ;;  %v3317_v43 = vsel %vm1022_vm3, %v2889_v20, 0 }
 0x8ce   : > { %4748 = vmatprep.mubr.msk.bf16.mxu1 %vm5274_vm2, %v5273_v30  ;;  %4758 = vmatprep.subr.bf16.mxu1 %v5273_v30 }
 0x8cf   : > { %v2789_v61 = vpop.f32.mrb[96].mxu1  ;;  %4764 = vmatprep.subr.bf16.mxu0 %v5273_v30 }
 0x8d0   : > { %v2791_v14 = vpop.f32.mrb[97].mxu1  ;;  %v2790_v9 = vadd.f32 %v2789_v61, %v6036_v38 }
 0x8d1   : > { %v2792_v27 = vadd.f32 %v2791_v14, %v6031_v3  ;;  %v2793_v15 = vpop.f32.mrb[98].mxu1 }
 0x8d2   : > { %v2795_v26 = vpop.f32.mrb[99].mxu1  ;;  %v2877_v53 = vpack.c.bf16 %v2790_v9, %v2790_v9  ;;  %v2794_v16 = vadd.f32 %v2793_v15, %v6036_v38 }
 0x8d3   : > { %v2885_v55 = vpack.c.bf16 %v2792_v27, %v2792_v27  ;;  %v2796_v29 = vadd.f32 %v2795_v26, %v6031_v3 }
 0x8d4   : > { %4749 = vmatmul.mubr.bf16.vlgmr.msra.gmra.mrb[108].mxu1 %v2874_v62  ;;  %4755 = vmatmul.mubr.bf16.vlgmr.msra.gmra.mrb[112].mxu0 %v2875_v5  ;;  %v2878_v58 = vpack.c.bf16 %v2794_v16, %v2794_v16 }
 0x8d5   : > { %4759 = vmatpush3.bf16.xpose.msra.mxu1 %v2884_v37  ;;  %4765 = vmatpush3.bf16.xpose.msra.mxu0 %v2885_v55  ;;  %v2886_v63 = vpack.c.bf16 %v2796_v29, %v2796_v29 }
 0x8d6   : > { %4760 = vmatprep.mubr.msk.bf16.mxu1 %vm5274_vm2, %v5273_v30  ;;  %4766 = vmatprep.mubr.msk.bf16.mxu0 %vm5274_vm2, %v5273_v30 }
 0x8d7   : > { %v2799_v35 = vpop.f32.mrb[100].mxu1  ;;  %v4738_v17 = vpop.f32.mrb[108].mxu0  ;;  %4770 = vmatprep.subr.bf16.mxu1 %v5273_v30  ;;  %4776 = vmatprep.subr.bf16.mxu0 %v5273_v30 }
 0x8d8   : > { %v6072_v44 = vadd.f32 %v4738_v17, %v6040_v40  ;;  %v2801_v10 = vpop.f32.mrb[101].mxu1  ;;  %v2858_v13 = vpop.f32.mrb[109].mxu0  ;;  %v2800_v25 = vadd.f32 %v2799_v35, %v6036_v38 }
 0x8d9   : > { %v2802_v59 = vadd.f32 %v2801_v10, %v6031_v3  ;;  %v6076_v47 = vadd.f32 %v2858_v13, %v6040_v40  ;;  %v2803_v6 = vpop.f32.mrb[102].mxu1  ;;  %v4739_v28 = vpop.f32.mrb[110].mxu0 }
 0x8da   : > { %v6079_v57 = vadd.f32 %v4739_v28, %v6040_v40  ;;  %v2805_v12 = vpop.f32.mrb[103].mxu1  ;;  %v2861_v1 = vpop.f32.mrb[111].mxu0  ;;  %v2879_v56 = vpack.c.bf16 %v2800_v25, %v2800_v25  ;;  %v2804_v22 = vadd.f32 %v2803_v6, %v6036_v38 }
 0x8db   : > { %v2887_v23 = vpack.c.bf16 %v2802_v59, %v2802_v59  ;;  %v6082_v0 = vadd.f32 %v2861_v1, %v6040_v40  ;;  %v2806_v8 = vadd.f32 %v2805_v12, %v6031_v3  ;;  %v2890_v3 = vpack.c.bf16 %v2846_v24, %v2846_v24 }
 0x8dc   : > { %4761 = vmatmul.mubr.bf16.vlgmr.msra.gmra.mrb[112].mxu1 %v2876_v48  ;;  %4767 = vmatmul.mubr.bf16.vlgmr.msra.gmra.mrb[116].mxu0 %v2877_v53  ;;  %v2880_v41 = vpack.c.bf16 %v2804_v22, %v2804_v22 }
 0x8dd   : > { %4771 = vmatpush3.bf16.xpose.msra.mxu1 %v2886_v63  ;;  %4777 = vmatpush3.bf16.xpose.msra.mxu0 %v2887_v23  ;;  %v2888_v60 = vpack.c.bf16 %v2806_v8, %v2806_v8  ;;  %v3363_v40 = vsel %vm1022_vm3, %v2890_v3, 0 }
 0x8de   : > { %4772 = vmatprep.mubr.msk.bf16.mxu1 %vm5274_vm2, %v5273_v30  ;;  %4778 = vmatprep.mubr.msk.bf16.mxu0 %vm5274_vm2, %v5273_v30 }
 0x8df   : > { %4782 = vmatprep.subr.bf16.mxu1 %v5273_v30  ;;  %4788 = vmatprep.subr.bf16.mxu0 %v5273_v30 }
 0x8e4   : > { %4773 = vmatmul.mubr.bf16.vlgmr.msra.gmra.mrb[116].mxu1 %v2878_v58  ;;  %4779 = vmatmul.mubr.bf16.vlgmr.msra.gmra.mrb[120].mxu0 %v2879_v56 }
 0x8e5   : > { %4783 = vmatpush3.bf16.xpose.msra.mxu1 %v2888_v60  ;;  %4789 = vmatpush3.bf16.msra.mxu0 %v3317_v43 }
 0x8e6   : > { %4784 = vmatprep.mubr.msk.bf16.mxu1 %vm5274_vm2, %v5273_v30  ;;  %4794 = vmatprep.subr.bf16.mxu1 %v5273_v30 }
 0x8e7   : > { %4790 = vmatprep.mubr.msk.bf16.mxu0 %vm5274_vm2, %v5273_v30  ;;  %4800 = vmatprep.subr.bf16.mxu0 %v5273_v30 }
 0x8ec   : > { %4785 = vmatmul.mubr.bf16.vlgmr.msra.gmra.mrb[120].mxu1 %v2880_v41 }
 0x8ed   : > { %4795 = vmatpush3.bf16.msra.mxu1 %v3363_v40  ;;  %4796 = vmatprep.mubr.msk.bf16.mxu1 %vm5274_vm2, %v5273_v30 }
 0x8ee   : > { %4806 = vmatprep.subr.bf16.mxu1 %v5273_v30 }
 0x99f   : > { %v2931_v38 = vpop.f32.mrb[104].mxu1 }
 0x9a0   : > { %v4744_v11 = vpop.f32.mrb[105].mxu1  ;;  %v3217_v18 = vsel %vm922_vm4, %v2931_v38, -inf }
 0x9a1   : > { %3218 = vmax.xlane.f32.xlu0 %v3217_v18  ;;  %v2934_v19 = vpop.f32.mrb[106].mxu1 }
 0x9a2   : > { %v4745_v36 = vpop.f32.mrb[107].mxu1 }
 0x9a7   : > { %v2971_v33 = vpop.f32.mrb[108].mxu1  ;;  %v3011_v51 = vpop.f32.mrb[112].mxu0 }
 0x9a8   : > { %v4750_v46 = vpop.f32.mrb[109].mxu1  ;;  %v4756_v42 = vpop.f32.mrb[113].mxu0  ;;  %v3223_v4 = vsel %vm922_vm4, %v3011_v51, -inf  ;;  %v3220_v31 = vsel %vm922_vm4, %v2971_v33, -inf }
 0x9a9   : > { %v3014_v39 = vpop.f32.mrb[114].mxu0  ;;  %3224 = vmax.xlane.f32.xlu0 %v3223_v4  ;;  %3221 = vmax.xlane.f32.xlu1 %v3220_v31  ;;  %v2974_v52 = vpop.f32.mrb[110].mxu1 }
 0x9aa   : > { %v4751_v54 = vpop.f32.mrb[111].mxu1  ;;  %v4757_v21 = vpop.f32.mrb[115].mxu0 }
 0x9af   : > { %v3051_v2 = vpop.f32.mrb[112].mxu1  ;;  %v3091_v49 = vpop.f32.mrb[116].mxu0 }
 0x9b0   : > { %v4762_v32 = vpop.f32.mrb[113].mxu1  ;;  %v4768_v61 = vpop.f32.mrb[117].mxu0  ;;  %v3229_v14 = vsel %vm922_vm4, %v3091_v49, -inf  ;;  %v3226_v27 = vsel %vm922_vm4, %v3051_v2, -inf }
 0x9b1   : > { %v3094_v15 = vpop.f32.mrb[118].mxu0  ;;  %3230 = vmax.xlane.f32.xlu0 %v3229_v14  ;;  %3227 = vmax.xlane.f32.xlu1 %v3226_v27  ;;  %v3054_v62 = vpop.f32.mrb[114].mxu1 }
 0x9b2   : > { %v4763_v5 = vpop.f32.mrb[115].mxu1  ;;  %v4769_v26 = vpop.f32.mrb[119].mxu0 }
 0x9b7   : > { %v3131_v37 = vpop.f32.mrb[116].mxu1  ;;  %v3171_v55 = vpop.f32.mrb[120].mxu0 }
 0x9b8   : > { %v4774_v45 = vpop.f32.mrb[117].mxu1  ;;  %v4780_v9 = vpop.f32.mrb[121].mxu0  ;;  %v3235_v29 = vsel %vm922_vm4, %v3171_v55, -inf  ;;  %v3232_v35 = vsel %vm922_vm4, %v3131_v37, -inf }
 0x9b9   : > { %v3174_v17 = vpop.f32.mrb[122].mxu0  ;;  %3236 = vmax.xlane.f32.xlu0 %v3235_v29  ;;  %3233 = vmax.xlane.f32.xlu1 %v3232_v35  ;;  %v3134_v10 = vpop.f32.mrb[118].mxu1  ;;  %v2891_v45 = vpack.c.bf16 %v6046_v50, %v6046_v50  ;;  %v2893_v50 = vpack.c.bf16 %v6076_v47, %v6076_v47 }
 0x9ba   : > { %v4775_v13 = vpop.f32.mrb[119].mxu1  ;;  %v4781_v59 = vpop.f32.mrb[123].mxu0 }
 0x9bb   : > { %v3409_v35 = vsel %vm1022_vm3, %v2891_v45, 0 }
 0x9bf   : > { %v3211_v6 = vpop.f32.mrb[120].mxu1 }
 0x9c0   : > { %v4786_v28 = vpop.f32.mrb[121].mxu1  ;;  %v3238_v48 = vsel %vm922_vm4, %v3211_v6, -inf }
 0x9c1   : > { %3239 = vmax.xlane.f32.xlu1 %v3238_v48  ;;  %v3214_v53 = vpop.f32.mrb[122].mxu1  ;;  %v2892_v28 = vpack.c.bf16 %v6050_v7, %v6050_v7 }
 0x9c2   : > { %v4787_v12 = vpop.f32.mrb[123].mxu1 }
 0xa2e   : > { %v3219_v1 = vpop.xlane.xlu0 %3218 }
 0xa2f   : > { %v3241_v63 = vsub.f32 %v2931_v38, %v3219_v1  ;;  %v3501_v1 = vsel %vm1022_vm3, %v2893_v50, 0 }
 0xa31   : > { %v3249_v23 = vmul.f32 1.442695, %v3241_v63 }
 0xa33   : > { %5087 = vpow2.f32 %v3249_v23  ;;  %v3455_v23 = vsel %vm1022_vm3, %v2892_v28, 0 }
 0xa36   : > { %v3225_v34 = vpop.xlane.xlu0 %3224  ;;  %v3222_v16 = vpop.xlane.xlu1 %3221 }
 0xa37   : > { %v3243_v25 = vsub.f32 %v3011_v51, %v3225_v34  ;;  %v3242_v8 = vsub.f32 %v2971_v33, %v3222_v16  ;;  %v2895_v16 = vpack.c.bf16 %v6072_v44, %v6072_v44 }
 0xa39   : > { %v3253_v20 = vmul.f32 1.442695, %v3243_v25  ;;  %v3251_v58 = vmul.f32 1.442695, %v3242_v8  ;;  %v2894_v8 = vpack.c.bf16 %v6082_v0, %v6082_v0 }
 0xa3b   : > { %5089 = vpow2.f32 %v3253_v20 }
 0xa3c   : > { %5091 = vpow2.f32 %v3251_v58 }
 0xa3d   : > { %v5088_v56 = vpop.eup %5087 }
 0xa3e   : > { %v3231_v60 = vpop.xlane.xlu0 %3230  ;;  %v3228_v43 = vpop.xlane.xlu1 %3227  ;;  %v3265_v24 = vsel %vm922_vm4, %v5088_v56, 0.0 }
 0xa3f   : > { %v3245_v22 = vsub.f32 %v3091_v49, %v3231_v60  ;;  %v3244_v3 = vsub.f32 %v3051_v2, %v3228_v43  ;;  %3266 = vadd.xlane.f32.xlu0 %v3265_v24  ;;  %v3593_v60 = vsel %vm1022_vm3, %v2895_v16, 0  ;;  %v3547_v24 = vsel %vm1022_vm3, %v2894_v8, 0  ;;  %v4994_v16 = vld [vmem:[#allocation5 + $0x84] ss:$20 sps:$4 sm:$0xff]   ;;  %v4996_v8 = vld [vmem:[#allocation5 + $0xd4] ss:$20 sps:$4 sm:$0xff]  }
 0xa41   : > { %v3257_v41 = vmul.f32 1.442695, %v3245_v22  ;;  %v3255_v40 = vmul.f32 1.442695, %v3244_v3  ;;  %v2896_v3 = vpack.c.bf16 %v6079_v57, %v6079_v57 }
 0xa43   : > { %5093 = vpow2.f32 %v3257_v41 }
 0xa44   : > { %5095 = vpow2.f32 %v3255_v40 }
 0xa45   : > { %v5090_v38 = vpop.eup %5089 }
 0xa46   : > { %v5092_v11 = vpop.eup %5091  ;;  %v3237_v18 = vpop.xlane.xlu0 %3236  ;;  %v3271_v36 = vsel %vm922_vm4, %v5090_v38, 0.0 }
 0xa47   : > { %v3234_v19 = vpop.xlane.xlu1 %3233  ;;  %v3247_v33 = vsub.f32 %v3171_v55, %v3237_v18  ;;  %3272 = vadd.xlane.f32.xlu0 %v3271_v36  ;;  %v3268_v46 = vsel %vm922_vm4, %v5092_v11, 0.0 }
 0xa48   : > { %v3246_v51 = vsub.f32 %v3131_v37, %v3234_v19  ;;  %3269 = vadd.xlane.f32.xlu1 %v3268_v46 }
 0xa49   : > { %v3261_v42 = vmul.f32 1.442695, %v3247_v33 }
 0xa4a   : > { %v3259_v4 = vmul.f32 1.442695, %v3246_v51 }
 0xa4b   : > { %5097 = vpow2.f32 %v3261_v42 }
 0xa4c   : > { %5099 = vpow2.f32 %v3259_v4 }
 0xa4d   : > { %v5094_v31 = vpop.eup %5093 }
 0xa4e   : > { %v6119_v39 = vpop.eup %5095  ;;  %v3240_v52 = vpop.xlane.xlu1 %3239  ;;  %v3277_v54 = vsel %vm922_vm4, %v5094_v31, 0.0 }
 0xa4f   : > { %v3248_v21 = vsub.f32 %v3211_v6, %v3240_v52  ;;  %3278 = vadd.xlane.f32.xlu0 %v3277_v54  ;;  %v3274_v2 = vsel %vm922_vm4, %v6119_v39, 0.0 }
 0xa50   : > { %3275 = vadd.xlane.f32.xlu1 %v3274_v2 }
 0xa51   : > { %v3263_v49 = vmul.f32 1.442695, %v3248_v21 }
 0xa53   : > { %5101 = vpow2.f32 %v3263_v49 }
 0xa55   : > { %v6124_v32 = vpop.eup %5097 }
 0xa56   : > { %v6126_v61 = vpop.eup %5099  ;;  %v3283_v14 = vsel %vm922_vm4, %v6124_v32, 0.0 }
 0xa57   : > { %3284 = vadd.xlane.f32.xlu0 %v3283_v14  ;;  %v3280_v27 = vsel %vm922_vm4, %v6126_v61, 0.0 }
 0xa58   : > { %3281 = vadd.xlane.f32.xlu1 %v3280_v27 }
 0xa5d   : > { %v6132_v15 = vpop.eup %5101 }
 0xa5e   : > { %v3286_v62 = vsel %vm922_vm4, %v6132_v15, 0.0 }
 0xa5f   : > { %3287 = vadd.xlane.f32.xlu1 %v3286_v62 }
 0xacc   : > { %v3267_v5 = vpop.xlane.xlu0 %3266 }
 0xacd   : > { %5103 = vrcp.f32 %v3267_v5 }
 0xad4   : > { %v3273_v26 = vpop.xlane.xlu0 %3272 }
 0xad5   : > { %5105 = vrcp.f32 %v3273_v26  ;;  %v3270_v37 = vpop.xlane.xlu1 %3269 }
 0xad6   : > { %5107 = vrcp.f32 %v3270_v37 }
 0xad7   : > { %v5104_v55 = vpop.eup %5103 }
 0xad8   : > { %v3297_v9 = vmul.f32 %v5104_v55, %v5088_v56 }
 0xada   : > { %v3305_v29 = vpack.c.bf16 %v3297_v9, %v3297_v9 }
 0xadc   : > { %4791 = vmatmul.mubr.msk.bf16.vlgmr.msra.gmra.mrb[124].mxu0 %vm922_vm4, %v3305_v29  ;;  %v3279_v17 = vpop.xlane.xlu0 %3278 }
 0xadd   : > { %4801 = vmatpush3.bf16.msra.mxu0 %v3409_v35  ;;  %5109 = vrcp.f32 %v3279_v17  ;;  %v3276_v10 = vpop.xlane.xlu1 %3275  ;;  %4802 = vmatprep.mubr.msk.bf16.mxu0 %vm5274_vm2, %v5273_v30 }
 0xade   : > { %5111 = vrcp.f32 %v3276_v10  ;;  %4812 = vmatprep.subr.bf16.mxu0 %v5273_v30 }
 0xadf   : > { %v5106_v13 = vpop.eup %5105 }
 0xae0   : > { %v5108_v59 = vpop.eup %5107  ;;  %v3299_v6 = vmul.f32 %v5106_v13, %v5090_v38 }
 0xae1   : > { %v3298_v48 = vmul.f32 %v5108_v59, %v5092_v11  ;;  %v3639_v11 = vsel %vm1022_vm3, %v2896_v3, 0 }
 0xae2   : > { %v3307_v53 = vpack.c.bf16 %v3299_v6, %v3299_v6 }
 0xae3   : > { %v3306_v12 = vpack.c.bf16 %v3298_v48, %v3298_v48 }
 0xae4   : > { %4803 = vmatmul.mubr.msk.bf16.vlgmr.msra.gmra.mrb[128].mxu0 %vm922_vm4, %v3307_v53  ;;  %v3285_v63 = vpop.xlane.xlu0 %3284 }
 0xae5   : > { %4813 = vmatpush3.bf16.msra.mxu0 %v3501_v1  ;;  %5113 = vrcp.f32 %v3285_v63  ;;  %4797 = vmatmul.mubr.msk.bf16.vlgmr.msra.gmra.mrb[124].mxu1 %vm922_vm4, %v3306_v12  ;;  %v3282_v34 = vpop.xlane.xlu1 %3281 }
 0xae6   : > { %4807 = vmatpush3.bf16.msra.mxu1 %v3455_v23  ;;  %5115 = vrcp.f32 %v3282_v34  ;;  %4808 = vmatprep.mubr.msk.bf16.mxu1 %vm5274_vm2, %v5273_v30  ;;  %v4991_v34 = vld [vmem:[#allocation5 + $0xc] ss:$20 sps:$4 sm:$0xff]  }
 0xae7   : > { %v5110_v7 = vpop.eup %5109  ;;  %4814 = vmatprep.mubr.msk.bf16.mxu0 %vm5274_vm2, %v5273_v30  ;;  %4818 = vmatprep.subr.bf16.mxu1 %v5273_v30 }
 0xae8   : > { %v5112_v47 = vpop.eup %5111  ;;  %v3301_v25 = vmul.f32 %v5110_v7, %v5094_v31  ;;  %4824 = vmatprep.subr.bf16.mxu0 %v5273_v30  ;;  %v4992_v7 = vld [vmem:[#allocation5 + $0x34] ss:$20 sps:$4 sm:$0xff]  }
 0xae9   : > { %v3300_v20 = vmul.f32 %v5112_v47, %v6119_v39  ;;  %v4993_v47 = vld [vmem:[#allocation5 + $0x5c] ss:$20 sps:$4 sm:$0xff]  }
 0xaea   : > { %v3309_v58 = vpack.c.bf16 %v3301_v25, %v3301_v25  ;;  %v4995_v25 = vld [vmem:[#allocation5 + $0xac] ss:$20 sps:$4 sm:$0xff]  }
 0xaeb   : > { %v3308_v56 = vpack.c.bf16 %v3300_v20, %v3300_v20  ;;  %v4997_v20 = vld [vmem:[#allocation5 + $0xfc] ss:$20 sps:$4 sm:$0xff]  }
 0xaec   : > { %4815 = vmatmul.mubr.msk.bf16.vlgmr.msra.gmra.mrb[132].mxu0 %vm922_vm4, %v3309_v58  ;;  %v3288_v43 = vpop.xlane.xlu1 %3287  ;;  %v4998_v58 = vld [vmem:[#allocation5 + $0x124] ss:$20 sps:$4 sm:$0xff]  }
 0xaed   : > { %4809 = vmatmul.mubr.msk.bf16.vlgmr.msra.gmra.mrb[128].mxu1 %vm922_vm4, %v3308_v56  ;;  %4825 = vmatpush3.bf16.msra.mxu0 %v3593_v60  ;;  %5117 = vrcp.f32 %v3288_v43  ;;  %v4999_v56 = vld [vmem:[#allocation5 + $0x10] ss:$20 sps:$4 sm:$0xff]   ;;  %v5000_v60 = vld [vmem:[#allocation5 + $0x38] ss:$20 sps:$4 sm:$0xff]   ;;  %v5001_v43 = vld [vmem:[#allocation5 + $0x60] ss:$20 sps:$4 sm:$0xff]  }
 0xaee   : > { %4819 = vmatpush3.bf16.msra.mxu1 %v3547_v24  ;;  %4820 = vmatprep.mubr.msk.bf16.mxu1 %vm5274_vm2, %v5273_v30  ;;  %v5002_v24 = vld [vmem:[#allocation5 + $0x88] ss:$20 sps:$4 sm:$0xff]  }
 0xaef   : > { %v5114_v44 = vpop.eup %5113  ;;  %4826 = vmatprep.mubr.msk.bf16.mxu0 %vm5274_vm2, %v5273_v30  ;;  %4830 = vmatprep.subr.bf16.mxu1 %v5273_v30 }
 0xaf0   : > { %v5116_v0 = vpop.eup %5115  ;;  %v3303_v22 = vmul.f32 %v5114_v44, %v6124_v32  ;;  %4836 = vmatprep.subr.bf16.mxu0 %v5273_v30  ;;  %v5003_v44 = vld [vmem:[#allocation5 + $0xb0] ss:$20 sps:$4 sm:$0xff]  }
 0xaf1   : > { %v3302_v41 = vmul.f32 %v5116_v0, %v6126_v61  ;;  %v5004_v0 = vld [vmem:[#allocation5 + $0xd8] ss:$20 sps:$4 sm:$0xff]  }
 0xaf2   : > { %v3311_v40 = vpack.c.bf16 %v3303_v22, %v3303_v22 }
 0xaf3   : > { %v3310_v38 = vpack.c.bf16 %v3302_v41, %v3302_v41 }
 0xaf4   : > { %4827 = vmatmul.mubr.msk.bf16.vlgmr.msra.gmra.mrb[136].mxu0 %vm922_vm4, %v3311_v40 }
 0xaf5   : > { %4821 = vmatmul.mubr.msk.bf16.vlgmr.msra.gmra.mrb[132].mxu1 %vm922_vm4, %v3310_v38  ;;  %4852 = vmatprep.mubr.msk.bf16.mxu0 %vm5274_vm2, %v5273_v30 }
 0xaf6   : > { %4831 = vmatpush3.bf16.msra.mxu1 %v3639_v11  ;;  %4832 = vmatprep.mubr.msk.bf16.mxu1 %vm5274_vm2, %v5273_v30 }
 0xaf7   : > { %v5118_v18 = vpop.eup %5117  ;;  %4856 = vmatprep.subr.bf16.mxu1 %v5273_v30  ;;  %4837 = vmatpush3.bf16.msra.mxu0 %v4991_v34 }
 0xaf8   : > { %v3304_v57 = vmul.f32 %v5118_v18, %v6132_v15  ;;  %4838 = vmatprep.subr.bf16.mxu0 %v5273_v30 }
 0xafa   : > { %v3312_v19 = vpack.c.bf16 %v3304_v57, %v3304_v57 }
 0xafb   : > { %4839 = vmatpush3.bf16.msra.mxu0 %v4992_v7 }
 0xafc   : > { %4840 = vmatprep.subr.bf16.mxu0 %v5273_v30 }
 0xafd   : > { %4833 = vmatmul.mubr.msk.bf16.vlgmr.msra.gmra.mrb[136].mxu1 %vm922_vm4, %v3312_v19 }
 0xafe   : > { %4872 = vmatprep.mubr.msk.bf16.mxu1 %vm5274_vm2, %v5273_v30  ;;  %4857 = vmatpush3.bf16.msra.mxu1 %v4999_v56 }
 0xaff   : > { %4841 = vmatpush3.bf16.msra.mxu0 %v4993_v47  ;;  %4858 = vmatprep.subr.bf16.mxu1 %v5273_v30 }
 0xb00   : > { %4842 = vmatprep.subr.bf16.mxu0 %v5273_v30 }
 0xb02   : > { %4859 = vmatpush3.bf16.msra.mxu1 %v5000_v60 }
 0xb03   : > { %4843 = vmatpush3.bf16.msra.mxu0 %v4994_v16  ;;  %4860 = vmatprep.subr.bf16.mxu1 %v5273_v30 }
 0xb04   : > { %4844 = vmatprep.subr.bf16.mxu0 %v5273_v30 }
 0xb06   : > { %4861 = vmatpush3.bf16.msra.mxu1 %v5001_v43 }
 0xb07   : > { %4845 = vmatpush3.bf16.msra.mxu0 %v4995_v25  ;;  %4862 = vmatprep.subr.bf16.mxu1 %v5273_v30 }
 0xb08   : > { %4846 = vmatprep.subr.bf16.mxu0 %v5273_v30 }
 0xb0a   : > { %4863 = vmatpush3.bf16.msra.mxu1 %v5002_v24 }
 0xb0b   : > { %4847 = vmatpush3.bf16.msra.mxu0 %v4996_v8  ;;  %4864 = vmatprep.subr.bf16.mxu1 %v5273_v30 }
 0xb0c   : > { %4848 = vmatprep.subr.bf16.mxu0 %v5273_v30 }
 0xb0e   : > { %4865 = vmatpush3.bf16.msra.mxu1 %v5003_v44 }
 0xb0f   : > { %4849 = vmatpush3.bf16.msra.mxu0 %v4997_v20  ;;  %4866 = vmatprep.subr.bf16.mxu1 %v5273_v30 }
 0xb10   : > { %4850 = vmatprep.subr.bf16.mxu0 %v5273_v30 }
 0xb12   : > { %4867 = vmatpush3.bf16.msra.mxu1 %v5004_v0 }
 0xb13   : > { %4851 = vmatpush3.bf16.msra.mxu0 %v4998_v58  ;;  %4868 = vmatprep.subr.bf16.mxu1 %v5273_v30 }
 0xbaf   : > { %v6188_v36 = vpop.f32.mrb[124].mxu0 }
 0xbb0   : > { %3683 = vadd.xlane.f32.xlu0 %v6188_v36  ;;  %v4792_v33 = vpop.f32.mrb[125].mxu0  ;;  %v3707_v42 = vmul.f32 %v6188_v36, %v6188_v36 }
 0xbb1   : > { %v3356_v51 = vpop.f32.mrb[126].mxu0 }
 0xbb2   : > { %v4793_v46 = vpop.f32.mrb[127].mxu0 }
 0xbb4   : > { %3715 = vadd.xlane.f32.xlu0 %v3707_v42 }
 0xbb7   : > { %v6193_v4 = vpop.f32.mrb[128].mxu0 }
 0xbb8   : > { %v6195_v31 = vpop.f32.mrb[124].mxu1  ;;  %3687 = vadd.xlane.f32.xlu0 %v6193_v4  ;;  %v4804_v39 = vpop.f32.mrb[129].mxu0  ;;  %v3709_v14 = vmul.f32 %v6193_v4, %v6193_v4 }
 0xbb9   : > { %3685 = vadd.xlane.f32.xlu1 %v6195_v31  ;;  %v4798_v52 = vpop.f32.mrb[125].mxu1  ;;  %v3448_v54 = vpop.f32.mrb[130].mxu0  ;;  %v3708_v32 = vmul.f32 %v6195_v31, %v6195_v31 }
 0xbba   : > { %v3402_v21 = vpop.f32.mrb[126].mxu1  ;;  %v4805_v2 = vpop.f32.mrb[131].mxu0 }
 0xbbb   : > { %v4799_v49 = vpop.f32.mrb[127].mxu1 }
 0xbbd   : > { %3717 = vadd.xlane.f32.xlu1 %v3708_v32 }
 0xbbf   : > { %v6201_v61 = vpop.f32.mrb[132].mxu0 }
 0xbc0   : > { %v6205_v27 = vpop.f32.mrb[128].mxu1  ;;  %3691 = vadd.xlane.f32.xlu0 %v6201_v61  ;;  %v4816_v15 = vpop.f32.mrb[133].mxu0  ;;  %v3711_v6 = vmul.f32 %v6201_v61, %v6201_v61 }
 0xbc1   : > { %3719 = vadd.xlane.f32.xlu1 %v3709_v14  ;;  %v4810_v62 = vpop.f32.mrb[129].mxu1  ;;  %v3540_v5 = vpop.f32.mrb[134].mxu0  ;;  %v3710_v9 = vmul.f32 %v6205_v27, %v6205_v27  ;;  %v6245_v15 = vld [vmem:[%s6358_s4 + $0xc] ss:$0 sm:$0xff] }
 0xbc2   : > { %v3494_v26 = vpop.f32.mrb[130].mxu1  ;;  %v4817_v37 = vpop.f32.mrb[135].mxu0 }
 0xbc3   : > { %v4811_v55 = vpop.f32.mrb[131].mxu1 }
 0xbc5   : > { %3689 = vadd.xlane.f32.xlu1 %v6205_v27 }
 0xbc7   : > { %v6209_v45 = vpop.f32.mrb[136].mxu0 }
 0xbc8   : > { %v6213_v29 = vpop.f32.mrb[132].mxu1  ;;  %v4828_v35 = vpop.f32.mrb[137].mxu0  ;;  %v3713_v63 = vmul.f32 %v6209_v45, %v6209_v45 }
 0xbc9   : > { %3721 = vadd.xlane.f32.xlu1 %v3710_v9  ;;  %3693 = vadd.xlane.f32.xlu0 %v6213_v29  ;;  %v4822_v17 = vpop.f32.mrb[133].mxu1  ;;  %v3632_v10 = vpop.f32.mrb[138].mxu0  ;;  %v3712_v28 = vmul.f32 %v6213_v29, %v6213_v29 }
 0xbca   : > { %v3586_v13 = vpop.f32.mrb[134].mxu1  ;;  %v4829_v59 = vpop.f32.mrb[139].mxu0 }
 0xbcb   : > { %v4823_v50 = vpop.f32.mrb[135].mxu1 }
 0xbcd   : > { %3723 = vadd.xlane.f32.xlu1 %v3711_v6  ;;  %3695 = vadd.xlane.f32.xlu0 %v6209_v45 }
 0xbd0   : > { %v6221_v48 = vpop.f32.mrb[136].mxu1 }
 0xbd1   : > { %3725 = vadd.xlane.f32.xlu1 %v3712_v28  ;;  %3697 = vadd.xlane.f32.xlu0 %v6221_v48  ;;  %v4834_v53 = vpop.f32.mrb[137].mxu1  ;;  %v3714_v23 = vmul.f32 %v6221_v48, %v6221_v48 }
 0xbd2   : > { %v3678_v12 = vpop.f32.mrb[138].mxu1 }
 0xbd3   : > { %v4835_v1 = vpop.f32.mrb[139].mxu1 }
 0xbd5   : > { %3727 = vadd.xlane.f32.xlu0 %v3713_v63  ;;  %3729 = vadd.xlane.f32.xlu1 %v3714_v23 }
 0xc3d   : > { %v3684_v22 = vpop.xlane.xlu0 %3683 }
 0xc3e   : > { %v3699_v3 = vmul.f32 0.015625, %v3684_v22 }
 0xc40   : > { %v3739_v40 = vmul.f32 %v3699_v3, %v3699_v3  ;;  %v3763_v2 = vsub.f32 %v6188_v36, %v3699_v3  ;;  %v6253_v36 = vld [vmem:[%s6358_s4 + $0xd] ss:$0 sm:$0xff] }
 0xc41   : > { %v3716_v41 = vpop.xlane.xlu0 %3715 }
 0xc42   : > { %v3731_v38 = vmul.f32 0.015625, %v3716_v41  ;;  %v3777_v55 = vmul.f32 %v6245_v15, %v3763_v2 }
 0xc44   : > { %v3747_v11 = vsub.f32 %v3731_v38, %v3739_v40 }
 0xc45   : > { %v3688_v51 = vpop.xlane.xlu0 %3687 }
 0xc46   : > { %v3755_v18 = vmax.f32 %v3747_v11, 0.0  ;;  %v3686_v57 = vpop.xlane.xlu1 %3685  ;;  %v3701_v42 = vmul.f32 0.015625, %v3688_v51 }
 0xc47   : > { %v3700_v19 = vmul.f32 0.015625, %v3686_v57 }
 0xc48   : > { %v3785_v33 = vadd.f32 1e-05, %v3755_v18  ;;  %v3741_v49 = vmul.f32 %v3701_v42, %v3701_v42  ;;  %v3765_v58 = vsub.f32 %v6193_v4, %v3701_v42 }
 0xc49   : > { %v3740_v39 = vmul.f32 %v3700_v19, %v3700_v19  ;;  %v3764_v1 = vsub.f32 %v6195_v31, %v3700_v19 }
 0xc4a   : > { %5119 = vrsqrt.f32 %v3785_v33  ;;  %v3718_v46 = vpop.xlane.xlu1 %3717  ;;  %v3779_v11 = vmul.f32 %v6245_v15, %v3765_v58 }
 0xc4b   : > { %v3732_v52 = vmul.f32 0.015625, %v3718_v46  ;;  %v3778_v56 = vmul.f32 %v6245_v15, %v3764_v1 }
 0xc4d   : > { %v3748_v54 = vsub.f32 %v3732_v52, %v3740_v39  ;;  %v3692_v26 = vpop.xlane.xlu0 %3691 }
 0xc4e   : > { %v3720_v21 = vpop.xlane.xlu1 %3719  ;;  %v6255_v59 = vmul.f32 0.015625, %v3692_v26 }
 0xc4f   : > { %v3756_v32 = vmax.f32 %v3748_v54, 0.0  ;;  %v3733_v14 = vmul.f32 0.015625, %v3720_v21 }
 0xc50   : > { %v3743_v25 = vmul.f32 %v6255_v59, %v6255_v59 }
 0xc51   : > { %v3786_v62 = vadd.f32 1e-05, %v3756_v32  ;;  %v3749_v5 = vsub.f32 %v3733_v14, %v3741_v49 }
 0xc52   : > { %v3690_v37 = vpop.xlane.xlu1 %3689 }
 0xc53   : > { %5121 = vrsqrt.f32 %v3786_v62  ;;  %v3757_v9 = vmax.f32 %v3749_v5, 0.0  ;;  %v6248_v35 = vmul.f32 0.015625, %v3690_v37 }
 0xc54   : > { %v5120_v17 = vpop.eup %5119 }
 0xc55   : > { %v3801_v10 = vmul.f32 %v5120_v17, %v3777_v55  ;;  %v3787_v13 = vadd.f32 1e-05, %v3757_v9  ;;  %v3742_v53 = vmul.f32 %v6248_v35, %v6248_v35  ;;  %v3766_v39 = vsub.f32 %v6205_v27, %v6248_v35 }
 0xc56   : > { %v3722_v50 = vpop.xlane.xlu1 %3721  ;;  %v3694_v6 = vpop.xlane.xlu0 %3693  ;;  %v3767_v17 = vsub.f32 %v6201_v61, %v6255_v59 }
 0xc57   : > { %v3815_v28 = vadd.f32 %v6253_v36, %v3801_v10  ;;  %5123 = vrsqrt.f32 %v3787_v13  ;;  %v3734_v12 = vmul.f32 0.015625, %v3722_v50  ;;  %v6261_v34 = vmul.f32 0.015625, %v3694_v6 }
 0xc58   : > { %v3780_v6 = vmul.f32 %v6245_v15, %v3766_v39 }
 0xc59   : > { %v3823_v63 = vrot.slane %v3815_v28, 4  ;;  %v3750_v23 = vsub.f32 %v3734_v12, %v3742_v53  ;;  %v3744_v0 = vmul.f32 %v6261_v34, %v6261_v34 }
 0xc5a   : > { %v3724_v7 = vpop.xlane.xlu1 %3723  ;;  %v3696_v47 = vpop.xlane.xlu0 %3695 }
 0xc5b   : > { %v3824_v16 = vmax.f32 %v3815_v28, %v3823_v63  ;;  %v3758_v8 = vmax.f32 %v3750_v23, 0.0  ;;  %v3735_v20 = vmul.f32 0.015625, %v3724_v7  ;;  %v6269_v40 = vmul.f32 0.015625, %v3696_v47 }
 0xc5d   : > { %v5122_v60 = vpop.eup %5121  ;;  %v3825_v43 = vrot.slane %v3824_v16, 2  ;;  %v3788_v24 = vadd.f32 1e-05, %v3758_v8  ;;  %v3751_v31 = vsub.f32 %v3735_v20, %v3743_v25  ;;  %v3745_v21 = vmul.f32 %v6269_v40, %v6269_v40 }
 0xc5e   : > { %v3802_v44 = vmul.f32 %v5122_v60, %v3778_v56  ;;  %v3726_v22 = vpop.xlane.xlu1 %3725  ;;  %v3698_v3 = vpop.xlane.xlu0 %3697  ;;  %v3768_v25 = vsub.f32 %v6213_v29, %v6261_v34 }
 0xc5f   : > { %5125 = vrsqrt.f32 %v3788_v24  ;;  %v3759_v41 = vmax.f32 %v3751_v31, 0.0  ;;  %v3736_v38 = vmul.f32 0.015625, %v3726_v22  ;;  %v6273_v18 = vmul.f32 0.015625, %v3698_v3 }
 0xc60   : > { %v3816_v4 = vadd.f32 %v6253_v36, %v3802_v44  ;;  %v3826_v19 = vmax.f32 %v3824_v16, %v3825_v43  ;;  %v3781_v16 = vmul.f32 %v6245_v15, %v3767_v17  ;;  %v3782_v31 = vmul.f32 %v6245_v15, %v3768_v25 }
 0xc61   : > { %v5124_v57 = vpop.eup %5123  ;;  %v3789_v33 = vadd.f32 1e-05, %v3759_v41  ;;  %v3752_v51 = vsub.f32 %v3736_v38, %v3744_v0  ;;  %v3746_v62 = vmul.f32 %v6273_v18, %v6273_v18  ;;  %v3769_v44 = vsub.f32 %v6209_v45, %v6269_v40 }
 0xc62   : > { %v3829_v46 = vrot.slane %v3816_v4, 4  ;;  %v3803_v42 = vmul.f32 %v5124_v57, %v3779_v11  ;;  %v3728_v52 = vpop.xlane.xlu0 %3727  ;;  %v3730_v54 = vpop.xlane.xlu1 %3729  ;;  %v3827_v26 = vrot.slane %v3826_v19, 1  ;;  %v3770_v38 = vsub.f32 %v6221_v48, %v6273_v18 }
 0xc63   : > { %5127 = vrsqrt.f32 %v3789_v33  ;;  %v3760_v2 = vmax.f32 %v3752_v51, 0.0  ;;  %v3737_v49 = vmul.f32 0.015625, %v3728_v52  ;;  %v3738_v5 = vmul.f32 0.015625, %v3730_v54 }
 0xc64   : > { %v3830_v32 = vmax.f32 %v3816_v4, %v3829_v46  ;;  %v3817_v14 = vadd.f32 %v6253_v36, %v3803_v42  ;;  %v3828_v12 = vmax.f32 %v3826_v19, %v3827_v26  ;;  %v3783_v33 = vmul.f32 %v6245_v15, %v3769_v44 }
 0xc65   : > { %v3790_v37 = vadd.f32 1e-05, %v3760_v2  ;;  %v3753_v55 = vsub.f32 %v3737_v49, %v3745_v21  ;;  %v3754_v35 = vsub.f32 %v3738_v5, %v3746_v62  ;;  %v3784_v52 = vmul.f32 %v6245_v15, %v3770_v38 }
 0xc66   : > { %v3831_v9 = vrot.slane %v3830_v32, 2  ;;  %v3835_v27 = vrot.slane %v3817_v14, 4  ;;  %v3871_v58 = vpack.c.bf16 %v3828_v12, %v3828_v12 }
 0xc67   : > { %5129 = vrsqrt.f32 %v3790_v37  ;;  %v3761_v10 = vmax.f32 %v3753_v55, 0.0  ;;  %v3762_v28 = vmax.f32 %v3754_v35, 0.0 }
 0xc68   : > { %v3832_v13 = vmax.f32 %v3830_v32, %v3831_v9  ;;  %v3836_v50 = vmax.f32 %v3817_v14, %v3835_v27  ;;  %v3910_v41 = vunpack.c.l.b16 %v3871_v58 }
 0xc69   : > { %v5126_v53 = vpop.eup %5125  ;;  %v3791_v1 = vadd.f32 1e-05, %v3761_v10  ;;  %v3792_v47 = vadd.f32 1e-05, %v3762_v28 }
 0xc6a   : > { %v3833_v63 = vrot.slane %v3832_v13, 1  ;;  %v3837_v23 = vrot.slane %v3836_v50, 2  ;;  %v3804_v7 = vmul.f32 %v5126_v53, %v3780_v6 }
 0xc6b   : > { %5131 = vrsqrt.f32 %v3791_v1 }
 0xc6c   : > { %v3834_v61 = vmax.f32 %v3832_v13, %v3833_v63  ;;  %v3838_v59 = vmax.f32 %v3836_v50, %v3837_v23  ;;  %v3818_v8 = vadd.f32 %v6253_v36, %v3804_v7  ;;  %5133 = vrsqrt.f32 %v3792_v47 }
 0xc6d   : > { %v5128_v20 = vpop.eup %5127 }
 0xc6e   : > { %v3872_v56 = vpack.c.bf16 %v3834_v61, %v3834_v61  ;;  %v3839_v60 = vrot.slane %v3838_v59, 1  ;;  %v3841_v43 = vrot.slane %v3818_v8, 4  ;;  %v3805_v24 = vmul.f32 %v5128_v20, %v3781_v16 }
 0xc70   : > { %v3911_v0 = vunpack.c.l.b16 %v3872_v56  ;;  %v3840_v29 = vmax.f32 %v3838_v59, %v3839_v60  ;;  %v3842_v34 = vmax.f32 %v3818_v8, %v3841_v43  ;;  %v3819_v22 = vadd.f32 %v6253_v36, %v3805_v24 }
 0xc71   : > { %v5130_v3 = vpop.eup %5129 }
 0xc72   : > { %v3873_v11 = vpack.c.bf16 %v3840_v29, %v3840_v29  ;;  %v3843_v4 = vrot.slane %v3842_v34, 2  ;;  %v3847_v57 = vrot.slane %v3819_v22, 4  ;;  %v3806_v19 = vmul.f32 %v5130_v3, %v3782_v31  ;;  %v4336_v3 = vld [vmem:[%s6358_s4 + $0xe] ss:$0 sm:$0xff] }
 0xc73   : > { %v3919_v51 = vsel %vm3918_vm5, %v3911_v0, %v3910_v41 }
 0xc74   : > { %v3844_v45 = vmax.f32 %v3842_v34, %v3843_v4  ;;  %v3848_v40 = vmax.f32 %v3819_v22, %v3847_v57  ;;  %v3820_v46 = vadd.f32 %v6253_v36, %v3806_v19  ;;  %v3912_v42 = vunpack.c.l.b16 %v3873_v11  ;;  %v5005_v34 = vld [vmem:[#allocation5 + $0x100] ss:$20 sps:$4 sm:$0xff]   ;;  %v5006_v22 = vld [vmem:[#allocation5 + $0x128] ss:$20 sps:$4 sm:$0xff]  }
 0xc75   : > { %v5132_v39 = vpop.eup %5131  ;;  %4869 = vmatpush3.bf16.msra.mxu1 %v5005_v34 }
 0xc76   : > { %v5134_v54 = vpop.eup %5133  ;;  %v3845_v21 = vrot.slane %v3844_v45, 1  ;;  %v3849_v2 = vrot.slane %v3848_v40, 2  ;;  %v3853_v48 = vrot.slane %v3820_v46, 4  ;;  %v3807_v18 = vmul.f32 %v5132_v39, %v3783_v33  ;;  %4870 = vmatprep.subr.bf16.mxu1 %v5273_v30 }
 0xc77   : > { %v3808_v49 = vmul.f32 %v5134_v54, %v3784_v52  ;;  %v3921_v32 = vsel %vm3920_vm6, %v3912_v42, %v3919_v51  ;;  %v4345_v51 = vld [vmem:[%s6358_s4 + $0xf] ss:$0 sm:$0xff] }
 0xc78   : > { %v3850_v14 = vmax.f32 %v3848_v40, %v3849_v2  ;;  %v3854_v62 = vmax.f32 %v3820_v46, %v3853_v48  ;;  %v3821_v5 = vadd.f32 %v6253_v36, %v3807_v18  ;;  %v3846_v26 = vmax.f32 %v3844_v45, %v3845_v21 }
 0xc79   : > { %v3822_v37 = vadd.f32 %v6253_v36, %v3808_v49  ;;  %4871 = vmatpush3.bf16.msra.mxu1 %v5006_v22 }
 0xc7a   : > { %v3855_v55 = vrot.slane %v3854_v62, 2  ;;  %v3859_v9 = vrot.slane %v3821_v5, 4  ;;  %v3851_v27 = vrot.slane %v3850_v14, 1  ;;  %v3874_v35 = vpack.c.bf16 %v3846_v26, %v3846_v26 }
 0xc7b   : > { %v3865_v17 = vrot.slane %v3822_v37, 4 }
 0xc7c   : > { %v3860_v15 = vmax.f32 %v3821_v5, %v3859_v9  ;;  %v3852_v10 = vmax.f32 %v3850_v14, %v3851_v27  ;;  %v3856_v13 = vmax.f32 %v3854_v62, %v3855_v55  ;;  %v3913_v50 = vunpack.c.l.b16 %v3874_v35 }
 0xc7d   : > { %v3866_v6 = vmax.f32 %v3822_v37, %v3865_v17 }
 0xc7e   : > { %v3857_v28 = vrot.slane %v3856_v13, 1  ;;  %v3861_v53 = vrot.slane %v3860_v15, 2  ;;  %v3875_v12 = vpack.c.bf16 %v3852_v10, %v3852_v10  ;;  %v3923_v1 = vsel %vm3922_vm7, %v3913_v50, %v3921_v32 }
 0xc7f   : > { %v3867_v63 = vrot.slane %v3866_v6, 2 }
 0xc80   : > { %v3858_v23 = vmax.f32 %v3856_v13, %v3857_v28  ;;  %v3862_v7 = vmax.f32 %v3860_v15, %v3861_v53  ;;  %v3914_v36 = vunpack.c.l.b16 %v3875_v12 }
 0xc81   : > { %v3868_v47 = vmax.f32 %v3866_v6, %v3867_v63 }
 0xc82   : > { %v3863_v16 = vrot.slane %v3862_v7, 1  ;;  %v3876_v25 = vpack.c.bf16 %v3858_v23, %v3858_v23  ;;  %v3925_v61 = vsel %vm3924_vm8, %v3914_v36, %v3923_v1 }
 0xc83   : > { %v3869_v59 = vrot.slane %v3868_v47, 1 }
 0xc84   : > { %v3864_v8 = vmax.f32 %v3862_v7, %v3863_v16  ;;  %v3915_v20 = vunpack.c.l.b16 %v3876_v25 }
 0xc85   : > { %v3870_v58 = vmax.f32 %v3868_v47, %v3869_v59 }
 0xc86   : > { %v3877_v56 = vpack.c.bf16 %v3864_v8, %v3864_v8  ;;  %v3927_v60 = vsel %vm3926_vm9, %v3915_v20, %v3925_v61 }
 0xc87   : > { %v3878_v43 = vpack.c.bf16 %v3870_v58, %v3870_v58 }
 0xc88   : > { %v3916_v24 = vunpack.c.l.b16 %v3877_v56 }
 0xc89   : > { %v3917_v31 = vunpack.c.l.b16 %v3878_v43 }
 0xc8a   : > { %v3929_v44 = vsel %vm3928_vm10, %v3916_v24, %v3927_v60 }
 0xc8b   : > { %v3931_v0 = vsel %vm3930_vm11, %v3917_v31, %v3929_v44 }
 0xc8c   : > { %v3932_v29 = vpack.c.b16 %v3931_v0, %v3931_v0 }
 0xc8e   : > { %4853 = vmatmul.mubr.bf16.vlgmr.msra.gmra.mrb[140].mxu0 %v3932_v29 }
 0xd61   : > { %v4016_v41 = vpop.f32.mrb[140].mxu0 }
 0xd62   : > { %v4017_v38 = vadd.f32 %v4336_v3, %v4016_v41  ;;  %v4854_v11 = vpop.f32.mrb[141].mxu0 }
 0xd63   : > { %v4019_v4 = vpop.f32.mrb[142].mxu0 }
 0xd64   : > { %v4022_v57 = vmax.f32 %v4017_v38, 0.0  ;;  %v4855_v19 = vpop.f32.mrb[143].mxu0 }
 0xd66   : > { %v4023_v33 = vpack.c.bf16 %v4022_v57, %v4022_v57 }
 0xd68   : > { %4873 = vmatmul.mubr.bf16.vlgmr.msra.gmra.mrb[140].mxu1 %v4023_v33 }
 0xe3b   : > { %v4129_v30 = vpop.f32.mrb[140].mxu1 }
 0xe3c   : > { %v4130_v45 = vadd.f32 %v4345_v51, %v4129_v30  ;;  %v4874_v40 = vpop.f32.mrb[141].mxu1 }
 0xe3d   : > { %v4132_v46 = vpop.f32.mrb[142].mxu1 }
 0xe3e   : > { %4135 = vmax.xlane.f32.xlu0 %v4130_v45  ;;  %v4875_v42 = vpop.f32.mrb[143].mxu1 }
 0xecb   : > { %v4136_v39 = vpop.xlane.xlu0 %4135 }
 0xecc   : > { %v4137_v52 = vsub.f32 %v4130_v45, %v4136_v39 }
 0xece   : > { %v4138_v54 = vmul.f32 1.442695, %v4137_v52 }
 0xed0   : > { %5135 = vpow2.f32 %v4138_v54 }
 0xeda   : > { %v5136_v21 = vpop.eup %5135 }
 0xedb   : > { %4140 = vadd.xlane.f32.xlu1 %v5136_v21 }
 0xf68   : > { %v4141_v2 = vpop.xlane.xlu1 %4140 }
 0xf69   : > { %5137 = vrcp.f32 %v4141_v2 }
 0xf73   : > { %v5138_v48 = vpop.eup %5137 }
 0xf74   : > { %v4143_v18 = vmul.f32 %v5138_v48, %v5136_v21 }
 0xf76   : > { %4144 = vst [vmem:[%s246_s15] sm:$0xff] %v4143_v18 }
 0xf77   : > { %5208 = shalt.err (!%p5205_p11)
}
 0xf78   : > { %s5209_s26 = scalar_lea.hbm %s6312_s23, 128  ;;  %s5213_s11 = scalar_lea.hbm %s6359_s5, 256 }
 0xf79   : > { %p5210_p13 = scmp.ne.s32.totalorder %s6312_s23, %s5209_s26  ;;  %p5214_p5 = scmp.lt.u32.totalorder %s6312_s23, %s6359_s5 }
 0xf7a   : > { %p5215_p9 = scmp.lt.u32.totalorder %s5213_s11, %s5209_s26  ;;  %p5217_p10 = scmp.lt.u32.totalorder %s5209_s26, %s6312_s23 }
 0xf7b   : > { %p5211_p0 = pnand %p5210_p13, %p6372_p1 }
 0xf7c   : > { %p5216_p12 = por %p5215_p9, %p5214_p5 }
 0xf7d   : > { %p5212_p6 = pneg %p5211_p0 }
 0xf7e   : > { %p5218_p2 = por %p5217_p10, %p5216_p12 }
 0xf80   : > { %p5219_p3 = pnand %p5218_p2, %p5212_p6 }
 0xf82   : > { %5222 = shalt.err (!%p5219_p3)
}
 0xf83   : > { %4884 = dma.vmem_to_hbm [thread:$0]  (%p6372_p1), %s6314_s7, 128, %s6312_s23, %s4146_s25  }
 0xf84 PF: > { %p4901_p4 = scmp.ge.s32.totalorder %s5265_s21, 2  ;;  %s4171_s14 = sand.u32 1, %s5253_s18  }
 0xf85   : > { %p6373_p7 = scmp.ne.s32.totalorder %s6364_s29, 0  ;;  %s4172_s15 = scalar_lea.sflag [#allocation4], %s4171_s14 }
 0xf87   : > { %p4894_p8 = pnand %p4901_p4, %p6373_p7 }
 0xf89   : > { %5248 = dma.done.wait (!%p4894_p8), %s4172_s15, 128  }
 0xf8a   : > { %5250 = vsyncadd (!%p4894_p8), %s4172_s15, 4294967168  ;;  %p17_p11 = scmp.ge.s32.totalorder %s5331_s24, 4   ;;  %s6374_s18 = smov %s5257_s19 }
 0xf8b   : > { %s6375_s19 = smov %s5261_s20  ;;  %s6376_s20 = smov %s5342_s27 }
 0xf8c   : > { %s6377_s21 = smov %s5331_s24  ;;  %19 = sbr.rel (!%p17_p11) target bundleno = 5 (0x5), region = 84 }
 0xf93   :  { %4177 = vsyncpa [#allocation3], 1 }
 0xf94   :  { %4179 = vsyncpa [#allocation3 + $0x1], 1 }
 0xf95   :  { %4180 = vsyncpa [#allocation6], 1 }
 0xf96   :  { %4181 = vsyncpa [#allocation4], 1 }
 0xf97   :  { %4183 = vsyncpa [#allocation4 + $0x1], 1 }

</bundles_post_ra>
